<compile_context>
chip_gen: v7x
topology: tpu7x:2x2x1
jax: 0.10.0
libtpu: 0.0.40
codegen_flags: <defaults>
</compile_context>

<pallas_src>
import math

import jax
import jax.numpy as jnp
from jax.experimental import pallas as pl
from jax.experimental.pallas import tpu as pltpu

# ----------------------------------------------------------------------------
# Synthetic SamVisionConfig (small, deterministic)
# ----------------------------------------------------------------------------
CFG = dict(
    image_size=16,
    patch_size=8,
    num_channels=3,            # > 1 -> is_rgb_input == True (gray input repeated to 3 ch)
    hidden_size=32,
    num_attention_heads=2,
    num_hidden_layers=2,
    mlp_ratio=4.0,
    output_channels=32,
    window_size=2,
    global_attn_indexes=(1,),
    use_abs_pos=True,
    use_rel_pos=True,
    qkv_bias=True,
    layer_norm_eps=1e-6,
)

# Activations travel between kernels in bf16 (halves HBM traffic on the mem-bound glue);
# all matmul accumulation, LayerNorm statistics and softmax math stay in fp32 in-kernel.
MXU_DTYPE = jnp.bfloat16
ACC_DTYPE = jnp.float32


def _default_vmem_limit():
    """Generation-aware scoped-VMEM budget (v5e/v6e: 128 MiB physical, v7x: 64 MiB)."""
    cap = 128 * 1024 * 1024
    try:
        info = pltpu.get_tpu_info()
        cap = int(getattr(info, "vmem_capacity_bytes", cap))
    except Exception:
        pass
    return int(max(32 * 1024 * 1024, min(96 * 1024 * 1024, cap * 3 // 4)))


VMEM_LIMIT = _default_vmem_limit()

# Preferred tile sizes.  Full-dim blocks are used whenever a dim is smaller, and for
# large dims the largest aligned *divisor* of the dim is preferred over padding
# (e.g. K=768 -> bk=384 instead of padding 768->1024).
TILE_M, TILE_N, TILE_K = 512, 512, 512


def _round_up(x, m):
    return (x + m - 1) // m * m


def _pad_to(x, shape):
    pads = [(0, t - s) for s, t in zip(x.shape, shape)]
    if all(p == (0, 0) for p in pads):
        return x
    return jnp.pad(x, pads)


def _pick(dim, pref, align):
    """Full-dim block when small; else largest align-multiple divisor of dim <= pref;
    else fall back to pref (with padding)."""
    if dim <= pref:
        return dim
    d = (pref // align) * align
    while d >= align:
        if dim % d == 0:
            return d
        d -= align
    return pref


def _gelu(x):
    # TODO(synk): torch nn.GELU defaults to exact erf GELU; tanh approximation used here
    # (erf lowering support inside Mosaic kernels is not guaranteed).
    return jax.nn.gelu(x, approximate=True)


# ----------------------------------------------------------------------------
# Pallas kernels
# ----------------------------------------------------------------------------
def pallas_matmul(x, w, bias=None, residual=None, act=None, post_ln=None,
                  out_dtype=jnp.float32, tm=TILE_M, tn=TILE_N, tk=TILE_K):
    """y = epilogue(x @ w), tiled (tm, tn, tk) with an fp32 VMEM accumulator.

    Epilogue (last K step): +bias, act(), +residual (residual may be bf16, upcast
    in-kernel) and optionally a LayerNorm over the output channels
    (post_ln=(gamma, beta, eps) -> needs the full N per block).
    MXU inputs are bf16; accumulation stays fp32.
    """
    M, K = x.shape
    K2, N = w.shape
    assert K == K2

    bm, bn, bk = _pick(M, tm, 8), _pick(N, tn, 128), _pick(K, tk, 128)
    if post_ln is not None:
        bn = N                          # channel-LN epilogue needs the whole output row
    Mp, Np, Kp = _round_up(M, bm), _round_up(N, bn), _round_up(K, bk)

    has_bias = bias is not None
    has_res = residual is not None
    has_pln = post_ln is not None
    n_k = Kp // bk

    inputs = [_pad_to(x.astype(MXU_DTYPE), (Mp, Kp)),
              _pad_to(w.astype(MXU_DTYPE), (Kp, Np))]
    in_specs = [pl.BlockSpec((bm, bk), lambda i, j, kk: (i, kk)),
                pl.BlockSpec((bk, bn), lambda i, j, kk: (kk, j))]
    if has_bias:
        inputs.append(_pad_to(bias.reshape(1, N).astype(ACC_DTYPE), (1, Np)))
        in_specs.append(pl.BlockSpec((1, bn), lambda i, j, kk: (0, j)))
    if has_res:
        inputs.append(_pad_to(residual, (Mp, Np)))                 # keep bf16 in HBM
        in_specs.append(pl.BlockSpec((bm, bn), lambda i, j, kk: (i, j)))
    if has_pln:
        g_ln, b_ln, eps_ln = post_ln
        inputs += [g_ln.reshape(1, N).astype(ACC_DTYPE),
                   b_ln.reshape(1, N).astype(ACC_DTYPE)]
        in_specs += [pl.BlockSpec((1, N), lambda i, j, kk: (0, 0)),
                     pl.BlockSpec((1, N), lambda i, j, kk: (0, 0))]
    else:
        eps_ln = 0.0

    def kernel(*refs):
        x_ref, w_ref = refs[0], refs[1]
        pos = 2
        b_ref = r_ref = g_ref = be_ref = None
        if has_bias:
            b_ref = refs[pos]; pos += 1
        if has_res:
            r_ref = refs[pos]; pos += 1
        if has_pln:
            g_ref, be_ref = refs[pos], refs[pos + 1]; pos += 2
        o_ref, acc_ref = refs[pos], refs[pos + 1]

        kk = pl.program_id(2)

        @pl.when(kk == 0)
        def _():
            acc_ref[...] = jnp.zeros(acc_ref.shape, acc_ref.dtype)

        acc_ref[...] += jnp.dot(x_ref[...], w_ref[...],
                                preferred_element_type=jnp.float32)

        @pl.when(kk == n_k - 1)
        def _():
            y = acc_ref[...]
            if has_bias:
                y = y + b_ref[...]
            if act is not None:
                y = act(y)
            if has_res:
                y = y + r_ref[...].astype(jnp.float32)
            if has_pln:
                mu = jnp.mean(y, axis=-1, keepdims=True)
                var = jnp.mean((y - mu) ** 2, axis=-1, keepdims=True)
                y = (y - mu) * jax.lax.rsqrt(var + eps_ln)
                y = y * g_ref[...] + be_ref[...]
            o_ref[...] = y.astype(o_ref.dtype)

    out = pl.pallas_call(
        kernel,
        out_shape=jax.ShapeDtypeStruct((Mp, Np), out_dtype),
        grid=(Mp // bm, Np // bn, n_k),
        in_specs=in_specs,
        out_specs=pl.BlockSpec((bm, bn), lambda i, j, kk: (i, j)),
        scratch_shapes=[pltpu.VMEM((bm, bn), jnp.float32)],
        compiler_params=pltpu.CompilerParams(
            dimension_semantics=("parallel", "parallel", "arbitrary"),
            vmem_limit_bytes=VMEM_LIMIT),
    )(*inputs)
    if Mp != M or Np != N:
        out = out[:M, :N]
    return out


def pallas_ln_matmul(x, gamma, beta, w, bias=None, act=None, eps=1e-6,
                     out_dtype=jnp.float32, tm=TILE_M, tn=TILE_N):
    """y = act(LayerNorm(x) @ w + bias) fused (pre-LN needs the full K per block).

    Used for LN1+QKV and LN2+MLP-lin1+GELU so the normalized activation never
    round-trips HBM.  x may be bf16; LN stats are computed in fp32 in-kernel.
    """
    M, K = x.shape
    K2, N = w.shape
    assert K == K2

    bm, bn = _pick(M, tm, 8), _pick(N, tn, 128)
    Mp, Np = _round_up(M, bm), _round_up(N, bn)
    has_bias = bias is not None

    inputs = [_pad_to(x, (Mp, K)),
              gamma.reshape(1, K).astype(jnp.float32),
              beta.reshape(1, K).astype(jnp.float32),
              _pad_to(w.astype(MXU_DTYPE), (K, Np))]
    in_specs = [pl.BlockSpec((bm, K), lambda i, j: (i, 0)),
                pl.BlockSpec((1, K), lambda i, j: (0, 0)),
                pl.BlockSpec((1, K), lambda i, j: (0, 0)),
                pl.BlockSpec((K, bn), lambda i, j: (0, j))]
    if has_bias:
        inputs.append(_pad_to(bias.reshape(1, N).astype(ACC_DTYPE), (1, Np)))
        in_specs.append(pl.BlockSpec((1, bn), lambda i, j: (0, j)))

    def kernel(*refs):
        x_ref, g_ref, be_ref, w_ref = refs[:4]
        b_ref = refs[4] if has_bias else None
        o_ref = refs[-1]

        xv = x_ref[...].astype(jnp.float32)
        mu = jnp.mean(xv, axis=-1, keepdims=True)
        var = jnp.mean((xv - mu) ** 2, axis=-1, keepdims=True)
        xn = (xv - mu) * jax.lax.rsqrt(var + eps)
        xn = xn * g_ref[...] + be_ref[...]
        y = jnp.dot(xn.astype(MXU_DTYPE), w_ref[...],
                    preferred_element_type=jnp.float32)
        if has_bias:
            y = y + b_ref[...]
        if act is not None:
            y = act(y)
        o_ref[...] = y.astype(o_ref.dtype)

    out = pl.pallas_call(
        kernel,
        out_shape=jax.ShapeDtypeStruct((Mp, Np), out_dtype),
        grid=(Mp // bm, Np // bn),
        in_specs=in_specs,
        out_specs=pl.BlockSpec((bm, bn), lambda i, j: (i, j)),
        compiler_params=pltpu.CompilerParams(
            dimension_semantics=("parallel", "parallel"),
            vmem_limit_bytes=VMEM_LIMIT),
    )(*inputs)
    if Mp != M or Np != N:
        out = out[:M, :N]
    return out


def pallas_layernorm(x2d, gamma, beta, eps, out_dtype=jnp.float32, tm=512):
    """Row-tiled LayerNorm over the last dim of a (M, C) view (padded-window fallback only)."""
    M, C = x2d.shape
    bm = _pick(M, tm, 8)
    Mp = _round_up(M, bm)

    def kernel(x_ref, g_ref, b_ref, o_ref):
        xv = x_ref[...].astype(jnp.float32)
        mu = jnp.mean(xv, axis=-1, keepdims=True)
        var = jnp.mean((xv - mu) ** 2, axis=-1, keepdims=True)
        y = (xv - mu) * jax.lax.rsqrt(var + eps)
        o_ref[...] = (y * g_ref[...] + b_ref[...]).astype(o_ref.dtype)

    out = pl.pallas_call(
        kernel,
        out_shape=jax.ShapeDtypeStruct((Mp, C), out_dtype),
        grid=(Mp // bm,),
        in_specs=[pl.BlockSpec((bm, C), lambda i: (i, 0)),
                  pl.BlockSpec((1, C), lambda i: (0, 0)),
                  pl.BlockSpec((1, C), lambda i: (0, 0))],
        out_specs=pl.BlockSpec((bm, C), lambda i: (i, 0)),
        compiler_params=pltpu.CompilerParams(
            dimension_semantics=("parallel",),
            vmem_limit_bytes=VMEM_LIMIT),
    )(_pad_to(x2d, (Mp, C)),
      gamma.reshape(1, C).astype(jnp.float32),
      beta.reshape(1, C).astype(jnp.float32))
    return out[:M] if Mp != M else out


def pallas_flash_attention(q, k, v, rel_hw, *, Hk, Wk, out_dtype=jnp.float32,
                           kv_chunk_target=512):
    """softmax(q @ k^T + decomposed rel-pos bias) @ v, flash-style.

    Online softmax over bounded KV chunks (whole key-grid rows, ~kv_chunk_target keys per
    chunk) so the (BH, L, L) bias/score matrix is never materialized and VMEM stays small
    even at real SAM sizes (L=4096, a hazard on v7x's 64 MiB VMEM).
    The softmax scale is pre-folded into K (at parameter prep); the rel-pos expansion
    matrix is precomputed once outside the kernel (chunk-invariant since chunks are
    row-aligned) and applied with a single bf16 2-D MXU matmul per KV step.
    rel_hw is the concatenation [rel_h | rel_w] of shape (BH, L, Hk + Wk).
    """
    BH, L, D = q.shape
    HW = Hk + Wk
    assert Hk * Wk == L and rel_hw.shape == (BH, L, HW)

    # Heads/windows batched per grid step to fill sublanes; keep >=2 blocks on a
    # parallel grid axis so v7x's second TensorCore gets work.
    bh_blk = math.gcd(BH, 8)
    while bh_blk > 1 and BH // bh_blk < 2:
        bh_blk //= 2

    if L <= 256:
        tq = L
    elif L % 256 == 0:
        tq = 256                       # fills the 256-row MXU on v6e/v7x
    elif L % 128 == 0:
        tq = 128
    else:
        tq = L

    if L <= kv_chunk_target:
        tkh = Hk
    else:
        tkh = max(1, kv_chunk_target // Wk)
        while tkh > 1 and (Hk % tkh != 0 or (tkh * Wk) % 128 != 0):
            tkh -= 1
        if Hk % tkh != 0 or (tkh * Wk) % 128 != 0:
            tkh = Hk                   # fallback: no KV tiling
    tkv = tkh * Wk
    n_kv = Hk // tkv * Wk if False else Hk // tkh   # n_kv = Hk // tkh

    q = q.astype(MXU_DTYPE)
    k = k.astype(MXU_DTYPE)
    v = v.astype(MXU_DTYPE)
    rel_hw = rel_hw.astype(MXU_DTYPE)

    # Rel-pos expansion matrix, built once (constant-folded under jit):
    #   e[r, kidx]      = 1  if kidx // Wk == r   (key-row selector, r < Hk)
    #   e[Hk+w, kidx]   = 1  if kidx %  Wk == w   (key-col selector)
    kidx = jnp.arange(L, dtype=jnp.int32)
    eh = (kidx[None, :] // Wk == jnp.arange(Hk, dtype=jnp.int32)[:, None])
    ew = (kidx[None, :] % Wk == jnp.arange(Wk, dtype=jnp.int32)[:, None])
    e_expand = jnp.concatenate([eh, ew], axis=0).astype(MXU_DTYPE)   # (Hk+Wk, L)

    def kernel(q_ref, k_ref, v_ref, rhw_ref, e_ref, o_ref, m_sc, l_sc, acc_sc):
        ki = pl.program_id(2)

        @pl.when(ki == 0)
        def _():
            m_sc[...] = jnp.full(m_sc.shape, -jnp.inf, m_sc.dtype)
            l_sc[...] = jnp.zeros(l_sc.shape, l_sc.dtype)
            acc_sc[...] = jnp.zeros(acc_sc.shape, acc_sc.dtype)

        # scores (scale already folded into k at param prep)
        s = jnp.einsum('bqd,bkd->bqk', q_ref[...], k_ref[...],
                       preferred_element_type=jnp.float32)            # (bh, tq, tkv) fp32

        # decomposed rel-pos bias for this KV chunk: one 2-D bf16 expansion matmul
        bias = jnp.dot(rhw_ref[...].reshape(bh_blk * tq, HW), e_ref[...],
                       preferred_element_type=jnp.float32).reshape(bh_blk, tq, tkv)
        s = s + bias

        m_prev = m_sc[...]
        m_new = jnp.maximum(m_prev, jnp.max(s, axis=-1, keepdims=True))
        alpha = jnp.exp(m_prev - m_new)
        p = jnp.exp(s - m_new)
        l_sc[...] = alpha * l_sc[...] + jnp.sum(p, axis=-1, keepdims=True)
        acc_sc[...] = alpha * acc_sc[...] + jnp.einsum(
            'bqk,bkd->bqd', p.astype(MXU_DTYPE), v_ref[...],
            preferred_element_type=jnp.float32)
        m_sc[...] = m_new

        @pl.when(ki == pl.num_programs(2) - 1)
        def _():
            o_ref[...] = (acc_sc[...] *
                          pl.reciprocal(l_sc[...], approx=True)).astype(o_ref.dtype)

    return pl.pallas_call(
        kernel,
        out_shape=jax.ShapeDtypeStruct((BH, L, D), out_dtype),
        grid=(BH // bh_blk, L // tq, n_kv),
        in_specs=[
            pl.BlockSpec((bh_blk, tq, D), lambda b, qi, ki: (b, qi, 0)),
            pl.BlockSpec((bh_blk, tkv, D), lambda b, qi, ki: (b, ki, 0)),
            pl.BlockSpec((bh_blk, tkv, D), lambda b, qi, ki: (b, ki, 0)),
            pl.BlockSpec((bh_blk, tq, HW), lambda b, qi, ki: (b, qi, 0)),
            pl.BlockSpec((HW, tkv), lambda b, qi, ki: (0, ki)),
        ],
        out_specs=pl.BlockSpec((bh_blk, tq, D), lambda b, qi, ki: (b, qi, 0)),
        scratch_shapes=[pltpu.VMEM((bh_blk, tq, 1), jnp.float32),
                        pltpu.VMEM((bh_blk, tq, 1), jnp.float32),
                        pltpu.VMEM((bh_blk, tq, D), jnp.float32)],
        compiler_params=pltpu.CompilerParams(
            dimension_semantics=("parallel", "parallel", "arbitrary"),
            vmem_limit_bytes=VMEM_LIMIT),
    )(q, k, v, rel_hw, e_expand)


def pallas_conv3x3_ln(x, weight_taps, gamma, beta, eps, out_dtype=jnp.float32):
    """3x3 'same' conv (no bias) + channel LayerNorm, fused in a single kernel.

    Reads the zero-padded per-batch block once and accumulates the 9 taps in-VMEM
    (no im2col HBM blow-up); each tap matmul has M = H*W so the MXU rows stay full.
    x: (B, H, W, C) channels-last; weight_taps: (9, C, Cout) pre-transposed bf16.
    Returns (B, H*W, Cout).
    """
    B, H, W, C = x.shape
    Cout = weight_taps.shape[-1]
    xp = jnp.pad(x, ((0, 0), (1, 1), (1, 1), (0, 0))).astype(MXU_DTYPE)

    def kernel(x_ref, w_ref, g_ref, b_ref, o_ref):
        acc = jnp.zeros((H * W, Cout), jnp.float32)
        for t in range(9):                       # fixed 9-tap unroll
            di, dj = t // 3, t % 3
            slab = x_ref[0, di:di + H, dj:dj + W, :].reshape(H * W, C)
            acc = acc + jnp.dot(slab, w_ref[t], preferred_element_type=jnp.float32)
        mu = jnp.mean(acc, axis=-1, keepdims=True)
        var = jnp.mean((acc - mu) ** 2, axis=-1, keepdims=True)
        y = (acc - mu) * jax.lax.rsqrt(var + eps)
        y = y * g_ref[...] + b_ref[...]
        o_ref[0, :, :] = y.astype(o_ref.dtype)

    return pl.pallas_call(
        kernel,
        out_shape=jax.ShapeDtypeStruct((B, H * W, Cout), out_dtype),
        grid=(B,),
        in_specs=[
            pl.BlockSpec((1, H + 2, W + 2, C), lambda b: (b, 0, 0, 0)),
            pl.BlockSpec((9, C, Cout), lambda b: (0, 0, 0)),
            pl.BlockSpec((1, Cout), lambda b: (0, 0)),
            pl.BlockSpec((1, Cout), lambda b: (0, 0)),
        ],
        out_specs=pl.BlockSpec((1, H * W, Cout), lambda b: (b, 0, 0)),
        compiler_params=pltpu.CompilerParams(
            dimension_semantics=("parallel",),
            vmem_limit_bytes=VMEM_LIMIT),
    )(xp, weight_taps,
      gamma.reshape(1, Cout).astype(jnp.float32),
      beta.reshape(1, Cout).astype(jnp.float32))


# ----------------------------------------------------------------------------
# SAM vision encoder pieces (glue in JAX, heavy compute via the kernels above)
# ----------------------------------------------------------------------------
def window_partition(h, ws):
    B, H, W, C = h.shape
    pad_h = (ws - H % ws) % ws
    pad_w = (ws - W % ws) % ws
    h = jnp.pad(h, ((0, 0), (0, pad_h), (0, pad_w), (0, 0)))
    Hp_, Wp_ = H + pad_h, W + pad_w
    h = h.reshape(B, Hp_ // ws, ws, Wp_ // ws, ws, C)
    h = h.transpose(0, 1, 3, 2, 4, 5).reshape(-1, ws, ws, C)
    return h, (Hp_, Wp_)


def window_unpartition(windows, ws, pad_hw, hw):
    Hp_, Wp_ = pad_hw
    H, W = hw
    B = windows.shape[0] // ((Hp_ // ws) * (Wp_ // ws))
    h = windows.reshape(B, Hp_ // ws, Wp_ // ws, ws, ws, -1)
    h = h.transpose(0, 1, 3, 2, 4, 5).reshape(B, Hp_, Wp_, -1)
    return h[:, :H, :W, :]


def get_rel_pos(q_size, k_size, rel_pos):
    max_rel_dist = 2 * max(q_size, k_size) - 1
    # TODO(synk): interpolation branch of get_rel_pos (len != max_rel_dist) not needed here.
    assert rel_pos.shape[0] == max_rel_dist
    q_coords = jnp.arange(q_size)[:, None] * max(k_size / q_size, 1.0)
    k_coords = jnp.arange(k_size)[None, :] * max(q_size / k_size, 1.0)
    rel_coords = (q_coords - k_coords) + (k_size - 1) * max(q_size / k_size, 1.0)
    return rel_pos[rel_coords.astype(jnp.int32)]


def attention_block(x, lp, cfg, fused_ln1, eps):
    """x: (Bw, H, W, C) pre-LN tokens (already windowed). Returns attn output (pre-proj)."""
    Bw, H, W, C = x.shape
    nh = cfg["num_attention_heads"]
    hd = C // nh
    L = H * W
    x2d = x.reshape(-1, C)

    if fused_ln1:
        qkv = pallas_ln_matmul(x2d, lp["ln1_g"], lp["ln1_b"],
                               lp["qkv_w"], lp["qkv_b"], eps=eps,
                               out_dtype=MXU_DTYPE)                   # (Bw*L, 3C) bf16
    else:
        qkv = pallas_matmul(x2d, lp["qkv_w"], bias=lp["qkv_b"], out_dtype=MXU_DTYPE)
    # TODO(synk): this head relayout still round-trips HBM once per layer (bf16); a
    # head-axis BlockSpec inside the flash kernel would remove it entirely.
    qkv = qkv.reshape(Bw, L, 3, nh, hd).transpose(2, 0, 3, 1, 4).reshape(3, Bw * nh, L, hd)
    q, k, v = qkv[0], qkv[1], qkv[2]     # k already carries the softmax scale (param prep)

    if cfg["use_rel_pos"]:
        Rh = get_rel_pos(H, H, lp["rel_pos_h"])                       # (H, H, hd) fp32
        Rw = get_rel_pos(W, W, lp["rel_pos_w"])                       # (W, W, hd) fp32
        rq = q.reshape(Bw * nh, H, W, hd).astype(jnp.float32)
        rel_h = jnp.einsum("bhwc,hkc->bhwk", rq, Rh).reshape(Bw * nh, L, H)
        rel_w = jnp.einsum("bhwc,wkc->bhwk", rq, Rw).reshape(Bw * nh, L, W)
        rel_hw = jnp.concatenate([rel_h, rel_w], axis=-1).astype(MXU_DTYPE)
    else:
        rel_hw = jnp.zeros((Bw * nh, L, H + W), MXU_DTYPE)

    attn = pallas_flash_attention(q, k, v, rel_hw, Hk=H, Wk=W, out_dtype=MXU_DTYPE)
    attn = attn.reshape(Bw, nh, H, W, hd).transpose(0, 2, 3, 1, 4).reshape(Bw, H, W, C)
    return attn


def vision_layer(h, lp, cfg, is_global):
    B, H, W, C = h.shape
    eps = cfg["layer_norm_eps"]
    ws = cfg["window_size"]
    use_window = (not is_global) and ws > 0
    pad_hw = (H, W)

    if use_window and (H % ws == 0) and (W % ws == 0):
        # Window partition is a pure permutation here (no padding), so LN1 can be fused
        # into the QKV matmul after partitioning.
        x_attn_in, pad_hw = window_partition(h, ws)
        fused_ln1 = True
    elif use_window:
        # Padded-window fallback: LN must precede the zero padding (reference semantics).
        hn = pallas_layernorm(h.reshape(-1, C), lp["ln1_g"], lp["ln1_b"], eps,
                              out_dtype=MXU_DTYPE).reshape(B, H, W, C)
        x_attn_in, pad_hw = window_partition(hn, ws)
        fused_ln1 = False
    else:
        x_attn_in = h
        fused_ln1 = True

    attn = attention_block(x_attn_in, lp, cfg, fused_ln1=fused_ln1, eps=eps)
    if use_window:
        attn = window_unpartition(attn, ws, pad_hw, (H, W))

    # Output projection + bias + residual fused in one kernel (the per-token projection
    # commutes with the token permutation of window_unpartition).
    h = pallas_matmul(attn.reshape(-1, C), lp["proj_w"], bias=lp["proj_b"],
                      residual=h.reshape(-1, C), out_dtype=MXU_DTYPE).reshape(B, H, W, C)

    # MLP: (LN2 + lin1 + GELU) fused, then (lin2 + bias + residual) fused.
    m = pallas_ln_matmul(h.reshape(-1, C), lp["ln2_g"], lp["ln2_b"],
                         lp["mlp_w1"], lp["mlp_b1"], act=_gelu, eps=eps,
                         out_dtype=MXU_DTYPE)
    h = pallas_matmul(m, lp["mlp_w2"], bias=lp["mlp_b2"],
                      residual=h.reshape(-1, C), out_dtype=MXU_DTYPE).reshape(B, H, W, C)
    return h


def sam_vision_encoder(pixel_values, params, cfg):
    B = pixel_values.shape[0]
    p = cfg["patch_size"]
    C_in = cfg["num_channels"]
    Hp = Wp = cfg["image_size"] // p
    hid = cfg["hidden_size"]
    Cout = cfg["output_channels"]

    # --- patch embedding: Conv2d(k=p, stride=p) == non-overlapping patch matmul ---
    x = pixel_values.reshape(B, C_in, Hp, p, Wp, p)
    x = x.transpose(0, 2, 4, 1, 3, 5).reshape(B * Hp * Wp, C_in * p * p)
    h = pallas_matmul(x, params["patch_embed_w"], bias=params["patch_embed_b"],
                      out_dtype=MXU_DTYPE).reshape(B, Hp, Wp, hid)

    if cfg["use_abs_pos"]:
        h = h + params["pos_embed"]

    # TODO(synk): at this tiny config the forward is launch-bound; fusing a whole layer
    # (or the whole encoder) into one pallas_call would be the next step for small shapes.
    for li, lp in enumerate(params["layers"]):
        h = vision_layer(h, lp, cfg, is_global=(li in cfg["global_attn_indexes"]))

    # --- neck: (conv1x1 + channel-LN) fused matmul, then (conv3x3 pad-1 + channel-LN) fused ---
    neck_eps = 1e-6  # SamLayerNorm default
    x = pallas_matmul(h.reshape(-1, hid), params["neck_conv1_w"],
                      post_ln=(params["neck_ln1_g"], params["neck_ln1_b"], neck_eps),
                      out_dtype=MXU_DTYPE).reshape(B, Hp, Wp, Cout)
    y = pallas_conv3x3_ln(x, params["neck_conv2_taps"],
                          params["neck_ln2_g"], params["neck_ln2_b"], neck_eps,
                          out_dtype=jnp.float32)
    return y.reshape(B, Hp, Wp, Cout).transpose(0, 3, 1, 2)           # -> NCHW


# ----------------------------------------------------------------------------
# ImageEmbeddingSam.forward
# ----------------------------------------------------------------------------
@jax.jit
def _encode(image, params):
    cfg = CFG
    B, c = image.shape[0], image.shape[1]
    S = cfg["image_size"]
    # TODO(synk): torchvision transforms.Resize(antialias=True) approximated with jax.image.resize.
    image = jax.image.resize(image, (B, c, S, S), method="bilinear", antialias=True)
    if cfg["num_channels"] > 1:                  # is_rgb_input: repeat(1,3,1,1), as in torch
        image = jnp.tile(image, (1, 3, 1, 1))
    return sam_vision_encoder(image.astype(jnp.float32), params, cfg)


def image_embedding_sam_forward(image, params, cfg):
    """image: (bs, 1, h, w) gray image -> (image_embedding NCHW, original_sizes)."""
    original_sizes = tuple(image.shape[-2:-1])   # mirrors torch `image.shape[-2:-1]`
    emb = _encode(image, params)
    return emb, original_sizes


# ----------------------------------------------------------------------------
# Deterministic parameter init (torch-like layout) + runtime preparation
# ----------------------------------------------------------------------------
def init_params(key, cfg):
    hid = cfg["hidden_size"]
    p = cfg["patch_size"]
    C = cfg["num_channels"]
    Hp = cfg["image_size"] // p
    nh = cfg["num_attention_heads"]
    hd = hid // nh
    mlp_dim = int(hid * cfg["mlp_ratio"])
    Cout = cfg["output_channels"]

    keys = iter(jax.random.split(key, 96))

    def rnd(shape, scale=0.02):
        return (scale * jax.random.normal(next(keys), shape)).astype(jnp.float32)

    def ln_pair(n):
        return (1.0 + 0.05 * jax.random.normal(next(keys), (n,))).astype(jnp.float32), \
               (0.05 * jax.random.normal(next(keys), (n,))).astype(jnp.float32)

    params = {
        "patch_embed_w": rnd((hid, C, p, p)),
        "patch_embed_b": rnd((hid,)),
        "pos_embed": rnd((1, Hp, Hp, hid)),
        "layers": [],
        "neck_conv1_w": rnd((Cout, hid, 1, 1)),
        "neck_conv2_w": rnd((Cout, Cout, 3, 3)),
    }
    params["neck_ln1_g"], params["neck_ln1_b"] = ln_pair(Cout)
    params["neck_ln2_g"], params["neck_ln2_b"] = ln_pair(Cout)

    for li in range(cfg["num_hidden_layers"]):
        is_global = li in cfg["global_attn_indexes"]
        in_sz = Hp if is_global else cfg["window_size"]
        ln1_g, ln1_b = ln_pair(hid)
        ln2_g, ln2_b = ln_pair(hid)
        layer = dict(
            ln1_g=ln1_g, ln1_b=ln1_b,
            qkv_w=rnd((hid, 3 * hid)),
            qkv_b=rnd((3 * hid,)) if cfg["qkv_bias"] else jnp.zeros((3 * hid,), jnp.float32),
            rel_pos_h=rnd((2 * in_sz - 1, hd)),
            rel_pos_w=rnd((2 * in_sz - 1, hd)),
            proj_w=rnd((hid, hid)),
            proj_b=rnd((hid,)),
            ln2_g=ln2_g, ln2_b=ln2_b,
            mlp_w1=rnd((hid, mlp_dim)), mlp_b1=rnd((mlp_dim,)),
            mlp_w2=rnd((mlp_dim, hid)), mlp_b2=rnd((hid,)),
        )
        params["layers"].append(layer)
    return params


def prepare_params(params, cfg):
    """One-time runtime prep: pre-cast matmul weights to bf16 (no per-call HBM converts),
    reshape conv weights to matmul/tap layouts, and fold the softmax 1/sqrt(hd) scale
    into the K slice of the QKV projection (rel-pos bias uses unscaled q, so folding
    into K keeps reference semantics exactly)."""
    hid = cfg["hidden_size"]
    nh = cfg["num_attention_heads"]
    hd = hid // nh
    p = cfg["patch_size"]
    C = cfg["num_channels"]
    Cout = cfg["output_channels"]
    scale = hd ** -0.5

    pp = {
        "patch_embed_w": params["patch_embed_w"].reshape(hid, C * p * p).T.astype(MXU_DTYPE),
        "patch_embed_b": params["patch_embed_b"].astype(jnp.float32),
        "pos_embed": params["pos_embed"].astype(MXU_DTYPE),
        "neck_conv1_w": params["neck_conv1_w"].reshape(Cout, hid).T.astype(MXU_DTYPE),
        "neck_ln1_g": params["neck_ln1_g"], "neck_ln1_b": params["neck_ln1_b"],
        "neck_conv2_taps": jnp.transpose(params["neck_conv2_w"], (2, 3, 1, 0))
                              .reshape(9, Cout, Cout).astype(MXU_DTYPE),
        "neck_ln2_g": params["neck_ln2_g"], "neck_ln2_b": params["neck_ln2_b"],
        "layers": [],
    }
    for lp in params["layers"]:
        qkv_w = lp["qkv_w"].at[:, hid:2 * hid].multiply(scale)   # fold scale into K (fp32)
        qkv_b = lp["qkv_b"].at[hid:2 * hid].multiply(scale)
        pp["layers"].append(dict(
            ln1_g=lp["ln1_g"], ln1_b=lp["ln1_b"],
            qkv_w=qkv_w.astype(MXU_DTYPE), qkv_b=qkv_b.astype(jnp.float32),
            rel_pos_h=lp["rel_pos_h"].astype(jnp.float32),
            rel_pos_w=lp["rel_pos_w"].astype(jnp.float32),
            proj_w=lp["proj_w"].astype(MXU_DTYPE), proj_b=lp["proj_b"].astype(jnp.float32),
            ln2_g=lp["ln2_g"], ln2_b=lp["ln2_b"],
            mlp_w1=lp["mlp_w1"].astype(MXU_DTYPE), mlp_b1=lp["mlp_b1"].astype(jnp.float32),
            mlp_w2=lp["mlp_w2"].astype(MXU_DTYPE), mlp_b2=lp["mlp_b2"].astype(jnp.float32),
        ))
    return pp


# ----------------------------------------------------------------------------
if __name__ == "__main__":
    key = jax.random.PRNGKey(0)
    pkey, ikey = jax.random.split(key)
    params = prepare_params(init_params(pkey, CFG), CFG)

    # gray image (bs, 1, h, w) with h/w different from image_size to exercise the resize
    image = jax.random.uniform(ikey, (2, 1, 20, 24), dtype=jnp.float32)

    emb, original_sizes = image_embedding_sam_forward(image, params, CFG)
    emb = jax.block_until_ready(emb)

    Hp = CFG["image_size"] // CFG["patch_size"]
    assert emb.shape == (2, CFG["output_channels"], Hp, Hp), emb.shape
    assert emb.dtype == jnp.float32
    assert bool(jnp.all(jnp.isfinite(emb)))
    assert original_sizes == (20,)
    print("KERNEL_OK")
</pallas_src>

<mosaic_0001>
module attributes {stable_mosaic.version = 11 : i64} {
  func.func @kernel(%arg0: i32, %arg1: i32, %arg2: i32, %arg3: memref<8x192xbf16, #tpu.memory_space<vmem>>, %arg4: memref<192x32xbf16, #tpu.memory_space<vmem>>, %arg5: memref<1x32xf32, #tpu.memory_space<vmem>>, %arg6: memref<8x32xbf16, #tpu.memory_space<vmem>>, %arg7: memref<8x32xf32, #tpu.memory_space<vmem>>) attributes {dimension_semantics = [#tpu.dimension_semantics<parallel>, #tpu.dimension_semantics<parallel>, #tpu.dimension_semantics<arbitrary>], iteration_bounds = array<i64: 1, 1, 1>, scalar_prefetch = 0 : i64, scratch_operands = 1 : i64, tpu.core_type = #tpu.core_type<tc>, window_params = [{transform_indices = @transform_0, window_bounds = array<i64: 8, 192>}, {transform_indices = @transform_1, window_bounds = array<i64: 192, 32>}, {transform_indices = @transform_2, window_bounds = array<i64: 1, 32>}, {transform_indices = @transform_3, window_bounds = array<i64: 8, 32>}]} {
    %c0_i32 = arith.constant 0 : i32
    %0 = arith.cmpi eq, %arg2, %c0_i32 : i32
    %1 = arith.extui %0 : i1 to i32
    %c0_i32_0 = arith.constant 0 : i32
    %2 = arith.cmpi ne, %1, %c0_i32_0 : i32
    scf.if %2 {
      %cst_10 = arith.constant 0.000000e+00 : f32
      %12 = vector.broadcast %cst_10 : f32 to vector<8x32xf32>
      %c0_11 = arith.constant 0 : index
      %c0_12 = arith.constant 0 : index
      %13 = vector.load %arg7[%c0_11, %c0_12] : memref<8x32xf32, #tpu.memory_space<vmem>>, vector<8x32xf32>
      tpu.vector_store %arg7[%c0_11, %c0_12], %12 {strides = array<i32>} : memref<8x32xf32, #tpu.memory_space<vmem>>, vector<8x32xf32>,
    } else {
    }
    %c0 = arith.constant 0 : index
    %c0_1 = arith.constant 0 : index
    %3 = vector.load %arg7[%c0, %c0_1] : memref<8x32xf32, #tpu.memory_space<vmem>>, vector<8x32xf32>
    %c0_2 = arith.constant 0 : index
    %c0_3 = arith.constant 0 : index
    %4 = vector.load %arg3[%c0_2, %c0_3] : memref<8x192xbf16, #tpu.memory_space<vmem>>, vector<8x192xbf16>
    %c0_4 = arith.constant 0 : index
    %c0_5 = arith.constant 0 : index
    %5 = vector.load %arg4[%c0_4, %c0_5] : memref<192x32xbf16, #tpu.memory_space<vmem>>, vector<192x32xbf16>
    %cst = arith.constant dense<0.000000e+00> : vector<8x32xf32>
    %6 = tpu.matmul %4, %5, %cst {dimension_numbers = #tpu.dot_dimension_numbers<[1], [0], [0], [1], [0, 0, 1, 1], [], []>} : vector<8x192xbf16>, vector<192x32xbf16>, vector<8x32xf32> -> vector<8x32xf32>
    %7 = arith.addf %3, %6 : vector<8x32xf32>
    %c0_6 = arith.constant 0 : index
    %c0_7 = arith.constant 0 : index
    %8 = vector.load %arg7[%c0_6, %c0_7] : memref<8x32xf32, #tpu.memory_space<vmem>>, vector<8x32xf32>
    tpu.vector_store %arg7[%c0_6, %c0_7], %7 {strides = array<i32>} : memref<8x32xf32, #tpu.memory_space<vmem>>, vector<8x32xf32>,
    %c0_i32_8 = arith.constant 0 : i32
    %9 = arith.cmpi eq, %arg2, %c0_i32_8 : i32
    %10 = arith.extui %9 : i1 to i32
    %c0_i32_9 = arith.constant 0 : i32
    %11 = arith.cmpi ne, %10, %c0_i32_9 : i32
    scf.if %11 {
      %c0_10 = arith.constant 0 : index
      %c0_11 = arith.constant 0 : index
      %12 = vector.load %arg7[%c0_10, %c0_11] : memref<8x32xf32, #tpu.memory_space<vmem>>, vector<8x32xf32>
      %c0_12 = arith.constant 0 : index
      %c0_13 = arith.constant 0 : index
      %13 = vector.load %arg5[%c0_12, %c0_13] : memref<1x32xf32, #tpu.memory_space<vmem>>, vector<1x32xf32>
      %14 = vector.broadcast %13 : vector<1x32xf32> to vector<8x32xf32>
      %15 = arith.addf %12, %14 : vector<8x32xf32>
      %16 = arith.truncf %15 : vector<8x32xf32> to vector<8x32xbf16>
      %c0_14 = arith.constant 0 : index
      %c0_15 = arith.constant 0 : index
      %17 = vector.load %arg6[%c0_14, %c0_15] : memref<8x32xbf16, #tpu.memory_space<vmem>>, vector<8x32xbf16>
      tpu.vector_store %arg6[%c0_14, %c0_15], %16 {strides = array<i32>} : memref<8x32xbf16, #tpu.memory_space<vmem>>, vector<8x32xbf16>,
    } else {
    }
    return
  }
  func.func @transform_0(%arg0: i32, %arg1: i32, %arg2: i32) -> (i32, i32) {
    %c0_i32 = arith.constant 0 : i32
    return %arg0, %arg2 : i32, i32
  }
  func.func @transform_1(%arg0: i32, %arg1: i32, %arg2: i32) -> (i32, i32) {
    %c0_i32 = arith.constant 0 : i32
    return %arg2, %arg1 : i32, i32
  }
  func.func @transform_2(%arg0: i32, %arg1: i32, %arg2: i32) -> (i32, i32) {
    %c0_i32 = arith.constant 0 : i32
    %c0_i32_0 = arith.constant 0 : i32
    return %c0_i32, %arg1 : i32, i32
  }
  func.func @transform_3(%arg0: i32, %arg1: i32, %arg2: i32) -> (i32, i32) {
    %c0_i32 = arith.constant 0 : i32
    return %arg0, %arg1 : i32, i32
  }
}

module attributes {stable_mosaic.version = 11 : i64} {
  func.func @kernel(%arg0: i32, %arg1: i32, %arg2: memref<8x32xbf16, #tpu.memory_space<vmem>>, %arg3: memref<1x32xf32, #tpu.memory_space<vmem>>, %arg4: memref<1x32xf32, #tpu.memory_space<vmem>>, %arg5: memref<32x96xbf16, #tpu.memory_space<vmem>>, %arg6: memref<1x96xf32, #tpu.memory_space<vmem>>, %arg7: memref<8x96xbf16, #tpu.memory_space<vmem>>) attributes {dimension_semantics = [#tpu.dimension_semantics<parallel>, #tpu.dimension_semantics<parallel>], iteration_bounds = array<i64: 1, 1>, scalar_prefetch = 0 : i64, scratch_operands = 0 : i64, tpu.core_type = #tpu.core_type<tc>, window_params = [{transform_indices = @transform_0, window_bounds = array<i64: 8, 32>}, {pipeline_mode = #tpu.pipeline_mode<synchronous>, transform_indices = @transform_1, window_bounds = array<i64: 1, 32>}, {pipeline_mode = #tpu.pipeline_mode<synchronous>, transform_indices = @transform_2, window_bounds = array<i64: 1, 32>}, {transform_indices = @transform_3, window_bounds = array<i64: 32, 96>}, {transform_indices = @transform_4, window_bounds = array<i64: 1, 96>}, {transform_indices = @transform_5, window_bounds = array<i64: 8, 96>}]} {
    %c0 = arith.constant 0 : index
    %c0_0 = arith.constant 0 : index
    %0 = vector.load %arg2[%c0, %c0_0] : memref<8x32xbf16, #tpu.memory_space<vmem>>, vector<8x32xbf16>
    %1 = arith.extf %0 : vector<8x32xbf16> to vector<8x32xf32>
    %cst = arith.constant dense<0.000000e+00> : vector<8xf32>
    %2 = vector.multi_reduction <add>, %1, %cst [1] : vector<8x32xf32> to vector<8xf32>
    %3 = vector.shape_cast %2 : vector<8xf32> to vector<8x1xf32>
    %cst_1 = arith.constant 3.200000e+01 : f32
    %4 = vector.broadcast %cst_1 : f32 to vector<8x1xf32>
    %5 = arith.divf %3, %4 : vector<8x1xf32>
    %6 = vector.broadcast %5 : vector<8x1xf32> to vector<8x32xf32>
    %7 = arith.subf %1, %6 : vector<8x32xf32>
    %8 = arith.mulf %7, %7 : vector<8x32xf32>
    %cst_2 = arith.constant dense<0.000000e+00> : vector<8xf32>
    %9 = vector.multi_reduction <add>, %8, %cst_2 [1] : vector<8x32xf32> to vector<8xf32>
    %10 = vector.shape_cast %9 : vector<8xf32> to vector<8x1xf32>
    %cst_3 = arith.constant 3.200000e+01 : f32
    %11 = vector.broadcast %cst_3 : f32 to vector<8x1xf32>
    %12 = arith.divf %10, %11 : vector<8x1xf32>
    %13 = vector.broadcast %5 : vector<8x1xf32> to vector<8x32xf32>
    %14 = arith.subf %1, %13 : vector<8x32xf32>
    %cst_4 = arith.constant 9.99999997E-7 : f32
    %15 = vector.broadcast %cst_4 : f32 to vector<8x1xf32>
    %16 = arith.addf %12, %15 : vector<8x1xf32>
    %17 = math.rsqrt %16 : vector<8x1xf32>
    %18 = vector.broadcast %17 : vector<8x1xf32> to vector<8x32xf32>
    %19 = arith.mulf %14, %18 : vector<8x32xf32>
    %c0_5 = arith.constant 0 : index
    %c0_6 = arith.constant 0 : index
    %20 = vector.load %arg3[%c0_5, %c0_6] : memref<1x32xf32, #tpu.memory_space<vmem>>, vector<1x32xf32>
    %21 = vector.broadcast %20 : vector<1x32xf32> to vector<8x32xf32>
    %22 = arith.mulf %19, %21 : vector<8x32xf32>
    %c0_7 = arith.constant 0 : index
    %c0_8 = arith.constant 0 : index
    %23 = vector.load %arg4[%c0_7, %c0_8] : memref<1x32xf32, #tpu.memory_space<vmem>>, vector<1x32xf32>
    %24 = vector.broadcast %23 : vector<1x32xf32> to vector<8x32xf32>
    %25 = arith.addf %22, %24 : vector<8x32xf32>
    %26 = arith.truncf %25 : vector<8x32xf32> to vector<8x32xbf16>
    %c0_9 = arith.constant 0 : index
    %c0_10 = arith.constant 0 : index
    %27 = vector.load %arg5[%c0_9, %c0_10] : memref<32x96xbf16, #tpu.memory_space<vmem>>, vector<32x96xbf16>
    %cst_11 = arith.constant dense<0.000000e+00> : vector<8x96xf32>
    %28 = tpu.matmul %26, %27, %cst_11 {dimension_numbers = #tpu.dot_dimension_numbers<[1], [0], [0], [1], [0, 0, 1, 1], [], []>} : vector<8x32xbf16>, vector<32x96xbf16>, vector<8x96xf32> -> vector<8x96xf32>
    %c0_12 = arith.constant 0 : index
    %c0_13 = arith.constant 0 : index
    %29 = vector.load %arg6[%c0_12, %c0_13] : memref<1x96xf32, #tpu.memory_space<vmem>>, vector<1x96xf32>
    %30 = vector.broadcast %29 : vector<1x96xf32> to vector<8x96xf32>
    %31 = arith.addf %28, %30 : vector<8x96xf32>
    %32 = arith.truncf %31 : vector<8x96xf32> to vector<8x96xbf16>
    %c0_14 = arith.constant 0 : index
    %c0_15 = arith.constant 0 : index
    %33 = vector.load %arg7[%c0_14, %c0_15] : memref<8x96xbf16, #tpu.memory_space<vmem>>, vector<8x96xbf16>
    tpu.vector_store %arg7[%c0_14, %c0_15], %32 {strides = array<i32>} : memref<8x96xbf16, #tpu.memory_space<vmem>>, vector<8x96xbf16>,
    return
  }
  func.func @transform_0(%arg0: i32, %arg1: i32) -> (i32, i32) {
    %c0_i32 = arith.constant 0 : i32
    %c0_i32_0 = arith.constant 0 : i32
    return %arg0, %c0_i32 : i32, i32
  }
  func.func @transform_1(%arg0: i32, %arg1: i32) -> (i32, i32) {
    %c0_i32 = arith.constant 0 : i32
    %c0_i32_0 = arith.constant 0 : i32
    %c0_i32_1 = arith.constant 0 : i32
    return %c0_i32, %c0_i32_0 : i32, i32
  }
  func.func @transform_2(%arg0: i32, %arg1: i32) -> (i32, i32) {
    %c0_i32 = arith.constant 0 : i32
    %c0_i32_0 = arith.constant 0 : i32
    %c0_i32_1 = arith.constant 0 : i32
    return %c0_i32, %c0_i32_0 : i32, i32
  }
  func.func @transform_3(%arg0: i32, %arg1: i32) -> (i32, i32) {
    %c0_i32 = arith.constant 0 : i32
    %c0_i32_0 = arith.constant 0 : i32
    return %c0_i32, %arg1 : i32, i32
  }
  func.func @transform_4(%arg0: i32, %arg1: i32) -> (i32, i32) {
    %c0_i32 = arith.constant 0 : i32
    %c0_i32_0 = arith.constant 0 : i32
    return %c0_i32, %arg1 : i32, i32
  }
  func.func @transform_5(%arg0: i32, %arg1: i32) -> (i32, i32) {
    %c0_i32 = arith.constant 0 : i32
    return %arg0, %arg1 : i32, i32
  }
}

module attributes {stable_mosaic.version = 11 : i64} {
  func.func @kernel(%arg0: i32, %arg1: i32, %arg2: i32, %arg3: memref<2x4x16xbf16, #tpu.memory_space<vmem>>, %arg4: memref<2x4x16xbf16, #tpu.memory_space<vmem>>, %arg5: memref<2x4x16xbf16, #tpu.memory_space<vmem>>, %arg6: memref<2x4x4xbf16, #tpu.memory_space<vmem>>, %arg7: memref<4x4xbf16, #tpu.memory_space<vmem>>, %arg8: memref<2x4x16xbf16, #tpu.memory_space<vmem>>, %arg9: memref<2x4x1xf32, #tpu.memory_space<vmem>>, %arg10: memref<2x4x1xf32, #tpu.memory_space<vmem>>, %arg11: memref<2x4x16xf32, #tpu.memory_space<vmem>>) attributes {dimension_semantics = [#tpu.dimension_semantics<parallel>, #tpu.dimension_semantics<parallel>, #tpu.dimension_semantics<arbitrary>], iteration_bounds = array<i64: 2, 1, 1>, scalar_prefetch = 0 : i64, scratch_operands = 3 : i64, tpu.core_type = #tpu.core_type<tc>, window_params = [{transform_indices = @transform_0, window_bounds = array<i64: 2, 4, 16>}, {transform_indices = @transform_1, window_bounds = array<i64: 2, 4, 16>}, {transform_indices = @transform_2, window_bounds = array<i64: 2, 4, 16>}, {transform_indices = @transform_3, window_bounds = array<i64: 2, 4, 4>}, {transform_indices = @transform_4, window_bounds = array<i64: 4, 4>}, {transform_indices = @transform_5, window_bounds = array<i64: 2, 4, 16>}]} {
    %c0_i32 = arith.constant 0 : i32
    %0 = arith.cmpi eq, %arg2, %c0_i32 : i32
    %1 = arith.extui %0 : i1 to i32
    %c0_i32_0 = arith.constant 0 : i32
    %2 = arith.cmpi ne, %1, %c0_i32_0 : i32
    scf.if %2 {
      %cst_38 = arith.constant 0xFF800000 : f32
      %39 = vector.broadcast %cst_38 : f32 to vector<2x4x1xf32>
      %c0_39 = arith.constant 0 : index
      %c0_40 = arith.constant 0 : index
      %c0_41 = arith.constant 0 : index
      %40 = vector.load %arg9[%c0_39, %c0_40, %c0_41] : memref<2x4x1xf32, #tpu.memory_space<vmem>>, vector<2x4x1xf32>
      tpu.vector_store %arg9[%c0_39, %c0_40, %c0_41], %39 {strides = array<i32>} : memref<2x4x1xf32, #tpu.memory_space<vmem>>, vector<2x4x1xf32>,
      %cst_42 = arith.constant 0.000000e+00 : f32
      %41 = vector.broadcast %cst_42 : f32 to vector<2x4x1xf32>
      %c0_43 = arith.constant 0 : index
      %c0_44 = arith.constant 0 : index
      %c0_45 = arith.constant 0 : index
      %42 = vector.load %arg10[%c0_43, %c0_44, %c0_45] : memref<2x4x1xf32, #tpu.memory_space<vmem>>, vector<2x4x1xf32>
      tpu.vector_store %arg10[%c0_43, %c0_44, %c0_45], %41 {strides = array<i32>} : memref<2x4x1xf32, #tpu.memory_space<vmem>>, vector<2x4x1xf32>,
      %cst_46 = arith.constant 0.000000e+00 : f32
      %43 = vector.broadcast %cst_46 : f32 to vector<2x4x16xf32>
      %c0_47 = arith.constant 0 : index
      %c0_48 = arith.constant 0 : index
      %c0_49 = arith.constant 0 : index
      %44 = vector.load %arg11[%c0_47, %c0_48, %c0_49] : memref<2x4x16xf32, #tpu.memory_space<vmem>>, vector<2x4x16xf32>
      tpu.vector_store %arg11[%c0_47, %c0_48, %c0_49], %43 {strides = array<i32>} : memref<2x4x16xf32, #tpu.memory_space<vmem>>, vector<2x4x16xf32>,
    } else {
    }
    %c0 = arith.constant 0 : index
    %c0_1 = arith.constant 0 : index
    %c0_2 = arith.constant 0 : index
    %3 = vector.load %arg3[%c0, %c0_1, %c0_2] : memref<2x4x16xbf16, #tpu.memory_space<vmem>>, vector<2x4x16xbf16>
    %c0_3 = arith.constant 0 : index
    %c0_4 = arith.constant 0 : index
    %c0_5 = arith.constant 0 : index
    %4 = vector.load %arg4[%c0_3, %c0_4, %c0_5] : memref<2x4x16xbf16, #tpu.memory_space<vmem>>, vector<2x4x16xbf16>
    "tpu.trace_start"() <{level = 10 : i32, message = "bqd,bkd->bqk"}> : () -> ()
    %cst = arith.constant dense<0.000000e+00> : vector<2x4x4xf32>
    %5 = tpu.matmul %3, %4, %cst {dimension_numbers = #tpu.dot_dimension_numbers<[2], [2], [1], [1], [0, 0, 0, 1, 1, 1], [0], [0]>} : vector<2x4x16xbf16>, vector<2x4x16xbf16>, vector<2x4x4xf32> -> vector<2x4x4xf32>
    "tpu.trace_stop"() : () -> ()
    %c0_6 = arith.constant 0 : index
    %c0_7 = arith.constant 0 : index
    %c0_8 = arith.constant 0 : index
    %6 = vector.load %arg6[%c0_6, %c0_7, %c0_8] : memref<2x4x4xbf16, #tpu.memory_space<vmem>>, vector<2x4x4xbf16>
    %7 = vector.shape_cast %6 : vector<2x4x4xbf16> to vector<8x4xbf16>
    %c0_9 = arith.constant 0 : index
    %c0_10 = arith.constant 0 : index
    %8 = vector.load %arg7[%c0_9, %c0_10] : memref<4x4xbf16, #tpu.memory_space<vmem>>, vector<4x4xbf16>
    %cst_11 = arith.constant dense<0.000000e+00> : vector<8x4xf32>
    %9 = tpu.matmul %7, %8, %cst_11 {dimension_numbers = #tpu.dot_dimension_numbers<[1], [0], [0], [1], [0, 0, 1, 1], [], []>} : vector<8x4xbf16>, vector<4x4xbf16>, vector<8x4xf32> -> vector<8x4xf32>
    %10 = vector.shape_cast %9 : vector<8x4xf32> to vector<2x4x4xf32>
    %11 = arith.addf %5, %10 : vector<2x4x4xf32>
    %c0_12 = arith.constant 0 : index
    %c0_13 = arith.constant 0 : index
    %c0_14 = arith.constant 0 : index
    %12 = vector.load %arg9[%c0_12, %c0_13, %c0_14] : memref<2x4x1xf32, #tpu.memory_space<vmem>>, vector<2x4x1xf32>
    %cst_15 = arith.constant dense<0xFF800000> : vector<2x4xf32>
    %13 = vector.multi_reduction <maximumf>, %11, %cst_15 [2] : vector<2x4x4xf32> to vector<2x4xf32>
    %14 = vector.shape_cast %13 : vector<2x4xf32> to vector<2x4x1xf32>
    %15 = arith.maximumf %12, %14 : vector<2x4x1xf32>
    %16 = arith.subf %12, %15 : vector<2x4x1xf32>
    %17 = math.exp %16 : vector<2x4x1xf32>
    %18 = vector.broadcast %15 : vector<2x4x1xf32> to vector<2x4x4xf32>
    %19 = arith.subf %11, %18 : vector<2x4x4xf32>
    %20 = math.exp %19 : vector<2x4x4xf32>
    %c0_16 = arith.constant 0 : index
    %c0_17 = arith.constant 0 : index
    %c0_18 = arith.constant 0 : index
    %21 = vector.load %arg10[%c0_16, %c0_17, %c0_18] : memref<2x4x1xf32, #tpu.memory_space<vmem>>, vector<2x4x1xf32>
    %22 = arith.mulf %17, %21 : vector<2x4x1xf32>
    %cst_19 = arith.constant dense<0.000000e+00> : vector<2x4xf32>
    %23 = vector.multi_reduction <add>, %20, %cst_19 [2] : vector<2x4x4xf32> to vector<2x4xf32>
    %24 = vector.shape_cast %23 : vector<2x4xf32> to vector<2x4x1xf32>
    %25 = arith.addf %22, %24 : vector<2x4x1xf32>
    %c0_20 = arith.constant 0 : index
    %c0_21 = arith.constant 0 : index
    %c0_22 = arith.constant 0 : index
    %26 = vector.load %arg10[%c0_20, %c0_21, %c0_22] : memref<2x4x1xf32, #tpu.memory_space<vmem>>, vector<2x4x1xf32>
    tpu.vector_store %arg10[%c0_20, %c0_21, %c0_22], %25 {strides = array<i32>} : memref<2x4x1xf32, #tpu.memory_space<vmem>>, vector<2x4x1xf32>,
    %c0_23 = arith.constant 0 : index
    %c0_24 = arith.constant 0 : index
    %c0_25 = arith.constant 0 : index
    %27 = vector.load %arg11[%c0_23, %c0_24, %c0_25] : memref<2x4x16xf32, #tpu.memory_space<vmem>>, vector<2x4x16xf32>
    %28 = vector.broadcast %17 : vector<2x4x1xf32> to vector<2x4x16xf32>
    %29 = arith.mulf %28, %27 : vector<2x4x16xf32>
    %30 = arith.truncf %20 : vector<2x4x4xf32> to vector<2x4x4xbf16>
    %c0_26 = arith.constant 0 : index
    %c0_27 = arith.constant 0 : index
    %c0_28 = arith.constant 0 : index
    %31 = vector.load %arg5[%c0_26, %c0_27, %c0_28] : memref<2x4x16xbf16, #tpu.memory_space<vmem>>, vector<2x4x16xbf16>
    "tpu.trace_start"() <{level = 10 : i32, message = "bqk,bkd->bqd"}> : () -> ()
    %cst_29 = arith.constant dense<0.000000e+00> : vector<2x4x16xf32>
    %32 = tpu.matmul %30, %31, %cst_29 {dimension_numbers = #tpu.dot_dimension_numbers<[2], [1], [1], [2], [0, 0, 0, 1, 1, 2], [0], [0]>} : vector<2x4x4xbf16>, vector<2x4x16xbf16>, vector<2x4x16xf32> -> vector<2x4x16xf32>
    "tpu.trace_stop"() : () -> ()
    %33 = arith.addf %29, %32 : vector<2x4x16xf32>
    %c0_30 = arith.constant 0 : index
    %c0_31 = arith.constant 0 : index
    %c0_32 = arith.constant 0 : index
    %34 = vector.load %arg11[%c0_30, %c0_31, %c0_32] : memref<2x4x16xf32, #tpu.memory_space<vmem>>, vector<2x4x16xf32>
    tpu.vector_store %arg11[%c0_30, %c0_31, %c0_32], %33 {strides = array<i32>} : memref<2x4x16xf32, #tpu.memory_space<vmem>>, vector<2x4x16xf32>,
    %c0_33 = arith.constant 0 : index
    %c0_34 = arith.constant 0 : index
    %c0_35 = arith.constant 0 : index
    %35 = vector.load %arg9[%c0_33, %c0_34, %c0_35] : memref<2x4x1xf32, #tpu.memory_space<vmem>>, vector<2x4x1xf32>
    tpu.vector_store %arg9[%c0_33, %c0_34, %c0_35], %15 {strides = array<i32>} : memref<2x4x1xf32, #tpu.memory_space<vmem>>, vector<2x4x1xf32>,
    %c0_i32_36 = arith.constant 0 : i32
    %36 = arith.cmpi eq, %arg2, %c0_i32_36 : i32
    %37 = arith.extui %36 : i1 to i32
    %c0_i32_37 = arith.constant 0 : i32
    %38 = arith.cmpi ne, %37, %c0_i32_37 : i32
    scf.if %38 {
      %c0_38 = arith.constant 0 : index
      %c0_39 = arith.constant 0 : index
      %c0_40 = arith.constant 0 : index
      %39 = vector.load %arg11[%c0_38, %c0_39, %c0_40] : memref<2x4x16xf32, #tpu.memory_space<vmem>>, vector<2x4x16xf32>
      %c0_41 = arith.constant 0 : index
      %c0_42 = arith.constant 0 : index
      %c0_43 = arith.constant 0 : index
      %40 = vector.load %arg10[%c0_41, %c0_42, %c0_43] : memref<2x4x1xf32, #tpu.memory_space<vmem>>, vector<2x4x1xf32>
      %41 = tpu.reciprocal %40 {approx = true} : vector<2x4x1xf32> -> vector<2x4x1xf32>
      %42 = vector.broadcast %41 : vector<2x4x1xf32> to vector<2x4x16xf32>
      %43 = arith.mulf %39, %42 : vector<2x4x16xf32>
      %44 = arith.truncf %43 : vector<2x4x16xf32> to vector<2x4x16xbf16>
      %c0_44 = arith.constant 0 : index
      %c0_45 = arith.constant 0 : index
      %c0_46 = arith.constant 0 : index
      %45 = vector.load %arg8[%c0_44, %c0_45, %c0_46] : memref<2x4x16xbf16, #tpu.memory_space<vmem>>, vector<2x4x16xbf16>
      tpu.vector_store %arg8[%c0_44, %c0_45, %c0_46], %44 {strides = array<i32>} : memref<2x4x16xbf16, #tpu.memory_space<vmem>>, vector<2x4x16xbf16>,
    } else {
    }
    return
  }
  func.func @transform_0(%arg0: i32, %arg1: i32, %arg2: i32) -> (i32, i32, i32) {
    %c0_i32 = arith.constant 0 : i32
    %c0_i32_0 = arith.constant 0 : i32
    return %arg0, %arg1, %c0_i32 : i32, i32, i32
  }
  func.func @transform_1(%arg0: i32, %arg1: i32, %arg2: i32) -> (i32, i32, i32) {
    %c0_i32 = arith.constant 0 : i32
    %c0_i32_0 = arith.constant 0 : i32
    return %arg0, %arg2, %c0_i32 : i32, i32, i32
  }
  func.func @transform_2(%arg0: i32, %arg1: i32, %arg2: i32) -> (i32, i32, i32) {
    %c0_i32 = arith.constant 0 : i32
    %c0_i32_0 = arith.constant 0 : i32
    return %arg0, %arg2, %c0_i32 : i32, i32, i32
  }
  func.func @transform_3(%arg0: i32, %arg1: i32, %arg2: i32) -> (i32, i32, i32) {
    %c0_i32 = arith.constant 0 : i32
    %c0_i32_0 = arith.constant 0 : i32
    return %arg0, %arg1, %c0_i32 : i32, i32, i32
  }
  func.func @transform_4(%arg0: i32, %arg1: i32, %arg2: i32) -> (i32, i32) {
    %c0_i32 = arith.constant 0 : i32
    %c0_i32_0 = arith.constant 0 : i32
    return %c0_i32, %arg2 : i32, i32
  }
  func.func @transform_5(%arg0: i32, %arg1: i32, %arg2: i32) -> (i32, i32, i32) {
    %c0_i32 = arith.constant 0 : i32
    %c0_i32_0 = arith.constant 0 : i32
    return %arg0, %arg1, %c0_i32 : i32, i32, i32
  }
}

module attributes {stable_mosaic.version = 11 : i64} {
  func.func @kernel(%arg0: i32, %arg1: i32, %arg2: i32, %arg3: memref<8x32xbf16, #tpu.memory_space<vmem>>, %arg4: memref<32x32xbf16, #tpu.memory_space<vmem>>, %arg5: memref<1x32xf32, #tpu.memory_space<vmem>>, %arg6: memref<8x32xbf16, #tpu.memory_space<vmem>>, %arg7: memref<8x32xbf16, #tpu.memory_space<vmem>>, %arg8: memref<8x32xf32, #tpu.memory_space<vmem>>) attributes {dimension_semantics = [#tpu.dimension_semantics<parallel>, #tpu.dimension_semantics<parallel>, #tpu.dimension_semantics<arbitrary>], iteration_bounds = array<i64: 1, 1, 1>, scalar_prefetch = 0 : i64, scratch_operands = 1 : i64, tpu.core_type = #tpu.core_type<tc>, window_params = [{transform_indices = @transform_0, window_bounds = array<i64: 8, 32>}, {transform_indices = @transform_1, window_bounds = array<i64: 32, 32>}, {transform_indices = @transform_2, window_bounds = array<i64: 1, 32>}, {transform_indices = @transform_3, window_bounds = array<i64: 8, 32>}, {transform_indices = @transform_4, window_bounds = array<i64: 8, 32>}]} {
    %c0_i32 = arith.constant 0 : i32
    %0 = arith.cmpi eq, %arg2, %c0_i32 : i32
    %1 = arith.extui %0 : i1 to i32
    %c0_i32_0 = arith.constant 0 : i32
    %2 = arith.cmpi ne, %1, %c0_i32_0 : i32
    scf.if %2 {
      %cst_10 = arith.constant 0.000000e+00 : f32
      %12 = vector.broadcast %cst_10 : f32 to vector<8x32xf32>
      %c0_11 = arith.constant 0 : index
      %c0_12 = arith.constant 0 : index
      %13 = vector.load %arg8[%c0_11, %c0_12] : memref<8x32xf32, #tpu.memory_space<vmem>>, vector<8x32xf32>
      tpu.vector_store %arg8[%c0_11, %c0_12], %12 {strides = array<i32>} : memref<8x32xf32, #tpu.memory_space<vmem>>, vector<8x32xf32>,
    } else {
    }
    %c0 = arith.constant 0 : index
    %c0_1 = arith.constant 0 : index
    %3 = vector.load %arg8[%c0, %c0_1] : memref<8x32xf32, #tpu.memory_space<vmem>>, vector<8x32xf32>
    %c0_2 = arith.constant 0 : index
    %c0_3 = arith.constant 0 : index
    %4 = vector.load %arg3[%c0_2, %c0_3] : memref<8x32xbf16, #tpu.memory_space<vmem>>, vector<8x32xbf16>
    %c0_4 = arith.constant 0 : index
    %c0_5 = arith.constant 0 : index
    %5 = vector.load %arg4[%c0_4, %c0_5] : memref<32x32xbf16, #tpu.memory_space<vmem>>, vector<32x32xbf16>
    %cst = arith.constant dense<0.000000e+00> : vector<8x32xf32>
    %6 = tpu.matmul %4, %5, %cst {dimension_numbers = #tpu.dot_dimension_numbers<[1], [0], [0], [1], [0, 0, 1, 1], [], []>} : vector<8x32xbf16>, vector<32x32xbf16>, vector<8x32xf32> -> vector<8x32xf32>
    %7 = arith.addf %3, %6 : vector<8x32xf32>
    %c0_6 = arith.constant 0 : index
    %c0_7 = arith.constant 0 : index
    %8 = vector.load %arg8[%c0_6, %c0_7] : memref<8x32xf32, #tpu.memory_space<vmem>>, vector<8x32xf32>
    tpu.vector_store %arg8[%c0_6, %c0_7], %7 {strides = array<i32>} : memref<8x32xf32, #tpu.memory_space<vmem>>, vector<8x32xf32>,
    %c0_i32_8 = arith.constant 0 : i32
    %9 = arith.cmpi eq, %arg2, %c0_i32_8 : i32
    %10 = arith.extui %9 : i1 to i32
    %c0_i32_9 = arith.constant 0 : i32
    %11 = arith.cmpi ne, %10, %c0_i32_9 : i32
    scf.if %11 {
      %c0_10 = arith.constant 0 : index
      %c0_11 = arith.constant 0 : index
      %12 = vector.load %arg8[%c0_10, %c0_11] : memref<8x32xf32, #tpu.memory_space<vmem>>, vector<8x32xf32>
      %c0_12 = arith.constant 0 : index
      %c0_13 = arith.constant 0 : index
      %13 = vector.load %arg5[%c0_12, %c0_13] : memref<1x32xf32, #tpu.memory_space<vmem>>, vector<1x32xf32>
      %14 = vector.broadcast %13 : vector<1x32xf32> to vector<8x32xf32>
      %15 = arith.addf %12, %14 : vector<8x32xf32>
      %c0_14 = arith.constant 0 : index
      %c0_15 = arith.constant 0 : index
      %16 = vector.load %arg6[%c0_14, %c0_15] : memref<8x32xbf16, #tpu.memory_space<vmem>>, vector<8x32xbf16>
      %17 = arith.extf %16 : vector<8x32xbf16> to vector<8x32xf32>
      %18 = arith.addf %15, %17 : vector<8x32xf32>
      %19 = arith.truncf %18 : vector<8x32xf32> to vector<8x32xbf16>
      %c0_16 = arith.constant 0 : index
      %c0_17 = arith.constant 0 : index
      %20 = vector.load %arg7[%c0_16, %c0_17] : memref<8x32xbf16, #tpu.memory_space<vmem>>, vector<8x32xbf16>
      tpu.vector_store %arg7[%c0_16, %c0_17], %19 {strides = array<i32>} : memref<8x32xbf16, #tpu.memory_space<vmem>>, vector<8x32xbf16>,
    } else {
    }
    return
  }
  func.func @transform_0(%arg0: i32, %arg1: i32, %arg2: i32) -> (i32, i32) {
    %c0_i32 = arith.constant 0 : i32
    return %arg0, %arg2 : i32, i32
  }
  func.func @transform_1(%arg0: i32, %arg1: i32, %arg2: i32) -> (i32, i32) {
    %c0_i32 = arith.constant 0 : i32
    return %arg2, %arg1 : i32, i32
  }
  func.func @transform_2(%arg0: i32, %arg1: i32, %arg2: i32) -> (i32, i32) {
    %c0_i32 = arith.constant 0 : i32
    %c0_i32_0 = arith.constant 0 : i32
    return %c0_i32, %arg1 : i32, i32
  }
  func.func @transform_3(%arg0: i32, %arg1: i32, %arg2: i32) -> (i32, i32) {
    %c0_i32 = arith.constant 0 : i32
    return %arg0, %arg1 : i32, i32
  }
  func.func @transform_4(%arg0: i32, %arg1: i32, %arg2: i32) -> (i32, i32) {
    %c0_i32 = arith.constant 0 : i32
    return %arg0, %arg1 : i32, i32
  }
}

module attributes {stable_mosaic.version = 11 : i64} {
  func.func @kernel(%arg0: i32, %arg1: i32, %arg2: memref<8x32xbf16, #tpu.memory_space<vmem>>, %arg3: memref<1x32xf32, #tpu.memory_space<vmem>>, %arg4: memref<1x32xf32, #tpu.memory_space<vmem>>, %arg5: memref<32x128xbf16, #tpu.memory_space<vmem>>, %arg6: memref<1x128xf32, #tpu.memory_space<vmem>>, %arg7: memref<8x128xbf16, #tpu.memory_space<vmem>>) attributes {dimension_semantics = [#tpu.dimension_semantics<parallel>, #tpu.dimension_semantics<parallel>], iteration_bounds = array<i64: 1, 1>, scalar_prefetch = 0 : i64, scratch_operands = 0 : i64, tpu.core_type = #tpu.core_type<tc>, window_params = [{transform_indices = @transform_0, window_bounds = array<i64: 8, 32>}, {pipeline_mode = #tpu.pipeline_mode<synchronous>, transform_indices = @transform_1, window_bounds = array<i64: 1, 32>}, {pipeline_mode = #tpu.pipeline_mode<synchronous>, transform_indices = @transform_2, window_bounds = array<i64: 1, 32>}, {transform_indices = @transform_3, window_bounds = array<i64: 32, 128>}, {transform_indices = @transform_4, window_bounds = array<i64: 1, 128>}, {transform_indices = @transform_5, window_bounds = array<i64: 8, 128>}]} {
    %c0 = arith.constant 0 : index
    %c0_0 = arith.constant 0 : index
    %0 = vector.load %arg2[%c0, %c0_0] : memref<8x32xbf16, #tpu.memory_space<vmem>>, vector<8x32xbf16>
    %1 = arith.extf %0 : vector<8x32xbf16> to vector<8x32xf32>
    %cst = arith.constant dense<0.000000e+00> : vector<8xf32>
    %2 = vector.multi_reduction <add>, %1, %cst [1] : vector<8x32xf32> to vector<8xf32>
    %3 = vector.shape_cast %2 : vector<8xf32> to vector<8x1xf32>
    %cst_1 = arith.constant 3.200000e+01 : f32
    %4 = vector.broadcast %cst_1 : f32 to vector<8x1xf32>
    %5 = arith.divf %3, %4 : vector<8x1xf32>
    %6 = vector.broadcast %5 : vector<8x1xf32> to vector<8x32xf32>
    %7 = arith.subf %1, %6 : vector<8x32xf32>
    %8 = arith.mulf %7, %7 : vector<8x32xf32>
    %cst_2 = arith.constant dense<0.000000e+00> : vector<8xf32>
    %9 = vector.multi_reduction <add>, %8, %cst_2 [1] : vector<8x32xf32> to vector<8xf32>
    %10 = vector.shape_cast %9 : vector<8xf32> to vector<8x1xf32>
    %cst_3 = arith.constant 3.200000e+01 : f32
    %11 = vector.broadcast %cst_3 : f32 to vector<8x1xf32>
    %12 = arith.divf %10, %11 : vector<8x1xf32>
    %13 = vector.broadcast %5 : vector<8x1xf32> to vector<8x32xf32>
    %14 = arith.subf %1, %13 : vector<8x32xf32>
    %cst_4 = arith.constant 9.99999997E-7 : f32
    %15 = vector.broadcast %cst_4 : f32 to vector<8x1xf32>
    %16 = arith.addf %12, %15 : vector<8x1xf32>
    %17 = math.rsqrt %16 : vector<8x1xf32>
    %18 = vector.broadcast %17 : vector<8x1xf32> to vector<8x32xf32>
    %19 = arith.mulf %14, %18 : vector<8x32xf32>
    %c0_5 = arith.constant 0 : index
    %c0_6 = arith.constant 0 : index
    %20 = vector.load %arg3[%c0_5, %c0_6] : memref<1x32xf32, #tpu.memory_space<vmem>>, vector<1x32xf32>
    %21 = vector.broadcast %20 : vector<1x32xf32> to vector<8x32xf32>
    %22 = arith.mulf %19, %21 : vector<8x32xf32>
    %c0_7 = arith.constant 0 : index
    %c0_8 = arith.constant 0 : index
    %23 = vector.load %arg4[%c0_7, %c0_8] : memref<1x32xf32, #tpu.memory_space<vmem>>, vector<1x32xf32>
    %24 = vector.broadcast %23 : vector<1x32xf32> to vector<8x32xf32>
    %25 = arith.addf %22, %24 : vector<8x32xf32>
    %26 = arith.truncf %25 : vector<8x32xf32> to vector<8x32xbf16>
    %c0_9 = arith.constant 0 : index
    %c0_10 = arith.constant 0 : index
    %27 = vector.load %arg5[%c0_9, %c0_10] : memref<32x128xbf16, #tpu.memory_space<vmem>>, vector<32x128xbf16>
    %cst_11 = arith.constant dense<0.000000e+00> : vector<8x128xf32>
    %28 = tpu.matmul %26, %27, %cst_11 {dimension_numbers = #tpu.dot_dimension_numbers<[1], [0], [0], [1], [0, 0, 1, 1], [], []>} : vector<8x32xbf16>, vector<32x128xbf16>, vector<8x128xf32> -> vector<8x128xf32>
    %c0_12 = arith.constant 0 : index
    %c0_13 = arith.constant 0 : index
    %29 = vector.load %arg6[%c0_12, %c0_13] : memref<1x128xf32, #tpu.memory_space<vmem>>, vector<1x128xf32>
    %30 = vector.broadcast %29 : vector<1x128xf32> to vector<8x128xf32>
    %31 = arith.addf %28, %30 : vector<8x128xf32>
    %32 = arith.mulf %31, %31 : vector<8x128xf32>
    %33 = arith.mulf %31, %32 : vector<8x128xf32>
    %cst_14 = arith.constant 4.471500e-02 : f32
    %34 = vector.broadcast %cst_14 : f32 to vector<8x128xf32>
    %35 = arith.mulf %34, %33 : vector<8x128xf32>
    %36 = arith.addf %31, %35 : vector<8x128xf32>
    %cst_15 = arith.constant 0.797884583 : f32
    %37 = vector.broadcast %cst_15 : f32 to vector<8x128xf32>
    %38 = arith.mulf %37, %36 : vector<8x128xf32>
    %39 = math.tanh %38 : vector<8x128xf32>
    %cst_16 = arith.constant 1.000000e+00 : f32
    %40 = vector.broadcast %cst_16 : f32 to vector<8x128xf32>
    %41 = arith.addf %40, %39 : vector<8x128xf32>
    %cst_17 = arith.constant 5.000000e-01 : f32
    %42 = vector.broadcast %cst_17 : f32 to vector<8x128xf32>
    %43 = arith.mulf %42, %41 : vector<8x128xf32>
    %44 = arith.mulf %31, %43 : vector<8x128xf32>
    %45 = arith.truncf %44 : vector<8x128xf32> to vector<8x128xbf16>
    %c0_18 = arith.constant 0 : index
    %c0_19 = arith.constant 0 : index
    %46 = vector.load %arg7[%c0_18, %c0_19] : memref<8x128xbf16, #tpu.memory_space<vmem>>, vector<8x128xbf16>
    tpu.vector_store %arg7[%c0_18, %c0_19], %45 {strides = array<i32>} : memref<8x128xbf16, #tpu.memory_space<vmem>>, vector<8x128xbf16>,
    return
  }
  func.func @transform_0(%arg0: i32, %arg1: i32) -> (i32, i32) {
    %c0_i32 = arith.constant 0 : i32
    %c0_i32_0 = arith.constant 0 : i32
    return %arg0, %c0_i32 : i32, i32
  }
  func.func @transform_1(%arg0: i32, %arg1: i32) -> (i32, i32) {
    %c0_i32 = arith.constant 0 : i32
    %c0_i32_0 = arith.constant 0 : i32
    %c0_i32_1 = arith.constant 0 : i32
    return %c0_i32, %c0_i32_0 : i32, i32
  }
  func.func @transform_2(%arg0: i32, %arg1: i32) -> (i32, i32) {
    %c0_i32 = arith.constant 0 : i32
    %c0_i32_0 = arith.constant 0 : i32
    %c0_i32_1 = arith.constant 0 : i32
    return %c0_i32, %c0_i32_0 : i32, i32
  }
  func.func @transform_3(%arg0: i32, %arg1: i32) -> (i32, i32) {
    %c0_i32 = arith.constant 0 : i32
    %c0_i32_0 = arith.constant 0 : i32
    return %c0_i32, %arg1 : i32, i32
  }
  func.func @transform_4(%arg0: i32, %arg1: i32) -> (i32, i32) {
    %c0_i32 = arith.constant 0 : i32
    %c0_i32_0 = arith.constant 0 : i32
    return %c0_i32, %arg1 : i32, i32
  }
  func.func @transform_5(%arg0: i32, %arg1: i32) -> (i32, i32) {
    %c0_i32 = arith.constant 0 : i32
    return %arg0, %arg1 : i32, i32
  }
}

module attributes {stable_mosaic.version = 11 : i64} {
  func.func @kernel(%arg0: i32, %arg1: i32, %arg2: i32, %arg3: memref<8x128xbf16, #tpu.memory_space<vmem>>, %arg4: memref<128x32xbf16, #tpu.memory_space<vmem>>, %arg5: memref<1x32xf32, #tpu.memory_space<vmem>>, %arg6: memref<8x32xbf16, #tpu.memory_space<vmem>>, %arg7: memref<8x32xbf16, #tpu.memory_space<vmem>>, %arg8: memref<8x32xf32, #tpu.memory_space<vmem>>) attributes {dimension_semantics = [#tpu.dimension_semantics<parallel>, #tpu.dimension_semantics<parallel>, #tpu.dimension_semantics<arbitrary>], iteration_bounds = array<i64: 1, 1, 1>, scalar_prefetch = 0 : i64, scratch_operands = 1 : i64, tpu.core_type = #tpu.core_type<tc>, window_params = [{transform_indices = @transform_0, window_bounds = array<i64: 8, 128>}, {transform_indices = @transform_1, window_bounds = array<i64: 128, 32>}, {transform_indices = @transform_2, window_bounds = array<i64: 1, 32>}, {transform_indices = @transform_3, window_bounds = array<i64: 8, 32>}, {transform_indices = @transform_4, window_bounds = array<i64: 8, 32>}]} {
    %c0_i32 = arith.constant 0 : i32
    %0 = arith.cmpi eq, %arg2, %c0_i32 : i32
    %1 = arith.extui %0 : i1 to i32
    %c0_i32_0 = arith.constant 0 : i32
    %2 = arith.cmpi ne, %1, %c0_i32_0 : i32
    scf.if %2 {
      %cst_10 = arith.constant 0.000000e+00 : f32
      %12 = vector.broadcast %cst_10 : f32 to vector<8x32xf32>
      %c0_11 = arith.constant 0 : index
      %c0_12 = arith.constant 0 : index
      %13 = vector.load %arg8[%c0_11, %c0_12] : memref<8x32xf32, #tpu.memory_space<vmem>>, vector<8x32xf32>
      tpu.vector_store %arg8[%c0_11, %c0_12], %12 {strides = array<i32>} : memref<8x32xf32, #tpu.memory_space<vmem>>, vector<8x32xf32>,
    } else {
    }
    %c0 = arith.constant 0 : index
    %c0_1 = arith.constant 0 : index
    %3 = vector.load %arg8[%c0, %c0_1] : memref<8x32xf32, #tpu.memory_space<vmem>>, vector<8x32xf32>
    %c0_2 = arith.constant 0 : index
    %c0_3 = arith.constant 0 : index
    %4 = vector.load %arg3[%c0_2, %c0_3] : memref<8x128xbf16, #tpu.memory_space<vmem>>, vector<8x128xbf16>
    %c0_4 = arith.constant 0 : index
    %c0_5 = arith.constant 0 : index
    %5 = vector.load %arg4[%c0_4, %c0_5] : memref<128x32xbf16, #tpu.memory_space<vmem>>, vector<128x32xbf16>
    %cst = arith.constant dense<0.000000e+00> : vector<8x32xf32>
    %6 = tpu.matmul %4, %5, %cst {dimension_numbers = #tpu.dot_dimension_numbers<[1], [0], [0], [1], [0, 0, 1, 1], [], []>} : vector<8x128xbf16>, vector<128x32xbf16>, vector<8x32xf32> -> vector<8x32xf32>
    %7 = arith.addf %3, %6 : vector<8x32xf32>
    %c0_6 = arith.constant 0 : index
    %c0_7 = arith.constant 0 : index
    %8 = vector.load %arg8[%c0_6, %c0_7] : memref<8x32xf32, #tpu.memory_space<vmem>>, vector<8x32xf32>
    tpu.vector_store %arg8[%c0_6, %c0_7], %7 {strides = array<i32>} : memref<8x32xf32, #tpu.memory_space<vmem>>, vector<8x32xf32>,
    %c0_i32_8 = arith.constant 0 : i32
    %9 = arith.cmpi eq, %arg2, %c0_i32_8 : i32
    %10 = arith.extui %9 : i1 to i32
    %c0_i32_9 = arith.constant 0 : i32
    %11 = arith.cmpi ne, %10, %c0_i32_9 : i32
    scf.if %11 {
      %c0_10 = arith.constant 0 : index
      %c0_11 = arith.constant 0 : index
      %12 = vector.load %arg8[%c0_10, %c0_11] : memref<8x32xf32, #tpu.memory_space<vmem>>, vector<8x32xf32>
      %c0_12 = arith.constant 0 : index
      %c0_13 = arith.constant 0 : index
      %13 = vector.load %arg5[%c0_12, %c0_13] : memref<1x32xf32, #tpu.memory_space<vmem>>, vector<1x32xf32>
      %14 = vector.broadcast %13 : vector<1x32xf32> to vector<8x32xf32>
      %15 = arith.addf %12, %14 : vector<8x32xf32>
      %c0_14 = arith.constant 0 : index
      %c0_15 = arith.constant 0 : index
      %16 = vector.load %arg6[%c0_14, %c0_15] : memref<8x32xbf16, #tpu.memory_space<vmem>>, vector<8x32xbf16>
      %17 = arith.extf %16 : vector<8x32xbf16> to vector<8x32xf32>
      %18 = arith.addf %15, %17 : vector<8x32xf32>
      %19 = arith.truncf %18 : vector<8x32xf32> to vector<8x32xbf16>
      %c0_16 = arith.constant 0 : index
      %c0_17 = arith.constant 0 : index
      %20 = vector.load %arg7[%c0_16, %c0_17] : memref<8x32xbf16, #tpu.memory_space<vmem>>, vector<8x32xbf16>
      tpu.vector_store %arg7[%c0_16, %c0_17], %19 {strides = array<i32>} : memref<8x32xbf16, #tpu.memory_space<vmem>>, vector<8x32xbf16>,
    } else {
    }
    return
  }
  func.func @transform_0(%arg0: i32, %arg1: i32, %arg2: i32) -> (i32, i32) {
    %c0_i32 = arith.constant 0 : i32
    return %arg0, %arg2 : i32, i32
  }
  func.func @transform_1(%arg0: i32, %arg1: i32, %arg2: i32) -> (i32, i32) {
    %c0_i32 = arith.constant 0 : i32
    return %arg2, %arg1 : i32, i32
  }
  func.func @transform_2(%arg0: i32, %arg1: i32, %arg2: i32) -> (i32, i32) {
    %c0_i32 = arith.constant 0 : i32
    %c0_i32_0 = arith.constant 0 : i32
    return %c0_i32, %arg1 : i32, i32
  }
  func.func @transform_3(%arg0: i32, %arg1: i32, %arg2: i32) -> (i32, i32) {
    %c0_i32 = arith.constant 0 : i32
    return %arg0, %arg1 : i32, i32
  }
  func.func @transform_4(%arg0: i32, %arg1: i32, %arg2: i32) -> (i32, i32) {
    %c0_i32 = arith.constant 0 : i32
    return %arg0, %arg1 : i32, i32
  }
}

module attributes {stable_mosaic.version = 11 : i64} {
  func.func @kernel(%arg0: i32, %arg1: i32, %arg2: i32, %arg3: memref<8x32xbf16, #tpu.memory_space<vmem>>, %arg4: memref<32x32xbf16, #tpu.memory_space<vmem>>, %arg5: memref<1x32xf32, #tpu.memory_space<vmem>>, %arg6: memref<1x32xf32, #tpu.memory_space<vmem>>, %arg7: memref<8x32xbf16, #tpu.memory_space<vmem>>, %arg8: memref<8x32xf32, #tpu.memory_space<vmem>>) attributes {dimension_semantics = [#tpu.dimension_semantics<parallel>, #tpu.dimension_semantics<parallel>, #tpu.dimension_semantics<arbitrary>], iteration_bounds = array<i64: 1, 1, 1>, scalar_prefetch = 0 : i64, scratch_operands = 1 : i64, tpu.core_type = #tpu.core_type<tc>, window_params = [{transform_indices = @transform_0, window_bounds = array<i64: 8, 32>}, {transform_indices = @transform_1, window_bounds = array<i64: 32, 32>}, {pipeline_mode = #tpu.pipeline_mode<synchronous>, transform_indices = @transform_2, window_bounds = array<i64: 1, 32>}, {pipeline_mode = #tpu.pipeline_mode<synchronous>, transform_indices = @transform_3, window_bounds = array<i64: 1, 32>}, {transform_indices = @transform_4, window_bounds = array<i64: 8, 32>}]} {
    %c0_i32 = arith.constant 0 : i32
    %0 = arith.cmpi eq, %arg2, %c0_i32 : i32
    %1 = arith.extui %0 : i1 to i32
    %c0_i32_0 = arith.constant 0 : i32
    %2 = arith.cmpi ne, %1, %c0_i32_0 : i32
    scf.if %2 {
      %cst_10 = arith.constant 0.000000e+00 : f32
      %12 = vector.broadcast %cst_10 : f32 to vector<8x32xf32>
      %c0_11 = arith.constant 0 : index
      %c0_12 = arith.constant 0 : index
      %13 = vector.load %arg8[%c0_11, %c0_12] : memref<8x32xf32, #tpu.memory_space<vmem>>, vector<8x32xf32>
      tpu.vector_store %arg8[%c0_11, %c0_12], %12 {strides = array<i32>} : memref<8x32xf32, #tpu.memory_space<vmem>>, vector<8x32xf32>,
    } else {
    }
    %c0 = arith.constant 0 : index
    %c0_1 = arith.constant 0 : index
    %3 = vector.load %arg8[%c0, %c0_1] : memref<8x32xf32, #tpu.memory_space<vmem>>, vector<8x32xf32>
    %c0_2 = arith.constant 0 : index
    %c0_3 = arith.constant 0 : index
    %4 = vector.load %arg3[%c0_2, %c0_3] : memref<8x32xbf16, #tpu.memory_space<vmem>>, vector<8x32xbf16>
    %c0_4 = arith.constant 0 : index
    %c0_5 = arith.constant 0 : index
    %5 = vector.load %arg4[%c0_4, %c0_5] : memref<32x32xbf16, #tpu.memory_space<vmem>>, vector<32x32xbf16>
    %cst = arith.constant dense<0.000000e+00> : vector<8x32xf32>
    %6 = tpu.matmul %4, %5, %cst {dimension_numbers = #tpu.dot_dimension_numbers<[1], [0], [0], [1], [0, 0, 1, 1], [], []>} : vector<8x32xbf16>, vector<32x32xbf16>, vector<8x32xf32> -> vector<8x32xf32>
    %7 = arith.addf %3, %6 : vector<8x32xf32>
    %c0_6 = arith.constant 0 : index
    %c0_7 = arith.constant 0 : index
    %8 = vector.load %arg8[%c0_6, %c0_7] : memref<8x32xf32, #tpu.memory_space<vmem>>, vector<8x32xf32>
    tpu.vector_store %arg8[%c0_6, %c0_7], %7 {strides = array<i32>} : memref<8x32xf32, #tpu.memory_space<vmem>>, vector<8x32xf32>,
    %c0_i32_8 = arith.constant 0 : i32
    %9 = arith.cmpi eq, %arg2, %c0_i32_8 : i32
    %10 = arith.extui %9 : i1 to i32
    %c0_i32_9 = arith.constant 0 : i32
    %11 = arith.cmpi ne, %10, %c0_i32_9 : i32
    scf.if %11 {
      %c0_10 = arith.constant 0 : index
      %c0_11 = arith.constant 0 : index
      %12 = vector.load %arg8[%c0_10, %c0_11] : memref<8x32xf32, #tpu.memory_space<vmem>>, vector<8x32xf32>
      %cst_12 = arith.constant dense<0.000000e+00> : vector<8xf32>
      %13 = vector.multi_reduction <add>, %12, %cst_12 [1] : vector<8x32xf32> to vector<8xf32>
      %14 = vector.shape_cast %13 : vector<8xf32> to vector<8x1xf32>
      %cst_13 = arith.constant 3.200000e+01 : f32
      %15 = vector.broadcast %cst_13 : f32 to vector<8x1xf32>
      %16 = arith.divf %14, %15 : vector<8x1xf32>
      %17 = vector.broadcast %16 : vector<8x1xf32> to vector<8x32xf32>
      %18 = arith.subf %12, %17 : vector<8x32xf32>
      %19 = arith.mulf %18, %18 : vector<8x32xf32>
      %cst_14 = arith.constant dense<0.000000e+00> : vector<8xf32>
      %20 = vector.multi_reduction <add>, %19, %cst_14 [1] : vector<8x32xf32> to vector<8xf32>
      %21 = vector.shape_cast %20 : vector<8xf32> to vector<8x1xf32>
      %cst_15 = arith.constant 3.200000e+01 : f32
      %22 = vector.broadcast %cst_15 : f32 to vector<8x1xf32>
      %23 = arith.divf %21, %22 : vector<8x1xf32>
      %24 = vector.broadcast %16 : vector<8x1xf32> to vector<8x32xf32>
      %25 = arith.subf %12, %24 : vector<8x32xf32>
      %cst_16 = arith.constant 9.99999997E-7 : f32
      %26 = vector.broadcast %cst_16 : f32 to vector<8x1xf32>
      %27 = arith.addf %23, %26 : vector<8x1xf32>
      %28 = math.rsqrt %27 : vector<8x1xf32>
      %29 = vector.broadcast %28 : vector<8x1xf32> to vector<8x32xf32>
      %30 = arith.mulf %25, %29 : vector<8x32xf32>
      %c0_17 = arith.constant 0 : index
      %c0_18 = arith.constant 0 : index
      %31 = vector.load %arg5[%c0_17, %c0_18] : memref<1x32xf32, #tpu.memory_space<vmem>>, vector<1x32xf32>
      %32 = vector.broadcast %31 : vector<1x32xf32> to vector<8x32xf32>
      %33 = arith.mulf %30, %32 : vector<8x32xf32>
      %c0_19 = arith.constant 0 : index
      %c0_20 = arith.constant 0 : index
      %34 = vector.load %arg6[%c0_19, %c0_20] : memref<1x32xf32, #tpu.memory_space<vmem>>, vector<1x32xf32>
      %35 = vector.broadcast %34 : vector<1x32xf32> to vector<8x32xf32>
      %36 = arith.addf %33, %35 : vector<8x32xf32>
      %37 = arith.truncf %36 : vector<8x32xf32> to vector<8x32xbf16>
      %c0_21 = arith.constant 0 : index
      %c0_22 = arith.constant 0 : index
      %38 = vector.load %arg7[%c0_21, %c0_22] : memref<8x32xbf16, #tpu.memory_space<vmem>>, vector<8x32xbf16>
      tpu.vector_store %arg7[%c0_21, %c0_22], %37 {strides = array<i32>} : memref<8x32xbf16, #tpu.memory_space<vmem>>, vector<8x32xbf16>,
    } else {
    }
    return
  }
  func.func @transform_0(%arg0: i32, %arg1: i32, %arg2: i32) -> (i32, i32) {
    %c0_i32 = arith.constant 0 : i32
    return %arg0, %arg2 : i32, i32
  }
  func.func @transform_1(%arg0: i32, %arg1: i32, %arg2: i32) -> (i32, i32) {
    %c0_i32 = arith.constant 0 : i32
    return %arg2, %arg1 : i32, i32
  }
  func.func @transform_2(%arg0: i32, %arg1: i32, %arg2: i32) -> (i32, i32) {
    %c0_i32 = arith.constant 0 : i32
    %c0_i32_0 = arith.constant 0 : i32
    %c0_i32_1 = arith.constant 0 : i32
    return %c0_i32, %c0_i32_0 : i32, i32
  }
  func.func @transform_3(%arg0: i32, %arg1: i32, %arg2: i32) -> (i32, i32) {
    %c0_i32 = arith.constant 0 : i32
    %c0_i32_0 = arith.constant 0 : i32
    %c0_i32_1 = arith.constant 0 : i32
    return %c0_i32, %c0_i32_0 : i32, i32
  }
  func.func @transform_4(%arg0: i32, %arg1: i32, %arg2: i32) -> (i32, i32) {
    %c0_i32 = arith.constant 0 : i32
    return %arg0, %arg1 : i32, i32
  }
}

module attributes {stable_mosaic.version = 11 : i64} {
  func.func @kernel(%arg0: i32, %arg1: memref<1x4x4x32xbf16, #tpu.memory_space<vmem>>, %arg2: memref<9x32x32xbf16, #tpu.memory_space<vmem>>, %arg3: memref<1x32xf32, #tpu.memory_space<vmem>>, %arg4: memref<1x32xf32, #tpu.memory_space<vmem>>, %arg5: memref<1x4x32xf32, #tpu.memory_space<vmem>>) attributes {dimension_semantics = [#tpu.dimension_semantics<parallel>], iteration_bounds = array<i64: 2>, scalar_prefetch = 0 : i64, scratch_operands = 0 : i64, tpu.core_type = #tpu.core_type<tc>, window_params = [{transform_indices = @transform_0, window_bounds = array<i64: 1, 4, 4, 32>}, {pipeline_mode = #tpu.pipeline_mode<synchronous>, transform_indices = @transform_1, window_bounds = array<i64: 9, 32, 32>}, {pipeline_mode = #tpu.pipeline_mode<synchronous>, transform_indices = @transform_2, window_bounds = array<i64: 1, 32>}, {pipeline_mode = #tpu.pipeline_mode<synchronous>, transform_indices = @transform_3, window_bounds = array<i64: 1, 32>}, {transform_indices = @transform_4, window_bounds = array<i64: 1, 4, 32>}]} {
    %cst = arith.constant 0.000000e+00 : f32
    %0 = vector.broadcast %cst : f32 to vector<4x32xf32>
    %c0 = arith.constant 0 : index
    %c0_0 = arith.constant 0 : index
    %c0_1 = arith.constant 0 : index
    %c0_2 = arith.constant 0 : index
    %1 = vector.load %arg1[%c0, %c0_0, %c0_1, %c0_2] : memref<1x4x4x32xbf16, #tpu.memory_space<vmem>>, vector<1x2x2x32xbf16>
    %2 = vector.shape_cast %1 : vector<1x2x2x32xbf16> to vector<2x2x32xbf16>
    %3 = vector.shape_cast %2 : vector<2x2x32xbf16> to vector<4x32xbf16>
    %c0_3 = arith.constant 0 : index
    %c0_4 = arith.constant 0 : index
    %c0_5 = arith.constant 0 : index
    %4 = vector.load %arg2[%c0_3, %c0_4, %c0_5] : memref<9x32x32xbf16, #tpu.memory_space<vmem>>, vector<1x32x32xbf16>
    %5 = vector.shape_cast %4 : vector<1x32x32xbf16> to vector<32x32xbf16>
    %cst_6 = arith.constant dense<0.000000e+00> : vector<4x32xf32>
    %6 = tpu.matmul %3, %5, %cst_6 {dimension_numbers = #tpu.dot_dimension_numbers<[1], [0], [0], [1], [0, 0, 1, 1], [], []>} : vector<4x32xbf16>, vector<32x32xbf16>, vector<4x32xf32> -> vector<4x32xf32>
    %7 = arith.addf %0, %6 : vector<4x32xf32>
    %c0_7 = arith.constant 0 : index
    %c0_8 = arith.constant 0 : index
    %c1 = arith.constant 1 : index
    %c0_9 = arith.constant 0 : index
    %8 = vector.load %arg1[%c0_7, %c0_8, %c1, %c0_9] : memref<1x4x4x32xbf16, #tpu.memory_space<vmem>>, vector<1x2x2x32xbf16>
    %9 = vector.shape_cast %8 : vector<1x2x2x32xbf16> to vector<2x2x32xbf16>
    %10 = vector.shape_cast %9 : vector<2x2x32xbf16> to vector<4x32xbf16>
    %c1_10 = arith.constant 1 : index
    %c0_11 = arith.constant 0 : index
    %c0_12 = arith.constant 0 : index
    %11 = vector.load %arg2[%c1_10, %c0_11, %c0_12] : memref<9x32x32xbf16, #tpu.memory_space<vmem>>, vector<1x32x32xbf16>
    %12 = vector.shape_cast %11 : vector<1x32x32xbf16> to vector<32x32xbf16>
    %cst_13 = arith.constant dense<0.000000e+00> : vector<4x32xf32>
    %13 = tpu.matmul %10, %12, %cst_13 {dimension_numbers = #tpu.dot_dimension_numbers<[1], [0], [0], [1], [0, 0, 1, 1], [], []>} : vector<4x32xbf16>, vector<32x32xbf16>, vector<4x32xf32> -> vector<4x32xf32>
    %14 = arith.addf %7, %13 : vector<4x32xf32>
    %c0_14 = arith.constant 0 : index
    %c0_15 = arith.constant 0 : index
    %c2 = arith.constant 2 : index
    %c0_16 = arith.constant 0 : index
    %15 = vector.load %arg1[%c0_14, %c0_15, %c2, %c0_16] : memref<1x4x4x32xbf16, #tpu.memory_space<vmem>>, vector<1x2x2x32xbf16>
    %16 = vector.shape_cast %15 : vector<1x2x2x32xbf16> to vector<2x2x32xbf16>
    %17 = vector.shape_cast %16 : vector<2x2x32xbf16> to vector<4x32xbf16>
    %c2_17 = arith.constant 2 : index
    %c0_18 = arith.constant 0 : index
    %c0_19 = arith.constant 0 : index
    %18 = vector.load %arg2[%c2_17, %c0_18, %c0_19] : memref<9x32x32xbf16, #tpu.memory_space<vmem>>, vector<1x32x32xbf16>
    %19 = vector.shape_cast %18 : vector<1x32x32xbf16> to vector<32x32xbf16>
    %cst_20 = arith.constant dense<0.000000e+00> : vector<4x32xf32>
    %20 = tpu.matmul %17, %19, %cst_20 {dimension_numbers = #tpu.dot_dimension_numbers<[1], [0], [0], [1], [0, 0, 1, 1], [], []>} : vector<4x32xbf16>, vector<32x32xbf16>, vector<4x32xf32> -> vector<4x32xf32>
    %21 = arith.addf %14, %20 : vector<4x32xf32>
    %c0_21 = arith.constant 0 : index
    %c1_22 = arith.constant 1 : index
    %c0_23 = arith.constant 0 : index
    %c0_24 = arith.constant 0 : index
    %22 = vector.load %arg1[%c0_21, %c1_22, %c0_23, %c0_24] : memref<1x4x4x32xbf16, #tpu.memory_space<vmem>>, vector<1x2x2x32xbf16>
    %23 = vector.shape_cast %22 : vector<1x2x2x32xbf16> to vector<2x2x32xbf16>
    %24 = vector.shape_cast %23 : vector<2x2x32xbf16> to vector<4x32xbf16>
    %c3 = arith.constant 3 : index
    %c0_25 = arith.constant 0 : index
    %c0_26 = arith.constant 0 : index
    %25 = vector.load %arg2[%c3, %c0_25, %c0_26] : memref<9x32x32xbf16, #tpu.memory_space<vmem>>, vector<1x32x32xbf16>
    %26 = vector.shape_cast %25 : vector<1x32x32xbf16> to vector<32x32xbf16>
    %cst_27 = arith.constant dense<0.000000e+00> : vector<4x32xf32>
    %27 = tpu.matmul %24, %26, %cst_27 {dimension_numbers = #tpu.dot_dimension_numbers<[1], [0], [0], [1], [0, 0, 1, 1], [], []>} : vector<4x32xbf16>, vector<32x32xbf16>, vector<4x32xf32> -> vector<4x32xf32>
    %28 = arith.addf %21, %27 : vector<4x32xf32>
    %c0_28 = arith.constant 0 : index
    %c1_29 = arith.constant 1 : index
    %c1_30 = arith.constant 1 : index
    %c0_31 = arith.constant 0 : index
    %29 = vector.load %arg1[%c0_28, %c1_29, %c1_30, %c0_31] : memref<1x4x4x32xbf16, #tpu.memory_space<vmem>>, vector<1x2x2x32xbf16>
    %30 = vector.shape_cast %29 : vector<1x2x2x32xbf16> to vector<2x2x32xbf16>
    %31 = vector.shape_cast %30 : vector<2x2x32xbf16> to vector<4x32xbf16>
    %c4 = arith.constant 4 : index
    %c0_32 = arith.constant 0 : index
    %c0_33 = arith.constant 0 : index
    %32 = vector.load %arg2[%c4, %c0_32, %c0_33] : memref<9x32x32xbf16, #tpu.memory_space<vmem>>, vector<1x32x32xbf16>
    %33 = vector.shape_cast %32 : vector<1x32x32xbf16> to vector<32x32xbf16>
    %cst_34 = arith.constant dense<0.000000e+00> : vector<4x32xf32>
    %34 = tpu.matmul %31, %33, %cst_34 {dimension_numbers = #tpu.dot_dimension_numbers<[1], [0], [0], [1], [0, 0, 1, 1], [], []>} : vector<4x32xbf16>, vector<32x32xbf16>, vector<4x32xf32> -> vector<4x32xf32>
    %35 = arith.addf %28, %34 : vector<4x32xf32>
    %c0_35 = arith.constant 0 : index
    %c1_36 = arith.constant 1 : index
    %c2_37 = arith.constant 2 : index
    %c0_38 = arith.constant 0 : index
    %36 = vector.load %arg1[%c0_35, %c1_36, %c2_37, %c0_38] : memref<1x4x4x32xbf16, #tpu.memory_space<vmem>>, vector<1x2x2x32xbf16>
    %37 = vector.shape_cast %36 : vector<1x2x2x32xbf16> to vector<2x2x32xbf16>
    %38 = vector.shape_cast %37 : vector<2x2x32xbf16> to vector<4x32xbf16>
    %c5 = arith.constant 5 : index
    %c0_39 = arith.constant 0 : index
    %c0_40 = arith.constant 0 : index
    %39 = vector.load %arg2[%c5, %c0_39, %c0_40] : memref<9x32x32xbf16, #tpu.memory_space<vmem>>, vector<1x32x32xbf16>
    %40 = vector.shape_cast %39 : vector<1x32x32xbf16> to vector<32x32xbf16>
    %cst_41 = arith.constant dense<0.000000e+00> : vector<4x32xf32>
    %41 = tpu.matmul %38, %40, %cst_41 {dimension_numbers = #tpu.dot_dimension_numbers<[1], [0], [0], [1], [0, 0, 1, 1], [], []>} : vector<4x32xbf16>, vector<32x32xbf16>, vector<4x32xf32> -> vector<4x32xf32>
    %42 = arith.addf %35, %41 : vector<4x32xf32>
    %c0_42 = arith.constant 0 : index
    %c2_43 = arith.constant 2 : index
    %c0_44 = arith.constant 0 : index
    %c0_45 = arith.constant 0 : index
    %43 = vector.load %arg1[%c0_42, %c2_43, %c0_44, %c0_45] : memref<1x4x4x32xbf16, #tpu.memory_space<vmem>>, vector<1x2x2x32xbf16>
    %44 = vector.shape_cast %43 : vector<1x2x2x32xbf16> to vector<2x2x32xbf16>
    %45 = vector.shape_cast %44 : vector<2x2x32xbf16> to vector<4x32xbf16>
    %c6 = arith.constant 6 : index
    %c0_46 = arith.constant 0 : index
    %c0_47 = arith.constant 0 : index
    %46 = vector.load %arg2[%c6, %c0_46, %c0_47] : memref<9x32x32xbf16, #tpu.memory_space<vmem>>, vector<1x32x32xbf16>
    %47 = vector.shape_cast %46 : vector<1x32x32xbf16> to vector<32x32xbf16>
    %cst_48 = arith.constant dense<0.000000e+00> : vector<4x32xf32>
    %48 = tpu.matmul %45, %47, %cst_48 {dimension_numbers = #tpu.dot_dimension_numbers<[1], [0], [0], [1], [0, 0, 1, 1], [], []>} : vector<4x32xbf16>, vector<32x32xbf16>, vector<4x32xf32> -> vector<4x32xf32>
    %49 = arith.addf %42, %48 : vector<4x32xf32>
    %c0_49 = arith.constant 0 : index
    %c2_50 = arith.constant 2 : index
    %c1_51 = arith.constant 1 : index
    %c0_52 = arith.constant 0 : index
    %50 = vector.load %arg1[%c0_49, %c2_50, %c1_51, %c0_52] : memref<1x4x4x32xbf16, #tpu.memory_space<vmem>>, vector<1x2x2x32xbf16>
    %51 = vector.shape_cast %50 : vector<1x2x2x32xbf16> to vector<2x2x32xbf16>
    %52 = vector.shape_cast %51 : vector<2x2x32xbf16> to vector<4x32xbf16>
    %c7 = arith.constant 7 : index
    %c0_53 = arith.constant 0 : index
    %c0_54 = arith.constant 0 : index
    %53 = vector.load %arg2[%c7, %c0_53, %c0_54] : memref<9x32x32xbf16, #tpu.memory_space<vmem>>, vector<1x32x32xbf16>
    %54 = vector.shape_cast %53 : vector<1x32x32xbf16> to vector<32x32xbf16>
    %cst_55 = arith.constant dense<0.000000e+00> : vector<4x32xf32>
    %55 = tpu.matmul %52, %54, %cst_55 {dimension_numbers = #tpu.dot_dimension_numbers<[1], [0], [0], [1], [0, 0, 1, 1], [], []>} : vector<4x32xbf16>, vector<32x32xbf16>, vector<4x32xf32> -> vector<4x32xf32>
    %56 = arith.addf %49, %55 : vector<4x32xf32>
    %c0_56 = arith.constant 0 : index
    %c2_57 = arith.constant 2 : index
    %c2_58 = arith.constant 2 : index
    %c0_59 = arith.constant 0 : index
    %57 = vector.load %arg1[%c0_56, %c2_57, %c2_58, %c0_59] : memref<1x4x4x32xbf16, #tpu.memory_space<vmem>>, vector<1x2x2x32xbf16>
    %58 = vector.shape_cast %57 : vector<1x2x2x32xbf16> to vector<2x2x32xbf16>
    %59 = vector.shape_cast %58 : vector<2x2x32xbf16> to vector<4x32xbf16>
    %c8 = arith.constant 8 : index
    %c0_60 = arith.constant 0 : index
    %c0_61 = arith.constant 0 : index
    %60 = vector.load %arg2[%c8, %c0_60, %c0_61] : memref<9x32x32xbf16, #tpu.memory_space<vmem>>, vector<1x32x32xbf16>
    %61 = vector.shape_cast %60 : vector<1x32x32xbf16> to vector<32x32xbf16>
    %cst_62 = arith.constant dense<0.000000e+00> : vector<4x32xf32>
    %62 = tpu.matmul %59, %61, %cst_62 {dimension_numbers = #tpu.dot_dimension_numbers<[1], [0], [0], [1], [0, 0, 1, 1], [], []>} : vector<4x32xbf16>, vector<32x32xbf16>, vector<4x32xf32> -> vector<4x32xf32>
    %63 = arith.addf %56, %62 : vector<4x32xf32>
    %cst_63 = arith.constant dense<0.000000e+00> : vector<4xf32>
    %64 = vector.multi_reduction <add>, %63, %cst_63 [1] : vector<4x32xf32> to vector<4xf32>
    %65 = vector.shape_cast %64 : vector<4xf32> to vector<4x1xf32>
    %cst_64 = arith.constant 3.200000e+01 : f32
    %66 = vector.broadcast %cst_64 : f32 to vector<4x1xf32>
    %67 = arith.divf %65, %66 : vector<4x1xf32>
    %68 = vector.broadcast %67 : vector<4x1xf32> to vector<4x32xf32>
    %69 = arith.subf %63, %68 : vector<4x32xf32>
    %70 = arith.mulf %69, %69 : vector<4x32xf32>
    %cst_65 = arith.constant dense<0.000000e+00> : vector<4xf32>
    %71 = vector.multi_reduction <add>, %70, %cst_65 [1] : vector<4x32xf32> to vector<4xf32>
    %72 = vector.shape_cast %71 : vector<4xf32> to vector<4x1xf32>
    %cst_66 = arith.constant 3.200000e+01 : f32
    %73 = vector.broadcast %cst_66 : f32 to vector<4x1xf32>
    %74 = arith.divf %72, %73 : vector<4x1xf32>
    %75 = vector.broadcast %67 : vector<4x1xf32> to vector<4x32xf32>
    %76 = arith.subf %63, %75 : vector<4x32xf32>
    %cst_67 = arith.constant 9.99999997E-7 : f32
    %77 = vector.broadcast %cst_67 : f32 to vector<4x1xf32>
    %78 = arith.addf %74, %77 : vector<4x1xf32>
    %79 = math.rsqrt %78 : vector<4x1xf32>
    %80 = vector.broadcast %79 : vector<4x1xf32> to vector<4x32xf32>
    %81 = arith.mulf %76, %80 : vector<4x32xf32>
    %c0_68 = arith.constant 0 : index
    %c0_69 = arith.constant 0 : index
    %82 = vector.load %arg3[%c0_68, %c0_69] : memref<1x32xf32, #tpu.memory_space<vmem>>, vector<1x32xf32>
    %83 = vector.broadcast %82 : vector<1x32xf32> to vector<4x32xf32>
    %84 = arith.mulf %81, %83 : vector<4x32xf32>
    %c0_70 = arith.constant 0 : index
    %c0_71 = arith.constant 0 : index
    %85 = vector.load %arg4[%c0_70, %c0_71] : memref<1x32xf32, #tpu.memory_space<vmem>>, vector<1x32xf32>
    %86 = vector.broadcast %85 : vector<1x32xf32> to vector<4x32xf32>
    %87 = arith.addf %84, %86 : vector<4x32xf32>
    %c0_72 = arith.constant 0 : index
    %c0_73 = arith.constant 0 : index
    %c0_74 = arith.constant 0 : index
    %88 = vector.load %arg5[%c0_72, %c0_73, %c0_74] : memref<1x4x32xf32, #tpu.memory_space<vmem>>, vector<1x4x32xf32>
    %89 = vector.shape_cast %88 : vector<1x4x32xf32> to vector<4x32xf32>
    %90 = vector.shape_cast %87 : vector<4x32xf32> to vector<1x4x32xf32>
    tpu.vector_store %arg5[%c0_72, %c0_73, %c0_74], %90 {strides = array<i32>} : memref<1x4x32xf32, #tpu.memory_space<vmem>>, vector<1x4x32xf32>,
    return
  }
  func.func @transform_0(%arg0: i32) -> (i32, i32, i32, i32) {
    %c0_i32 = arith.constant 0 : i32
    %c0_i32_0 = arith.constant 0 : i32
    %c0_i32_1 = arith.constant 0 : i32
    %c0_i32_2 = arith.constant 0 : i32
    return %arg0, %c0_i32, %c0_i32_0, %c0_i32_1 : i32, i32, i32, i32
  }
  func.func @transform_1(%arg0: i32) -> (i32, i32, i32) {
    %c0_i32 = arith.constant 0 : i32
    %c0_i32_0 = arith.constant 0 : i32
    %c0_i32_1 = arith.constant 0 : i32
    %c0_i32_2 = arith.constant 0 : i32
    return %c0_i32, %c0_i32_0, %c0_i32_1 : i32, i32, i32
  }
  func.func @transform_2(%arg0: i32) -> (i32, i32) {
    %c0_i32 = arith.constant 0 : i32
    %c0_i32_0 = arith.constant 0 : i32
    %c0_i32_1 = arith.constant 0 : i32
    return %c0_i32, %c0_i32_0 : i32, i32
  }
  func.func @transform_3(%arg0: i32) -> (i32, i32) {
    %c0_i32 = arith.constant 0 : i32
    %c0_i32_0 = arith.constant 0 : i32
    %c0_i32_1 = arith.constant 0 : i32
    return %c0_i32, %c0_i32_0 : i32, i32
  }
  func.func @transform_4(%arg0: i32) -> (i32, i32, i32) {
    %c0_i32 = arith.constant 0 : i32
    %c0_i32_0 = arith.constant 0 : i32
    %c0_i32_1 = arith.constant 0 : i32
    return %arg0, %c0_i32, %c0_i32_0 : i32, i32, i32
  }
}

</mosaic_0001>

<bundles_post_ra>
// kernel: _encode.14
= control target key start
LH: loop header
LB: loop body
LE: loop exit
PB: predicated region body
PF: predicated region fallthrough
CT: control target
= control target key end

     0   :  { %10 = vsyncpa [#allocation3], 0  ;;  %s495_s0 = inlined_call_operand.hbm [shape: bf16[8,32], index: 0, kind: input, shape index: {}]   ;;  %s496_s1 = inlined_call_operand.hbm [shape: f32[1,32], index: 1, kind: input, shape index: {}]   ;;  %s497_s2 = inlined_call_operand.hbm [shape: f32[1,32], index: 2, kind: input, shape index: {}]   ;;  %s498_s3 = inlined_call_operand.hbm [shape: bf16[32,96], index: 3, kind: input, shape index: {}]   ;;  %s499_s4 = inlined_call_operand.hbm [shape: f32[1,96], index: 4, kind: input, shape index: {}]   ;;  %s500_s5 = inlined_call_operand.hbm [shape: bf16[8,96], index: 5, kind: output, shape index: {}]  }
   0x1   :  { %11 = vsyncpa [#allocation6], 0 }
   0x2   :  { %12 = vsyncpa [#allocation9], 0 }
   0x3   :  { %13 = vsyncpa [#allocation4], 0  ;;  %s373_s18 = smov [#allocation5]   ;;  %s374_s20 = smov [#allocation8]  }
   0x4   :  { %s30_s19 = sshll.u32 %s373_s18, 4  ;;  %s49_s21 = sshll.u32 %s374_s20, 4  ;;  %s31_s19 = int_to_ptr.vmem [resolvable:$true] %s30_s19  ;;  %s413_s21 = int_to_ptr.vmem [resolvable:$true] %s49_s21 }
   0x5   :  { %s233_s24 = scalar_lea.hbm %s496_s1, 16 }
   0x6   :  { %p234_p0 = scmp.ne.s32.totalorder %s496_s1, %s233_s24  ;;  %p237_p1 = scmp.lt.u32.totalorder %s233_s24, %s496_s1 }
   0x8   :  { %p239_p2 = pnand %p237_p1, %p234_p0 }
   0xa   :  { %242 = shalt.err (!%p239_p2)
}
   0xb   :  { %s243_s29 = scalar_lea.vmem %s31_s19, 16  ;;  %s247_s30 = scalar_lea.vmem %s31_s19, 32 }
   0xc   :  { %p244_p3 = scmp.ne.s32.totalorder %s31_s19, %s243_s29  ;;  %p248_p4 = scmp.lt.s32.totalorder %s31_s19, %s31_s19 }
   0xd   :  { %p249_p5 = scmp.lt.s32.totalorder %s247_s30, %s243_s29 }
   0xf   :  { %p250_p6 = por %p249_p5, %p248_p4 }
  0x11   :  { %p251_p7 = pnand %p250_p6, %p244_p3 }
  0x13   :  { %254 = shalt.err (!%p251_p7)
}
  0x14   :  { %33 = dma.hbm_to_vmem [thread:$0]  %s496_s1, 16, %s31_s19, [#allocation6]  }
  0x15   :  { %s255_s10 = scalar_lea.hbm %s498_s3, 256 }
  0x16   :  { %p256_p8 = scmp.ne.s32.totalorder %s498_s3, %s255_s10  ;;  %p259_p9 = scmp.lt.u32.totalorder %s255_s10, %s498_s3 }
  0x18   :  { %p261_p10 = pnand %p259_p9, %p256_p8 }
  0x1a   :  { %264 = shalt.err (!%p261_p10)
}
  0x1b   :  { %s265_s15 = scalar_lea.vmem %s413_s21, 256  ;;  %p270_p12 = scmp.lt.s32.totalorder %s413_s21, %s413_s21 }
  0x1c   :  { %p266_p11 = scmp.ne.s32.totalorder %s413_s21, %s265_s15  ;;  %p271_p13 = scmp.lt.s32.totalorder %s265_s15, %s265_s15 }
  0x1e   :  { %p272_p0 = por %p271_p13, %p270_p12 }
  0x20   :  { %p273_p1 = pnand %p272_p0, %p266_p11 }
  0x22   :  { %276 = shalt.err (!%p273_p1)
}
  0x23   :  { %s375_s1 = smov 64   ;;  %s376_s16 = smov 4  }
  0x24   :  { %55 = dma.hbm_to_vmem [thread:$0]  %s498_s3, 256, %s413_s21, [#allocation9], %s375_s1, %s375_s1, %s376_s16  }
  0x25   :  { %s377_s19 = smov [#allocation2]   ;;  %s378_s22 = smov [#allocation7]  }
  0x26   :  { %s20_s20 = sshll.u32 %s377_s19, 4  ;;  %s40_s23 = sshll.u32 %s378_s22, 4  ;;  %s21_s20 = int_to_ptr.vmem [resolvable:$true] %s20_s20  ;;  %s41_s23 = int_to_ptr.vmem [resolvable:$true] %s40_s23 }
  0x27   :  { %s277_s26 = scalar_lea.hbm %s495_s0, 64 }
  0x28   :  { %p278_p2 = scmp.ne.s32.totalorder %s495_s0, %s277_s26  ;;  %p281_p3 = scmp.lt.u32.totalorder %s277_s26, %s495_s0 }
  0x2a   :  { %p283_p4 = pnand %p281_p3, %p278_p2 }
  0x2c   :  { %286 = shalt.err (!%p283_p4)
}
  0x2d   :  { %s287_s3 = scalar_lea.vmem %s21_s20, 64  ;;  %p292_p6 = scmp.lt.s32.totalorder %s21_s20, %s21_s20 }
  0x2e   :  { %p288_p5 = scmp.ne.s32.totalorder %s21_s20, %s287_s3  ;;  %p293_p7 = scmp.lt.s32.totalorder %s287_s3, %s287_s3 }
  0x30   :  { %p294_p8 = por %p293_p7, %p292_p6 }
  0x32   :  { %p295_p9 = pnand %p294_p8, %p288_p5 }
  0x34   :  { %298 = shalt.err (!%p295_p9)
}
  0x35   :  { %23 = dma.hbm_to_vmem [thread:$0]  %s495_s0, 64, %s21_s20, [#allocation3]  }
  0x36   :  { %s299_s9 = scalar_lea.hbm %s497_s2, 16 }
  0x37   :  { %p300_p10 = scmp.ne.s32.totalorder %s497_s2, %s299_s9  ;;  %p303_p11 = scmp.lt.u32.totalorder %s299_s9, %s497_s2 }
  0x39   :  { %p305_p12 = pnand %p303_p11, %p300_p10 }
  0x3b   :  { %308 = shalt.err (!%p305_p12)
}
  0x3c   :  { %s309_s14 = scalar_lea.vmem %s41_s23, 16  ;;  %s313_s15 = scalar_lea.vmem %s41_s23, 32 }
  0x3d   :  { %p310_p13 = scmp.ne.s32.totalorder %s41_s23, %s309_s14  ;;  %p314_p0 = scmp.lt.s32.totalorder %s41_s23, %s41_s23 }
  0x3e   :  { %p315_p1 = scmp.lt.s32.totalorder %s313_s15, %s309_s14 }
  0x40   :  { %p316_p2 = por %p315_p1, %p314_p0 }
  0x42   :  { %p317_p3 = pnand %p316_p2, %p310_p13 }
  0x44   :  { %320 = shalt.err (!%p317_p3)
}
  0x45   :  { %43 = dma.hbm_to_vmem [thread:$0]  %s497_s2, 16, %s41_s23, [#allocation6]  }
  0x46   :  { %s379_s16 = smov [#allocation10]   ;;  %s321_s20 = scalar_lea.hbm %s499_s4, 16 }
  0x47   :  { %s62_s17 = sshll.u32 %s379_s16, 4  ;;  %p322_p4 = scmp.ne.s32.totalorder %s499_s4, %s321_s20  ;;  %s63_s17 = int_to_ptr.vmem [resolvable:$true] %s62_s17 }
  0x48   :  { %p325_p5 = scmp.lt.u32.totalorder %s321_s20, %s499_s4 }
  0x4a   :  { %p327_p6 = pnand %p325_p5, %p322_p4 }
  0x4c   :  { %330 = shalt.err (!%p327_p6)
}
  0x4d   :  { %s331_s27 = scalar_lea.vmem %s63_s17, 16  ;;  %s335_s2 = scalar_lea.vmem %s63_s17, 32 }
  0x4e   :  { %p332_p7 = scmp.ne.s32.totalorder %s63_s17, %s331_s27  ;;  %p336_p8 = scmp.lt.s32.totalorder %s63_s17, %s63_s17 }
  0x4f   :  { %p337_p9 = scmp.lt.s32.totalorder %s335_s2, %s331_s27 }
  0x51   :  { %p338_p10 = por %p337_p9, %p336_p8 }
  0x53   :  { %p339_p11 = pnand %p338_p10, %p332_p7 }
  0x55   :  { %342 = shalt.err (!%p339_p11)
}
  0x56   :  { %65 = dma.hbm_to_vmem [thread:$0]  %s499_s4, 16, %s63_s17, [#allocation9]  }
  0x57   :  { %365 = dma.done.wait [#allocation3], 64  }
  0x58   :  { %366 = vsyncadd [#allocation3], 4294967232 }
  0x59   :  { %367 = dma.done.wait [#allocation6], 32  }
  0x5a   :  { %368 = vsyncadd [#allocation6], 4294967264 }
  0x5b   :  { %369 = dma.done.wait [#allocation9], 272  }
  0x5c   :  { %370 = vsyncadd [#allocation9], 4294967024  ;;  %vm84_vm0 = vcmask 261120   ;;  %v82_v0 = vld [vmem:[#allocation2] sm:$0xf]  ;;  %v229_v8 = vld [vmem:[#allocation8] sm:$0xff]  }
  0x5d   :  { %v83_v1 = vunpack.c.l.bf16 %v82_v0  ;;  %v380_v9 = vmov 0.0   ;;  %v230_v10 = vld [vmem:[#allocation8 + $0x8] sm:$0xff]   ;;  %vm381_vm1 = vmmov 0   ;;  %v202_v15 = vld [vmem:[#allocation5] ss:$0 sm:$0xff]  ;;  %s382_s4 = smov [#allocation11]  }
  0x5e   :  { %211 = vmatprep.subr.bf16.mxu0 %v380_v9  ;;  %215 = vmatprep.mubr.msk.bf16.mxu0 %vm381_vm1, %v380_v9  ;;  %v203_v17 = vld [vmem:[#allocation7] ss:$0 sm:$0xff]  ;;  %v204_v21 = vld [vmem:[#allocation10] ss:$0 sm:$0xff]  ;;  %s191_s29 = sshll.u32 %s382_s4, 4  ;;  %vm183_vm2 = vcmask 781312   ;;  %s192_s29 = int_to_ptr.vmem [resolvable:$true] %s191_s29 }
  0x5f   :  { %v85_v2 = vsel %vm84_vm0, %v83_v1, 0.0  ;;  %212 = vmatpush3.bf16.msra.mxu0 %v229_v8  ;;  %s343_s30 = scalar_lea.vmem %s192_s29, 64  ;;  %p348_p13 = scmp.lt.s32.totalorder %s192_s29, %s192_s29 }
  0x60   :  { %86 = vadd.xlane.f32.xlu0 %v85_v2  ;;  %213 = vmatprep.subr.bf16.mxu0 %v380_v9  ;;  %p344_p12 = scmp.ne.s32.totalorder %s192_s29, %s343_s30  ;;  %p349_p0 = scmp.lt.s32.totalorder %s343_s30, %s343_s30 }
  0x62   :  { %p350_p1 = por %p349_p0, %p348_p13 }
  0x63   :  { %214 = vmatpush3.bf16.msra.mxu0 %v230_v10 }
  0x64   :  { %p351_p2 = pnand %p350_p1, %p344_p12 }
  0xed   :  { %v87_v3 = vpop.xlane.xlu0 %86 }
  0xee   :  { %v89_v4 = vmul.f32 0.03125, %v87_v3 }
  0xf0   :  { %v90_v5 = vsub.f32 %v83_v1, %v89_v4 }
  0xf2   :  { %v91_v6 = vmul.f32 %v90_v5, %v90_v5 }
  0xf4   :  { %v92_v7 = vsel %vm84_vm0, %v91_v6, 0.0 }
  0xf5   :  { %93 = vadd.xlane.f32.xlu0 %v92_v7 }
 0x182   :  { %v94_v11 = vpop.xlane.xlu0 %93 }
 0x183   :  { %v95_v12 = vmul.f32 0.03125, %v94_v11 }
 0x185   :  { %v96_v13 = vadd.f32 1e-06, %v95_v12 }
 0x187   :  { %231 = vrsqrt.f32 %v96_v13 }
 0x191   :  { %v232_v14 = vpop.eup %231 }
 0x192   :  { %v98_v16 = vmul.f32 %v232_v14, %v90_v5 }
 0x194   :  { %v106_v18 = vmul.f32 %v202_v15, %v98_v16 }
 0x196   :  { %v114_v19 = vadd.f32 %v203_v17, %v106_v18 }
 0x198   :  { %v115_v20 = vpack.c.bf16 %v114_v19, %v114_v19 }
 0x19a   :  { %216 = vmatmul.mubr.msk.bf16.vlgmr.msra.gmra.mrb[0].mxu0 %vm84_vm0, %v115_v20 }
 0x26d   :  { %v176_v22 = vpop.f32.mrb[0].mxu0 }
 0x26e   :  { %v177_v23 = vadd.f32 %v204_v21, %v176_v22  ;;  %v217_v24 = vpop.f32.mrb[1].mxu0 }
 0x26f   :  { %v179_v25 = vpop.f32.mrb[2].mxu0 }
 0x270   :  { %v182_v26 = vpack.c.bf16 %v177_v23, %v177_v23  ;;  %v218_v27 = vpop.f32.mrb[3].mxu0 }
 0x272   :  { %184 = vst.msk [vmem:[#allocation11] sm:$0xf] %vm183_vm2, %v182_v26 }
 0x273   :  { %354 = shalt.err (!%p351_p2)
}
 0x274   :  { %s355_s6 = scalar_lea.hbm %s500_s5, 64 }
 0x275   :  { %p356_p3 = scmp.ne.s32.totalorder %s500_s5, %s355_s6  ;;  %p359_p4 = scmp.lt.u32.totalorder %s355_s6, %s500_s5 }
 0x277   :  { %p361_p5 = pnand %p359_p4, %p356_p3 }
 0x279   :  { %364 = shalt.err (!%p361_p5)
}
 0x27a   :  { %194 = dma.vmem_to_hbm [thread:$0]  %s192_s29, 64, %s500_s5, [#allocation4]  }
 0x27b   :  { %371 = dma.done.wait [#allocation4], 64  }
 0x27c   :  { %372 = vsyncadd [#allocation4], 4294967232 }
 0x27d   :  { %198 = vsyncpa [#allocation3], 1 }
 0x27e   :  { %199 = vsyncpa [#allocation6], 1 }
 0x27f   :  { %200 = vsyncpa [#allocation9], 1 }
 0x280   :  { %201 = vsyncpa [#allocation4], 1 }

// kernel: _encode.13
= control target key start
LH: loop header
LB: loop body
LE: loop exit
PB: predicated region body
PF: predicated region fallthrough
CT: control target
= control target key end

     0   :  { %8 = vsyncpa [#allocation4], 0  ;;  %s451_s0 = inlined_call_operand.hbm [shape: bf16[8,192], index: 0, kind: input, shape index: {}]   ;;  %s452_s1 = inlined_call_operand.hbm [shape: bf16[192,32], index: 1, kind: input, shape index: {}]   ;;  %s453_s2 = inlined_call_operand.hbm [shape: f32[1,32], index: 2, kind: input, shape index: {}]   ;;  %s454_s3 = inlined_call_operand.hbm [shape: bf16[8,32], index: 3, kind: output, shape index: {}]  }
   0x1   :  { %9 = vsyncpa [#allocation7], 0 }
   0x2   :  { %10 = vsyncpa [#allocation5], 0  ;;  %s373_s12 = smov [#allocation6]   ;;  %s279_s16 = scalar_lea.hbm %s452_s1, 1536 }
   0x3   :  { %s26_s13 = sshll.u32 %s373_s12, 4  ;;  %p280_p0 = scmp.ne.s32.totalorder %s452_s1, %s279_s16  ;;  %s27_s13 = int_to_ptr.vmem [resolvable:$true] %s26_s13 }
   0x4   :  { %p283_p1 = scmp.lt.u32.totalorder %s279_s16, %s452_s1 }
   0x6   :  { %p285_p2 = pnand %p283_p1, %p280_p0 }
   0x8   :  { %288 = shalt.err (!%p285_p2)
}
   0x9   :  { %s289_s21 = scalar_lea.vmem %s27_s13, 1536  ;;  %p294_p4 = scmp.lt.s32.totalorder %s27_s13, %s27_s13 }
   0xa   :  { %p290_p3 = scmp.ne.s32.totalorder %s27_s13, %s289_s21  ;;  %p295_p5 = scmp.lt.s32.totalorder %s289_s21, %s289_s21 }
   0xc   :  { %p296_p6 = por %p295_p5, %p294_p4 }
   0xe   :  { %p297_p7 = pnand %p296_p6, %p290_p3 }
  0x10   :  { %300 = shalt.err (!%p297_p7)
}
  0x11   :  { %s374_s22 = smov 64   ;;  %s375_s23 = smov 4  }
  0x12   :  { %32 = dma.hbm_to_vmem [thread:$0]  %s452_s1, 1536, %s27_s13, [#allocation7], %s374_s22, %s374_s22, %s375_s23  }
  0x13   :  { %s376_s26 = smov [#allocation3]   ;;  %s377_s28 = smov [#allocation8]  }
  0x14   :  { %s17_s27 = sshll.u32 %s376_s26, 4  ;;  %s39_s29 = sshll.u32 %s377_s28, 4  ;;  %s18_s27 = int_to_ptr.vmem [resolvable:$true] %s17_s27  ;;  %s40_s29 = int_to_ptr.vmem [resolvable:$true] %s39_s29 }
  0x15   :  { %s301_s5 = scalar_lea.hbm %s451_s0, 128 }
  0x16   :  { %p302_p8 = scmp.ne.s32.totalorder %s451_s0, %s301_s5  ;;  %p305_p9 = scmp.lt.u32.totalorder %s301_s5, %s451_s0 }
  0x18   :  { %p307_p10 = pnand %p305_p9, %p302_p8 }
  0x1a   :  { %310 = shalt.err (!%p307_p10)
}
  0x1b   :  { %s311_s1 = scalar_lea.vmem %s18_s27, 128  ;;  %p316_p12 = scmp.lt.s32.totalorder %s18_s27, %s18_s27 }
  0x1c   :  { %p312_p11 = scmp.ne.s32.totalorder %s18_s27, %s311_s1  ;;  %p317_p13 = scmp.lt.s32.totalorder %s311_s1, %s311_s1 }
  0x1e   :  { %p318_p0 = por %p317_p13, %p316_p12 }
  0x20   :  { %p319_p1 = pnand %p318_p0, %p312_p11 }
  0x22   :  { %322 = shalt.err (!%p319_p1)
}
  0x23   :  { %20 = dma.hbm_to_vmem [thread:$0]  %s451_s0, 128, %s18_s27, [#allocation4]  }
  0x24   :  { %s323_s14 = scalar_lea.hbm %s453_s2, 16 }
  0x25   :  { %p324_p2 = scmp.ne.s32.totalorder %s453_s2, %s323_s14  ;;  %p327_p3 = scmp.lt.u32.totalorder %s323_s14, %s453_s2 }
  0x27   :  { %p329_p4 = pnand %p327_p3, %p324_p2 }
  0x29   :  { %332 = shalt.err (!%p329_p4)
}
  0x2a   :  { %s333_s19 = scalar_lea.vmem %s40_s29, 16  ;;  %s337_s20 = scalar_lea.vmem %s40_s29, 32 }
  0x2b   :  { %p334_p5 = scmp.ne.s32.totalorder %s40_s29, %s333_s19  ;;  %p338_p6 = scmp.lt.s32.totalorder %s40_s29, %s40_s29 }
  0x2c   :  { %p339_p7 = scmp.lt.s32.totalorder %s337_s20, %s333_s19 }
  0x2e   :  { %p340_p8 = por %p339_p7, %p338_p6 }
  0x30   :  { %p341_p9 = pnand %p340_p8, %p334_p5 }
  0x32   :  { %344 = shalt.err (!%p341_p9)
}
  0x33   :  { %42 = dma.hbm_to_vmem [thread:$0]  %s453_s2, 16, %s40_s29, [#allocation7]  }
  0x34   :  { %367 = dma.done.wait [#allocation4], 128  }
  0x35   :  { %368 = vsyncadd [#allocation4], 4294967168 }
  0x36   :  { %369 = dma.done.wait [#allocation7], 1552  }
  0x37   :  { %370 = vsyncadd [#allocation7], 4294965744  ;;  %vm57_vm0 = vcmask 261120   ;;  %v378_v0 = vmov 0   ;;  %v379_v1 = vmov 0.0   ;;  %v265_v2 = vld [vmem:[#allocation6] sm:$0xff]  }
  0x38   :  { %167 = vmatprep.subr.bf16.mxu0 %v378_v0  ;;  %58 = vst.msk [vmem:[#allocation2] sm:$0xff] %vm57_vm0, %v379_v1  ;;  %v266_v3 = vld [vmem:[#allocation6 + $0x8] sm:$0xff]   ;;  %v267_v4 = vld [vmem:[#allocation6 + $0x10] sm:$0xff]   ;;  %v268_v5 = vld [vmem:[#allocation6 + $0x18] sm:$0xff]   ;;  %vm163_vm1 = vcmask 523264   ;;  %s380_s2 = smov [#allocation9]  }
  0x39   :  { %168 = vmatpush1.bf16.msra.mxu0 %v265_v2  ;;  %v60_v6 = vld [vmem:[#allocation3] sm:$0xff]  ;;  %v269_v8 = vld [vmem:[#allocation6 + $0x20] sm:$0xff]   ;;  %v270_v9 = vld [vmem:[#allocation6 + $0x28] sm:$0xff]   ;;  %s231_s22 = sshll.u32 %s380_s2, 4  ;;  %vm223_vm2 = vcmask 257024   ;;  %s232_s22 = int_to_ptr.vmem [resolvable:$true] %s231_s22 }
  0x3a   :  { %169 = vmatprep.subr.bf16.mxu0 %v378_v0  ;;  %v242_v7 = vcombine.high %v60_v6, %v60_v6  ;;  %v271_v10 = vld [vmem:[#allocation6 + $0x30] sm:$0xff]   ;;  %v272_v11 = vld [vmem:[#allocation6 + $0x38] sm:$0xff]   ;;  %v273_v12 = vld [vmem:[#allocation6 + $0x40] sm:$0xff]   ;;  %v241_v16 = vcombine.low %v60_v6, %v60_v6  ;;  %s345_s23 = scalar_lea.vmem %s232_s22, 64  ;;  %p350_p11 = scmp.lt.s32.totalorder %s232_s22, %s232_s22 }
  0x3b   :  { %v274_v13 = vld [vmem:[#allocation6 + $0x48] sm:$0xff]   ;;  %v275_v14 = vld [vmem:[#allocation6 + $0x50] sm:$0xff]   ;;  %v276_v15 = vld [vmem:[#allocation6 + $0x58] sm:$0xff]   ;;  %p346_p10 = scmp.ne.s32.totalorder %s232_s22, %s345_s23  ;;  %p351_p12 = scmp.lt.s32.totalorder %s345_s23, %s345_s23 }
  0x3c   :  { %255 = vmatprep.mubr.msk.bf16.mxu0 %vm163_vm1, %v242_v7  ;;  %v256_v23 = vld [vmem:[#allocation8] ss:$0 sm:$0xff] }
  0x3d   :  { %170 = vmatpush1.bf16.msra.mxu0 %v266_v3  ;;  %p352_p13 = por %p351_p12, %p350_p11 }
  0x3e   :  { %171 = vmatprep.subr.bf16.mxu0 %v378_v0 }
  0x3f   :  { %v59_v17 = vld [vmem:[#allocation2] sm:$0xff]  ;;  %p353_p0 = pnand %p352_p13, %p346_p10 }
  0x41   :  { %172 = vmatpush1.bf16.msra.mxu0 %v267_v4 }
  0x42   :  { %173 = vmatprep.subr.bf16.mxu0 %v378_v0 }
  0x45   :  { %174 = vmatpush1.bf16.msra.mxu0 %v268_v5 }
  0x46   :  { %175 = vmatprep.subr.bf16.mxu0 %v378_v0 }
  0x49   :  { %176 = vmatpush1.bf16.msra.mxu0 %v269_v8 }
  0x4a   :  { %177 = vmatprep.subr.bf16.mxu0 %v378_v0 }
  0x4d   :  { %178 = vmatpush1.bf16.msra.mxu0 %v270_v9 }
  0x4e   :  { %179 = vmatprep.subr.bf16.mxu0 %v378_v0 }
  0x51   :  { %180 = vmatpush1.bf16.msra.mxu0 %v271_v10 }
  0x52   :  { %181 = vmatprep.subr.bf16.mxu0 %v378_v0 }
  0x55   :  { %182 = vmatpush1.bf16.msra.mxu0 %v272_v11 }
  0x56   :  { %183 = vmatprep.subr.bf16.mxu0 %v378_v0 }
  0x59   :  { %184 = vmatpush1.bf16.msra.mxu0 %v273_v12 }
  0x5a   :  { %185 = vmatprep.subr.bf16.mxu0 %v378_v0 }
  0x5d   :  { %186 = vmatpush1.bf16.msra.mxu0 %v274_v13 }
  0x5e   :  { %187 = vmatprep.subr.bf16.mxu0 %v378_v0 }
  0x61   :  { %188 = vmatpush1.bf16.msra.mxu0 %v275_v14 }
  0x62   :  { %189 = vmatprep.subr.bf16.mxu0 %v378_v0 }
  0x65   :  { %190 = vmatpush1.bf16.msra.mxu0 %v276_v15 }
  0x68   :  { %200 = vmatmul.mubr.bf16.vlgmr.msra.gmra.mrb[0].mxu0 %v241_v16 }
 0x13b   :  { %v201_v18 = vpop.f32.mrb[0].mxu0 }
 0x13c   :  { %v207_v19 = vadd.f32 %v201_v18, %v59_v17  ;;  %v203_v20 = vpop.f32.mrb[1].mxu0 }
 0x13d   :  { %v204_v21 = vpop.f32.mrb[2].mxu0 }
 0x13e   :  { %209 = vst.msk [vmem:[#allocation2] sm:$0xff] %vm57_vm0, %v207_v19  ;;  %v205_v22 = vpop.f32.mrb[3].mxu0 }
 0x145   :  { %v213_v24 = vld [vmem:[#allocation2] sm:$0xff] }
 0x146   :  { %v221_v25 = vadd.f32 %v256_v23, %v213_v24 }
 0x148   :  { %v222_v26 = vpack.c.bf16 %v221_v25, %v221_v25 }
 0x14a   :  { %224 = vst.msk [vmem:[#allocation9] sm:$0xf] %vm223_vm2, %v222_v26 }
 0x14b   :  { %356 = shalt.err (!%p353_p0)
}
 0x14c   :  { %s357_s26 = scalar_lea.hbm %s454_s3, 64 }
 0x14d   :  { %p358_p1 = scmp.ne.s32.totalorder %s454_s3, %s357_s26  ;;  %p361_p2 = scmp.lt.u32.totalorder %s357_s26, %s454_s3 }
 0x14f   :  { %p363_p3 = pnand %p361_p2, %p358_p1 }
 0x151   :  { %366 = shalt.err (!%p363_p3)
}
 0x152   :  { %234 = dma.vmem_to_hbm [thread:$0]  %s232_s22, 64, %s454_s3, [#allocation5]  }
 0x153   :  { %371 = dma.done.wait [#allocation5], 64  }
 0x154   :  { %372 = vsyncadd [#allocation5], 4294967232 }
 0x155   :  { %238 = vsyncpa [#allocation4], 1 }
 0x156   :  { %239 = vsyncpa [#allocation7], 1 }
 0x157   :  { %240 = vsyncpa [#allocation5], 1 }

// kernel: _encode.16
= control target key start
LH: loop header
LB: loop body
LE: loop exit
PB: predicated region body
PF: predicated region fallthrough
CT: control target
= control target key end

     0   :  { %9 = vsyncpa [#allocation4], 0  ;;  %s414_s0 = inlined_call_operand.hbm [shape: bf16[8,32], index: 0, kind: input, shape index: {}]   ;;  %s415_s1 = inlined_call_operand.hbm [shape: bf16[32,32], index: 1, kind: input, shape index: {}]   ;;  %s416_s2 = inlined_call_operand.hbm [shape: f32[1,32], index: 2, kind: input, shape index: {}]   ;;  %s417_s3 = inlined_call_operand.hbm [shape: bf16[8,32], index: 3, kind: input, shape index: {}]   ;;  %s418_s4 = inlined_call_operand.hbm [shape: bf16[8,32], index: 4, kind: output, shape index: {}]  }
   0x1   :  { %10 = vsyncpa [#allocation7], 0 }
   0x2   :  { %11 = vsyncpa [#allocation10], 0 }
   0x3   :  { %12 = vsyncpa [#allocation5], 0  ;;  %s317_s15 = smov [#allocation6]   ;;  %s199_s19 = scalar_lea.hbm %s415_s1, 256 }
   0x4   :  { %s28_s16 = sshll.u32 %s317_s15, 4  ;;  %p200_p0 = scmp.ne.s32.totalorder %s415_s1, %s199_s19  ;;  %s29_s16 = int_to_ptr.vmem [resolvable:$true] %s28_s16 }
   0x5   :  { %p203_p1 = scmp.lt.u32.totalorder %s199_s19, %s415_s1 }
   0x7   :  { %p205_p2 = pnand %p203_p1, %p200_p0 }
   0x9   :  { %208 = shalt.err (!%p205_p2)
}
   0xa   :  { %s209_s24 = scalar_lea.vmem %s29_s16, 256  ;;  %p214_p4 = scmp.lt.s32.totalorder %s29_s16, %s29_s16 }
   0xb   :  { %p210_p3 = scmp.ne.s32.totalorder %s29_s16, %s209_s24  ;;  %p215_p5 = scmp.lt.s32.totalorder %s209_s24, %s209_s24 }
   0xd   :  { %p216_p6 = por %p215_p5, %p214_p4 }
   0xf   :  { %p217_p7 = pnand %p216_p6, %p210_p3 }
  0x11   :  { %220 = shalt.err (!%p217_p7)
}
  0x12   :  { %s318_s25 = smov 64   ;;  %s319_s26 = smov 4  }
  0x13   :  { %34 = dma.hbm_to_vmem [thread:$0]  %s415_s1, 256, %s29_s16, [#allocation7], %s318_s25, %s318_s25, %s319_s26  }
  0x14   :  { %s320_s29 = smov [#allocation3]   ;;  %s321_s5 = smov [#allocation8]  }
  0x15   :  { %s19_s30 = sshll.u32 %s320_s29, 4  ;;  %s41_s6 = sshll.u32 %s321_s5, 4  ;;  %s20_s30 = int_to_ptr.vmem [resolvable:$true] %s19_s30  ;;  %s42_s6 = int_to_ptr.vmem [resolvable:$true] %s41_s6 }
  0x16   :  { %s221_s9 = scalar_lea.hbm %s414_s0, 64 }
  0x17   :  { %p222_p8 = scmp.ne.s32.totalorder %s414_s0, %s221_s9  ;;  %p225_p9 = scmp.lt.u32.totalorder %s221_s9, %s414_s0 }
  0x19   :  { %p227_p10 = pnand %p225_p9, %p222_p8 }
  0x1b   :  { %230 = shalt.err (!%p227_p10)
}
  0x1c   :  { %s231_s1 = scalar_lea.vmem %s20_s30, 64  ;;  %p236_p12 = scmp.lt.s32.totalorder %s20_s30, %s20_s30 }
  0x1d   :  { %p232_p11 = scmp.ne.s32.totalorder %s20_s30, %s231_s1  ;;  %p237_p13 = scmp.lt.s32.totalorder %s231_s1, %s231_s1 }
  0x1f   :  { %p238_p0 = por %p237_p13, %p236_p12 }
  0x21   :  { %p239_p1 = pnand %p238_p0, %p232_p11 }
  0x23   :  { %242 = shalt.err (!%p239_p1)
}
  0x24   :  { %22 = dma.hbm_to_vmem [thread:$0]  %s414_s0, 64, %s20_s30, [#allocation4]  }
  0x25   :  { %s243_s18 = scalar_lea.hbm %s416_s2, 16 }
  0x26   :  { %p244_p2 = scmp.ne.s32.totalorder %s416_s2, %s243_s18  ;;  %p247_p3 = scmp.lt.u32.totalorder %s243_s18, %s416_s2 }
  0x28   :  { %p249_p4 = pnand %p247_p3, %p244_p2 }
  0x2a   :  { %252 = shalt.err (!%p249_p4)
}
  0x2b   :  { %s253_s23 = scalar_lea.vmem %s42_s6, 16  ;;  %s257_s24 = scalar_lea.vmem %s42_s6, 32 }
  0x2c   :  { %p254_p5 = scmp.ne.s32.totalorder %s42_s6, %s253_s23  ;;  %p258_p6 = scmp.lt.s32.totalorder %s42_s6, %s42_s6 }
  0x2d   :  { %p259_p7 = scmp.lt.s32.totalorder %s257_s24, %s253_s23 }
  0x2f   :  { %p260_p8 = por %p259_p7, %p258_p6 }
  0x31   :  { %p261_p9 = pnand %p260_p8, %p254_p5 }
  0x33   :  { %264 = shalt.err (!%p261_p9)
}
  0x34   :  { %44 = dma.hbm_to_vmem [thread:$0]  %s416_s2, 16, %s42_s6, [#allocation7]  }
  0x35   :  { %s322_s26 = smov [#allocation9]   ;;  %s265_s30 = scalar_lea.hbm %s417_s3, 64 }
  0x36   :  { %s51_s27 = sshll.u32 %s322_s26, 4  ;;  %p266_p10 = scmp.ne.s32.totalorder %s417_s3, %s265_s30  ;;  %s52_s27 = int_to_ptr.vmem [resolvable:$true] %s51_s27 }
  0x37   :  { %p269_p11 = scmp.lt.u32.totalorder %s265_s30, %s417_s3 }
  0x39   :  { %p271_p12 = pnand %p269_p11, %p266_p10 }
  0x3b   :  { %274 = shalt.err (!%p271_p12)
}
  0x3c   :  { %s275_s10 = scalar_lea.vmem %s52_s27, 64  ;;  %p280_p0 = scmp.lt.s32.totalorder %s52_s27, %s52_s27 }
  0x3d   :  { %p276_p13 = scmp.ne.s32.totalorder %s52_s27, %s275_s10  ;;  %p281_p1 = scmp.lt.s32.totalorder %s275_s10, %s275_s10 }
  0x3f   :  { %p282_p2 = por %p281_p1, %p280_p0 }
  0x41   :  { %p283_p3 = pnand %p282_p2, %p276_p13 }
  0x43   :  { %286 = shalt.err (!%p283_p3)
}
  0x44   :  { %54 = dma.hbm_to_vmem [thread:$0]  %s417_s3, 64, %s52_s27, [#allocation10]  }
  0x45   :  { %309 = dma.done.wait [#allocation4], 64  }
  0x46   :  { %310 = vsyncadd [#allocation4], 4294967232 }
  0x47   :  { %311 = dma.done.wait [#allocation7], 272  }
  0x48   :  { %312 = vsyncadd [#allocation7], 4294967024 }
  0x49   :  { %313 = dma.done.wait [#allocation10], 64  }
  0x4a   :  { %314 = vsyncadd [#allocation10], 4294967232  ;;  %vm72_vm0 = vcmask 261120   ;;  %v323_v0 = vmov 0.0   ;;  %vm324_vm1 = vmmov 0   ;;  %v197_v1 = vld [vmem:[#allocation6] sm:$0xff]  }
  0x4b   :  { %180 = vmatprep.subr.bf16.mxu0 %v323_v0  ;;  %184 = vmatprep.mubr.msk.bf16.mxu0 %vm324_vm1, %v323_v0  ;;  %73 = vst.msk [vmem:[#allocation2] sm:$0xff] %vm72_vm0, %v323_v0  ;;  %v198_v2 = vld [vmem:[#allocation6 + $0x8] sm:$0xff]   ;;  %v75_v3 = vld [vmem:[#allocation3] sm:$0xf]  ;;  %v150_v10 = vld [vmem:[#allocation9] sm:$0xf] }
  0x4c   :  { %181 = vmatpush3.bf16.msra.mxu0 %v197_v1  ;;  %v176_v11 = vld [vmem:[#allocation8] ss:$0 sm:$0xff]  ;;  %v151_v12 = vunpack.c.l.bf16 %v150_v10  ;;  %s325_s3 = smov [#allocation11]   ;;  %vm154_vm2 = vcmask 257024  }
  0x4d   :  { %182 = vmatprep.subr.bf16.mxu0 %v323_v0  ;;  %s162_s11 = sshll.u32 %s325_s3, 4  ;;  %s163_s11 = int_to_ptr.vmem [resolvable:$true] %s162_s11 }
  0x4e   :  { %s287_s12 = scalar_lea.vmem %s163_s11, 64  ;;  %p292_p5 = scmp.lt.s32.totalorder %s163_s11, %s163_s11 }
  0x4f   :  { %p288_p4 = scmp.ne.s32.totalorder %s163_s11, %s287_s12  ;;  %p293_p6 = scmp.lt.s32.totalorder %s287_s12, %s287_s12 }
  0x50   :  { %183 = vmatpush3.bf16.msra.mxu0 %v198_v2 }
  0x51   :  { %p294_p7 = por %p293_p6, %p292_p5 }
  0x52   :  { %v74_v4 = vld [vmem:[#allocation2] sm:$0xff] }
  0x53   :  { %185 = vmatmul.mubr.msk.bf16.vlgmr.msra.gmra.mrb[0].mxu0 %vm72_vm0, %v75_v3  ;;  %p295_p8 = pnand %p294_p7, %p288_p4 }
 0x126   :  { %v130_v5 = vpop.f32.mrb[0].mxu0 }
 0x127   :  { %v136_v6 = vadd.f32 %v130_v5, %v74_v4  ;;  %v186_v7 = vpop.f32.mrb[1].mxu0 }
 0x128   :  { %v133_v8 = vpop.f32.mrb[2].mxu0 }
 0x129   :  { %137 = vst.msk [vmem:[#allocation2] sm:$0xff] %vm72_vm0, %v136_v6  ;;  %v187_v9 = vpop.f32.mrb[3].mxu0 }
 0x130   :  { %v141_v13 = vld [vmem:[#allocation2] sm:$0xff] }
 0x131   :  { %v149_v14 = vadd.f32 %v176_v11, %v141_v13 }
 0x133   :  { %v152_v15 = vadd.f32 %v151_v12, %v149_v14 }
 0x135   :  { %v153_v16 = vpack.c.bf16 %v152_v15, %v152_v15 }
 0x137   :  { %155 = vst.msk [vmem:[#allocation11] sm:$0xf] %vm154_vm2, %v153_v16 }
 0x138   :  { %298 = shalt.err (!%p295_p8)
}
 0x139   :  { %s299_s14 = scalar_lea.hbm %s418_s4, 64 }
 0x13a   :  { %p300_p9 = scmp.ne.s32.totalorder %s418_s4, %s299_s14  ;;  %p303_p10 = scmp.lt.u32.totalorder %s299_s14, %s418_s4 }
 0x13c   :  { %p305_p11 = pnand %p303_p10, %p300_p9 }
 0x13e   :  { %308 = shalt.err (!%p305_p11)
}
 0x13f   :  { %165 = dma.vmem_to_hbm [thread:$0]  %s163_s11, 64, %s418_s4, [#allocation5]  }
 0x140   :  { %315 = dma.done.wait [#allocation5], 64  }
 0x141   :  { %316 = vsyncadd [#allocation5], 4294967232 }
 0x142   :  { %169 = vsyncpa [#allocation4], 1 }
 0x143   :  { %170 = vsyncpa [#allocation7], 1 }
 0x144   :  { %171 = vsyncpa [#allocation10], 1 }
 0x145   :  { %172 = vsyncpa [#allocation5], 1 }

// kernel: _encode.15
= control target key start
LH: loop header
LB: loop body
LE: loop exit
PB: predicated region body
PF: predicated region fallthrough
CT: control target
= control target key end

     0   :  { %s1867_s0 = inlined_call_operand.hbm [shape: bf16[4,4,16], index: 0, kind: input, shape index: {}]   ;;  %s1868_s1 = inlined_call_operand.hbm [shape: bf16[4,4,16], index: 1, kind: input, shape index: {}]   ;;  %s1869_s2 = inlined_call_operand.hbm [shape: bf16[4,4,16], index: 2, kind: input, shape index: {}]   ;;  %s1870_s3 = inlined_call_operand.hbm [shape: bf16[4,4,4], index: 3, kind: input, shape index: {}]   ;;  %s1871_s4 = inlined_call_operand.hbm [shape: bf16[4,4], index: 4, kind: input, shape index: {}]   ;;  %s1872_s5 = inlined_call_operand.hbm [shape: bf16[4,4,16], index: 5, kind: output, shape index: {}]  }
   0x1   :  { %1889 = sst [smem:[#allocation26_spill]] %s1867_s0 }
   0x2   :  { %1890 = sst [smem:[#allocation27_spill]] %s1868_s1 }
   0x3   :  { %1891 = sst [smem:[#allocation28_spill]] %s1871_s4 }
   0x4   :  { %10 = vsyncpa [#allocation6], 0 }
   0x5   :  { %12 = vsyncpa [#allocation6 + $0x1], 0 }
   0x6   :  { %13 = vsyncpa [#allocation9], 0 }
   0x7   :  { %15 = vsyncpa [#allocation9 + $0x1], 0 }
   0x8   :  { %16 = vsyncpa [#allocation12], 0 }
   0x9   :  { %18 = vsyncpa [#allocation12 + $0x1], 0 }
   0xa   :  { %19 = vsyncpa [#allocation7], 0 }
   0xb   :  { %21 = vsyncpa [#allocation7 + $0x1], 0  ;;  %s1447_s18 = smov 0   ;;  %s1449_s19 = smov 0  }
   0xc   :  { %s1451_s20 = smov 0   ;;  %s1453_s21 = smov 0  }
   0xd   :  { %s1455_s22 = smov 0   ;;  %s1457_s23 = smov 0  }
   0xe LB: > { %1892 = sst [smem:[#allocation20_spill]] %s1380_s18  ;;  %s1478_s24 = sadd.s32 4294967295, %s1400_s23   ;;  %s1400_s23 = sphi %s1457_s23, %s27_s23   ;;  %s1396_s22 = sphi %s1455_s22, %s1929_s22   ;;  %s1392_s21 = sphi %s1453_s21, %s1928_s21   ;;  %s1388_s20 = sphi %s1451_s20, %s1927_s20   ;;  %s1384_s19 = sphi %s1449_s19, %s1931_s19   ;;  %s1380_s18 = sphi %s1447_s18, %s1930_s18  }
   0xf   : > { %1893 = sst [smem:[#allocation21_spill]] %s1388_s20  ;;  %s969_s25 = sadd.s32 4294967294, %s1400_s23  }
  0x10   : > { %1894 = sst [smem:[#allocation22_spill]] %s1396_s22  ;;  %p62_p0 = scmp.ne.s32.totalorder %s1388_s20, %s1384_s19 }
  0x11   : > { %p63_p1 = scmp.eq.s32.totalorder %s1400_s23, 0  ;;  %p68_p2 = scmp.ne.s32.totalorder %s1384_s19, %s1380_s18 }
  0x12   : > { %p1873_p3 = scmp.eq.s32.totalorder %s1478_s24, 0  ;;  %p204_p4 = scmp.eq.s32.totalorder %s1478_s24, 1 }
  0x13   : > { %p1489_p5 = por %p63_p1, %p62_p0  ;;  %p210_p6 = scmp.eq.s32.totalorder %s969_s25, 1 }
  0x14   : > { %p1495_p7 = por %p1873_p3, %p68_p2  ;;  %p1499_p8 = por %p204_p4, %p62_p0 }
  0x15   : > { %p1503_p9 = por %p210_p6, %p68_p2  ;;  %p970_p10 = scmp.ge.s32.totalorder %s1400_s23, 1 }
  0x16   : > { %s1896_s28 = scalar_select %p1495_p7, 1, 0 }
  0x17   : > { %s1897_s29 = scalar_select %p1499_p8, 1, 0 }
  0x18   : > { %s1898_s30 = scalar_select %p1503_p9, 1, 0 }
  0x19   : > { %p217_p11 = scmp.lt.s32.totalorder %s1400_s23, 3  ;;  %s1402_s7 = smov [#allocation13]  }
  0x1a   : > { %1899 = sst [smem:[#allocation23_spill]] %s1898_s30  ;;  %s232_s8 = sshll.u32 %s1402_s7, 4  ;;  %s233_s8 = int_to_ptr.vmem [resolvable:$true] %s232_s8 }
  0x1b   : > { %p1510_p13 = pnand %p970_p10, %p217_p11  ;;  %p1083_p1 = scmp.lt.s32.totalorder %s1400_s23, 2 }
  0x1c   : > { %s46_s11 = sadd.s32 1, %s1396_s22  ;;  %s1878_s13 = sand.u32 1, %s1388_s20  }
  0x1d   : > { %s1900_s6 = scalar_select %p1510_p13, 1, 0 }
  0x1e   : > { %p1061_p0 = pneg %p1510_p13  ;;  %p1519_p4 = pnand %p1083_p1, %p1489_p5 }
  0x1f   : > { %p1530_p6 = scmp.ge.s32.totalorder %s46_s11, 2  ;;  %s1904_s4 = sld [smem:[#allocation28_spill]] }
  0x20   : > { %s1901_s9 = scalar_select %p1519_p4, 1, 0 }
  0x21   : > { %p1525_p2 = pnand %p1061_p0, %p1873_p3 }
  0x22   : > { %s1903_s12 = scalar_select %p1530_p6, 1, 0 }
  0x23   : > { %p1160_p10 = pneg %p1525_p2 }
  0x25   : > { %s1158_s16 = scalar_lea.hbm %s1904_s4, 32 }
  0x26   : > { %p1159_p5 = scmp.ne.s32.totalorder %s1904_s4, %s1158_s16  ;;  %p1165_p0 = scmp.lt.u32.totalorder %s1158_s16, %s1904_s4 }
  0x28   : > { %p1161_p11 = pnand %p1160_p10, %p1159_p5 }
  0x2a   : > { %p1162_p1 = pneg %p1161_p11 }
  0x2c   : > { %p1167_p12 = pnand %p1165_p0, %p1162_p1 }
  0x2e   : > { %1170 = shalt.err (!%p1167_p12)
}
  0x2f   : > { %s1171_s26 = scalar_lea.vmem %s233_s8, 32  ;;  %p1179_p7 = scmp.lt.s32.totalorder %s233_s8, %s233_s8 }
  0x30   : > { %p1172_p3 = scmp.ne.s32.totalorder %s233_s8, %s1171_s26  ;;  %p1180_p13 = scmp.lt.s32.totalorder %s1171_s26, %s1171_s26 }
  0x32   : > { %p1174_p9 = pnand %p1172_p3, %p1160_p10  ;;  %p1181_p4 = por %p1180_p13, %p1179_p7 }
  0x34   : > { %p1175_p8 = pneg %p1174_p9 }
  0x36   : > { %p1182_p6 = pnand %p1181_p4, %p1175_p8 }
  0x38   : > { %1185 = shalt.err (!%p1182_p6)
}
  0x39   : > { %1064 = dma.hbm_to_vmem [thread:$0]  (!%p1525_p2), %s1904_s4, 32, %s233_s8, [#allocation12]  }
  0x3a   : > { %p1905_p3 = scmp.ne.s32.totalorder %s1903_s12, 0  ;;  %s1557_s26 = sshll.u32 %s1878_s13, 2 }
  0x3b   : > { %s1560_s10 = sshll.u32 %s1396_s22, 6  ;;  %s1880_s17 = sand.u32 1, %s1400_s23  }
  0x3c   : > { %s1933_s11 = smov (%p1905_p3, %s46_s11), 0  ;;  %s1907_s25 = sadd.s32 1, %s1388_s20 }
  0x3d   : > { %1906 = sst [smem:[#allocation24_spill]] %s1933_s11  ;;  %s50_s16 = ssub.s32 %s1396_s22, %s1933_s11 }
  0x3e   : > { %p53_p7 = scmp.eq.s32.totalorder %s50_s16, 0  ;;  %s1909_s1 = sld [smem:[#allocation27_spill]] }
  0x3f   : > { %s269_s12 = scalar_lea.vmem [#allocation8], %s1557_s26  ;;  %s1581_s13 = scalar_lea.sflag [#allocation9], %s1880_s17 }
  0x40   : > { %s1568_s27 = scalar_select %p53_p7, %s1388_s20, %s1907_s25  }
  0x41   : > { %s277_s15 = sshll.u32 %s269_s12, 4  ;;  %p1910_p9 = scmp.ne.s32.totalorder %s1901_s9, 0  ;;  %s1577_s15 = int_to_ptr.vmem [resolvable:$true] %s277_s15 }
  0x42   : > { %1908 = sst [smem:[#allocation25_spill]] %s1568_s27 }
  0x43   : > { %p1587_p12 = pneg %p1910_p9 }
  0x44   : > { %s1574_s8 = scalar_lea.hbm %s1909_s1, %s1560_s10  ;;  %s1191_s12 = scalar_lea.hbm %s1909_s1, 128 }
  0x45   : > { %s1186_s16 = scalar_lea.hbm %s1574_s8, 64  ;;  %p1192_p2 = scmp.lt.u32.totalorder %s1574_s8, %s1909_s1 }
  0x46   : > { %p1187_p8 = scmp.ne.s32.totalorder %s1574_s8, %s1186_s16  ;;  %p1193_p6 = scmp.lt.u32.totalorder %s1191_s12, %s1186_s16 }
  0x47   : > { %p1195_p10 = scmp.lt.u32.totalorder %s1186_s16, %s1574_s8 }
  0x48   : > { %p1189_p13 = pnand %p1587_p12, %p1187_p8  ;;  %p1194_p5 = por %p1193_p6, %p1192_p2 }
  0x4a   : > { %p1190_p4 = pneg %p1189_p13  ;;  %p1196_p11 = por %p1195_p10, %p1194_p5 }
  0x4c   : > { %p1197_p1 = pnand %p1196_p11, %p1190_p4 }
  0x4e   : > { %1200 = shalt.err (!%p1197_p1)
}
  0x4f   : > { %s1201_s17 = scalar_lea.vmem %s1577_s15, 64  ;;  %s1403_s7 = smov [#allocation8]  }
  0x50   : > { %p1202_p0 = scmp.ne.s32.totalorder %s1577_s15, %s1201_s17  ;;  %s1206_s14 = sshll.u32 %s1403_s7, 4  ;;  %s1207_s14 = int_to_ptr.vmem [resolvable:$false] %s1206_s14 }
  0x51   : > { %s1208_s4 = scalar_lea.vmem %s1207_s14, 128  ;;  %p1209_p8 = scmp.lt.s32.totalorder %s1577_s15, %s1207_s14 }
  0x52   : > { %p1204_p3 = pnand %p1202_p0, %p1587_p12  ;;  %p1210_p13 = scmp.lt.s32.totalorder %s1208_s4, %s1201_s17 }
  0x54   : > { %p1205_p7 = pneg %p1204_p3  ;;  %p1211_p2 = por %p1210_p13, %p1209_p8 }
  0x56   : > { %p1212_p6 = pnand %p1211_p2, %p1205_p7 }
  0x58   : > { %1215 = shalt.err (!%p1212_p6)
}
  0x59   : > { %s1883_s11 = smov 32   ;;  %s1885_s16 = smov 2  }
  0x5a   : > { %1071 = dma.hbm_to_vmem [thread:$0]  (!%p1910_p9), %s1574_s8, 64, %s1577_s15, %s1581_s13, %s1883_s11, %s1883_s11, %s1885_s16  }
  0x5b   : > { %s1912_s0 = sld [smem:[#allocation26_spill]]  ;;  %s247_s14 = scalar_lea.vmem [#allocation5], %s1557_s26 }
  0x5c   : > { %s255_s4 = sshll.u32 %s247_s14, 4  ;;  %s1627_s27 = scalar_lea.hbm %s1869_s2, %s1560_s10  ;;  %s1621_s4 = int_to_ptr.vmem [resolvable:$true] %s255_s4 }
  0x5d   : > { %s1913_s30 = sand.u32 1, %s1388_s20  }
  0x5e   : > { %s1631_s8 = scalar_lea.sflag [#allocation6], %s1913_s30 }
  0x61   : > { %s1618_s7 = scalar_lea.hbm %s1912_s0, %s1560_s10  ;;  %s1221_s11 = scalar_lea.hbm %s1912_s0, 128 }
  0x62   : > { %s1216_s15 = scalar_lea.hbm %s1618_s7, 64  ;;  %p1222_p11 = scmp.lt.u32.totalorder %s1618_s7, %s1912_s0 }
  0x63   : > { %p1217_p4 = scmp.ne.s32.totalorder %s1618_s7, %s1216_s15  ;;  %p1223_p1 = scmp.lt.u32.totalorder %s1221_s11, %s1216_s15 }
  0x64   : > { %p1225_p3 = scmp.lt.u32.totalorder %s1216_s15, %s1618_s7 }
  0x65   : > { %p1219_p5 = pnand %p1217_p4, %p1587_p12  ;;  %p1224_p0 = por %p1223_p1, %p1222_p11 }
  0x67   : > { %p1220_p10 = pneg %p1219_p5  ;;  %p1226_p7 = por %p1225_p3, %p1224_p0 }
  0x69   : > { %p1227_p8 = pnand %p1226_p7, %p1220_p10 }
  0x6b   : > { %1230 = shalt.err (!%p1227_p8)
}
  0x6c   : > { %s1231_s1 = scalar_lea.vmem %s1621_s4, 64  ;;  %s1406_s22 = smov [#allocation5]  }
  0x6d   : > { %p1232_p13 = scmp.ne.s32.totalorder %s1621_s4, %s1231_s1  ;;  %s1236_s30 = sshll.u32 %s1406_s22, 4  ;;  %s1237_s30 = int_to_ptr.vmem [resolvable:$false] %s1236_s30 }
  0x6e   : > { %s1238_s16 = scalar_lea.vmem %s1237_s30, 128  ;;  %p1239_p4 = scmp.lt.s32.totalorder %s1621_s4, %s1237_s30 }
  0x6f   : > { %p1234_p2 = pnand %p1232_p13, %p1587_p12  ;;  %p1240_p5 = scmp.lt.s32.totalorder %s1238_s16, %s1231_s1 }
  0x71   : > { %p1235_p6 = pneg %p1234_p2  ;;  %p1241_p11 = por %p1240_p5, %p1239_p4 }
  0x73   : > { %p1242_p1 = pnand %p1241_p11, %p1235_p6 }
  0x75   : > { %1245 = shalt.err (!%p1242_p1)
}
  0x76   : > { %s1914_s11 = smov 2   ;;  %s1915_s15 = smov 32  }
  0x77   : > { %1068 = dma.hbm_to_vmem [thread:$0]  (!%p1910_p9), %s1618_s7, 64, %s1621_s4, %s1631_s8, %s1915_s15, %s1915_s15, %s1914_s11  }
  0x78   : > { %s291_s17 = scalar_lea.vmem [#allocation10], %s1557_s26  ;;  %s1665_s22 = scalar_lea.hbm %s1870_s3, %s1560_s10 }
  0x79   : > { %s299_s12 = sshll.u32 %s291_s17, 4  ;;  %s1246_s30 = scalar_lea.hbm %s1627_s27, 64  ;;  %s1659_s12 = int_to_ptr.vmem [resolvable:$true] %s299_s12 }
  0x7a   : > { %p1247_p10 = scmp.ne.s32.totalorder %s1627_s27, %s1246_s30  ;;  %s1251_s20 = scalar_lea.hbm %s1869_s2, 128 }
  0x7b   : > { %p1252_p7 = scmp.lt.u32.totalorder %s1627_s27, %s1869_s2  ;;  %p1253_p8 = scmp.lt.u32.totalorder %s1251_s20, %s1246_s30 }
  0x7c   : > { %p1249_p0 = pnand %p1247_p10, %p1587_p12  ;;  %p1255_p2 = scmp.lt.u32.totalorder %s1246_s30, %s1627_s27 }
  0x7d   : > { %p1254_p13 = por %p1253_p8, %p1252_p7 }
  0x7e   : > { %p1250_p3 = pneg %p1249_p0 }
  0x7f   : > { %p1256_p6 = por %p1255_p2, %p1254_p13 }
  0x81   : > { %p1257_p4 = pnand %p1256_p6, %p1250_p3 }
  0x83   : > { %1260 = shalt.err (!%p1257_p4)
}
  0x84   : > { %s1261_s10 = scalar_lea.vmem %s1659_s12, 64  ;;  %s1407_s0 = smov [#allocation10]  }
  0x85   : > { %p1262_p5 = scmp.ne.s32.totalorder %s1659_s12, %s1261_s10  ;;  %s1266_s4 = sshll.u32 %s1407_s0, 4  ;;  %s1267_s4 = int_to_ptr.vmem [resolvable:$false] %s1266_s4 }
  0x86   : > { %s1268_s18 = scalar_lea.vmem %s1267_s4, 128  ;;  %p1269_p10 = scmp.lt.s32.totalorder %s1659_s12, %s1267_s4 }
  0x87   : > { %p1264_p11 = pnand %p1262_p5, %p1587_p12  ;;  %p1270_p0 = scmp.lt.s32.totalorder %s1268_s18, %s1261_s10 }
  0x89   : > { %p1265_p1 = pneg %p1264_p11  ;;  %p1271_p7 = por %p1270_p0, %p1269_p10 }
  0x8b   : > { %p1272_p8 = pnand %p1271_p7, %p1265_p1 }
  0x8d   : > { %1275 = shalt.err (!%p1272_p8)
}
  0x8e   : > { %1074 = dma.hbm_to_vmem [thread:$0]  (!%p1910_p9), %s1627_s27, 64, %s1659_s12, %s1581_s13, %s1915_s15, %s1915_s15, %s1914_s11  }
  0x8f   : > { %s313_s20 = scalar_lea.vmem [#allocation11], %s1557_s26  ;;  %s1916_s17 = sand.u32 1, %s1400_s23  }
  0x90   : > { %s321_s8 = sshll.u32 %s313_s20, 4  ;;  %s1697_s14 = scalar_lea.sflag [#allocation12], %s1916_s17  ;;  %s1693_s8 = int_to_ptr.vmem [resolvable:$true] %s321_s8 }
  0x91   : > { %s1276_s1 = scalar_lea.hbm %s1665_s22, 64  ;;  %s1281_s7 = scalar_lea.hbm %s1870_s3, 128 }
  0x92   : > { %p1277_p3 = scmp.ne.s32.totalorder %s1665_s22, %s1276_s1  ;;  %p1282_p6 = scmp.lt.u32.totalorder %s1665_s22, %s1870_s3 }
  0x93   : > { %p1283_p4 = scmp.lt.u32.totalorder %s1281_s7, %s1276_s1  ;;  %p1285_p11 = scmp.lt.u32.totalorder %s1276_s1, %s1665_s22 }
  0x94   : > { %p1279_p13 = pnand %p1277_p3, %p1587_p12 }
  0x95   : > { %p1284_p5 = por %p1283_p4, %p1282_p6 }
  0x96   : > { %p1280_p2 = pneg %p1279_p13 }
  0x97   : > { %p1286_p1 = por %p1285_p11, %p1284_p5 }
  0x99   : > { %p1287_p10 = pnand %p1286_p1, %p1280_p2 }
  0x9b   : > { %1290 = shalt.err (!%p1287_p10)
}
  0x9c   : > { %s1291_s13 = scalar_lea.vmem %s1693_s8, 64  ;;  %s1408_s26 = smov [#allocation11]  }
  0x9d   : > { %p1292_p0 = scmp.ne.s32.totalorder %s1693_s8, %s1291_s13  ;;  %s1296_s27 = sshll.u32 %s1408_s26, 4  ;;  %s1297_s27 = int_to_ptr.vmem [resolvable:$false] %s1296_s27 }
  0x9e   : > { %s1298_s12 = scalar_lea.vmem %s1297_s27, 128  ;;  %p1299_p3 = scmp.lt.s32.totalorder %s1693_s8, %s1297_s27 }
  0x9f   : > { %p1294_p7 = pnand %p1292_p0, %p1587_p12  ;;  %p1300_p13 = scmp.lt.s32.totalorder %s1298_s12, %s1291_s13 }
  0xa1   : > { %p1295_p8 = pneg %p1294_p7  ;;  %p1301_p6 = por %p1300_p13, %p1299_p3 }
  0xa3   : > { %p1302_p4 = pnand %p1301_p6, %p1295_p8 }
  0xa5   : > { %1305 = shalt.err (!%p1302_p4)
}
  0xa6   : > { %1077 = dma.hbm_to_vmem [thread:$0]  (!%p1910_p9), %s1665_s22, 64, %s1693_s8, %s1697_s14, %s1915_s15, %s1915_s15, %s1914_s11  }
  0xa7   : > { %p1917_p12 = scmp.ne.s32.totalorder %s1900_s6, 0 }
  0xa8   : > { %s1727_s25 = sand.u32 (!%p1917_p12), 1, %s1384_s19   ;;  %p1918_p2 = scmp.ne.s32.totalorder (!%p1917_p12), %s1896_s28, 0 }
  0xa9   : > { %333 = sbr.rel (%p1917_p12) target bundleno = 1018 (0x3fa), region = 40  ;;  %s1730_s4 = sshll.u32 (!%p1917_p12), %s1727_s25, 2 }
  0xaa   : > { %s336_s9 = scalar_lea.sflag (!%p1917_p12), [#allocation6], %s1727_s25  ;;  %s339_s18 = scalar_lea.vmem (!%p1917_p12), [#allocation5], %s1730_s4 }
  0xb0   : > { %1359 = dma.done.wait (%p1918_p2), %s336_s9, 64  }
  0xb1   : > { %1361 = vsyncadd (%p1918_p2), %s336_s9, 4294967232  ;;  %s344_s6 = sand.u32 1, %s1478_s24   ;;  %s348_s15 = scalar_lea.vmem [#allocation8], %s1730_s4 }
  0xb2   : > { %s345_s11 = scalar_lea.sflag [#allocation9], %s344_s6 }
  0xb3   : > { %1363 = dma.done.wait (%p1918_p2), %s345_s11, 128  }
  0xb4   : > { %1365 = vsyncadd (%p1918_p2), %s345_s11, 4294967168  ;;  %s357_s22 = scalar_lea.vmem [#allocation10], %s1730_s4  ;;  %s363_s20 = scalar_lea.sflag [#allocation12], %s344_s6 }
  0xb5   : > { %s366_s8 = scalar_lea.vmem [#allocation11], %s1730_s4 }
  0xb6   : > { %1367 = dma.done.wait (%p1918_p2), %s363_s20, 64  }
  0xb7   : > { %1369 = vsyncadd (%p1918_p2), %s363_s20, 4294967232  ;;  %p1919_p9 = scmp.eq.s32.totalorder %s1478_s24, 0 }
  0xb9   : > { %1371 = dma.done.wait (%p1919_p9), [#allocation12], 32   ;;  %p1920_p5 = pmov %p1919_p9 }
  0xba   : > { %v1409_v0 = vmov 0.0   ;;  %v443_v1 = vlaneseq  ;;  %vm1410_vm0 = vmmov 0   ;;  %v1411_v2 = vmov 1983009808   ;;  %v436_v6 = vld [vmem:[#allocation13] sm:$0x3] }
  0xbb   : > { %1373 = vsyncadd (%p1920_p5), [#allocation12], 4294967264  ;;  %1017 = vmatprep.subr.bf16.mxu0 %v1409_v0  ;;  %1023 = vmatprep.subr.bf16.mxu1 %v1409_v0  ;;  %v441_v3 = vunpack.c.l.s4 %v1411_v2  ;;  %vm451_vm1 = vcmask 1041408   ;;  %vm498_vm2 = vcmask 130048   ;;  %v432_v7 = vld [vmem:[%s348_s15] sm:$0x3] }
  0xbc   : > { %1019 = vmatprep.mubr.msk.bf16.mxu0 %vm1410_vm0, %v1409_v0  ;;  %1025 = vmatprep.mubr.msk.bf16.mxu1 %vm1410_vm0, %v1409_v0  ;;  %v444_v4 = vshrl.u32 %v443_v1, 7  ;;  %v434_v8 = vld [vmem:[%s366_s8] sm:$0x3]  ;;  %v453_v10 = vsel %vm451_vm1, %v436_v6, 0  ;;  %v503_v11 = vsel %vm498_vm2, %v432_v7, 0  ;;  %vm447_vm3 = vcmask 31744  }
  0xbd   : > { %v442_v5 = vunpack.c.0.s8 %v441_v3  ;;  %v435_v12 = vld [vmem:[%s366_s8 + $0x2] sm:$0x3]  ;;  %1018 = vmatpush3.bf16.msra.mxu0 %v453_v10  ;;  %1024 = vmatpush3.bf16.xpose.msra.mxu1 %v503_v11  ;;  %v433_v15 = vld [vmem:[%s348_s15 + $0x2] sm:$0x3]  ;;  %v430_v16 = vld [vmem:[%s339_s18] sm:$0x3] }
  0xbe   : > { %v439_v13 = vcombine.low %v434_v8, %v435_v12  ;;  %1029 = vmatprep.subr.bf16.mxu0 %v1409_v0  ;;  %1035 = vmatprep.subr.bf16.mxu1 %v1409_v0  ;;  %v549_v17 = vsel %vm498_vm2, %v433_v15, 0  ;;  %v431_v18 = vld [vmem:[%s339_s18 + $0x2] sm:$0x3]  ;;  %vm422_vm4 = vcmask 3072   ;;  %v1412_v19 = vmov -inf   ;;  %s411_s24 = scalar_lea.vmem [#allocation14], %s1730_s4 }
  0xbf   : > { %v445_v9 = vsub.s32 %v442_v5, %v444_v4  ;;  %423 = vst.msk [vmem:[#allocation2] sm:$0xf] %vm422_vm4, %v1412_v19  ;;  %424 = vst.msk [vmem:[#allocation2 + $0x4] sm:$0xf] %vm422_vm4, %v1412_v19  ;;  %vm593_vm5 = vcmask 27648   ;;  %v1413_v37 = vmov 0  }
  0xc0   : > { %425 = vst.msk [vmem:[#allocation3] sm:$0xf] %vm422_vm4, %v1409_v0  ;;  %426 = vst.msk [vmem:[#allocation3 + $0x4] sm:$0xf] %vm422_vm4, %v1409_v0  ;;  %1144 = vset.pattern.permute.xlu1 %v1413_v37  ;;  %1145 = vset.pattern.permute.xlu0 %v1413_v37  ;;  %v655_v46 = vld [vmem:[%s357_s22] sm:$0x3] }
  0xc1   : > { %v446_v14 = vrot.slane %v439_v13, %v445_v9  ;;  %v661_v47 = vsel %vm451_vm1, %v655_v46, 0  ;;  %v656_v48 = vld [vmem:[%s357_s22 + $0x2] sm:$0x3]  ;;  %vm427_vm6 = vcmask 125952   ;;  %vm779_vm7 = vcmask 123904   ;;  %s797_s28 = sshll.u32 %s411_s24, 4  ;;  %s1818_s28 = int_to_ptr.vmem [resolvable:$true] %s797_s28 }
  0xc2   : > { %v707_v49 = vsel %vm451_vm1, %v656_v48, 0  ;;  %428 = vst.msk [vmem:[#allocation4] sm:$0xf] %vm427_vm6, %v1409_v0  ;;  %429 = vst.msk [vmem:[#allocation4 + $0x4] sm:$0xf] %vm427_vm6, %v1409_v0  ;;  %s1006_s17 = sshll.u32 %s1392_s21, 6 }
  0xc3   : > { %1020 = vmatmul.mubr.msk.bf16.vlgmr.msra.gmra.mrb[0].mxu0 %vm447_vm3, %v446_v14  ;;  %s1816_s30 = scalar_lea.hbm %s1872_s5, %s1006_s17  ;;  %s783_s16 = scalar_lea.sflag [#allocation7], %s1727_s25 }
  0xc4   : > { %1031 = vmatprep.mubr.msk.bf16.mxu0 %vm1410_vm0, %v1409_v0  ;;  %1026 = vmatmul.mubr.msk.bf16.vlgmr.msra.gmra.mrb[0].mxu1 %vm498_vm2, %v430_v16  ;;  %s1306_s7 = scalar_lea.vmem %s1818_s28, 64  ;;  %p1921_p1 = scmp.ne.s32.totalorder %s1897_s29, 0 }
  0xc5   : > { %1037 = vmatprep.mubr.msk.bf16.mxu1 %vm1410_vm0, %v1409_v0  ;;  %1036 = vmatpush3.bf16.msra.mxu1 %v661_v47  ;;  %p1307_p11 = scmp.ne.s32.totalorder %s1818_s28, %s1306_s7  ;;  %s1414_s21 = smov [#allocation14]  }
  0xc6   : > { %1030 = vmatpush3.bf16.xpose.msra.mxu0 %v549_v17  ;;  %v591_v38 = vld [vmem:[#allocation2] sm:$0xf]  ;;  %v592_v42 = vld [vmem:[#allocation2 + $0x4] sm:$0xf]  ;;  %s1310_s10 = sshll.u32 %s1414_s21, 4  ;;  %s1311_s10 = int_to_ptr.vmem [resolvable:$false] %s1310_s10 }
  0xc7   : > { %1041 = vmatprep.subr.bf16.mxu0 %v1409_v0  ;;  %v624_v3 = vld [vmem:[#allocation3] sm:$0xf]  ;;  %v625_v7 = vld [vmem:[#allocation3 + $0x4] sm:$0xf]  ;;  %p1308_p10 = pnand %p1307_p11, %p1921_p1  ;;  %s1312_s0 = scalar_lea.vmem %s1311_s10, 128 }
  0xc8   : > { %p1313_p7 = scmp.lt.s32.totalorder %s1818_s28, %s1311_s10  ;;  %p1314_p8 = scmp.lt.s32.totalorder %s1312_s0, %s1306_s7 }
  0xc9   : > { %v639_v14 = vld [vmem:[#allocation4] sm:$0xf]  ;;  %p1309_p0 = pneg %p1308_p10 }
  0xca   : > { %p1315_p3 = por %p1314_p8, %p1313_p7 }
  0xcc   : > { %p1316_p13 = pnand %p1315_p3, %p1309_p0 }
  0xcd   : > { %1032 = vmatmul.mubr.msk.bf16.vlgmr.msra.gmra.mrb[4].mxu0 %vm498_vm2, %v431_v18 }
  0xce   : > { %1043 = vmatprep.mubr.msk.bf16.mxu0 %vm1410_vm0, %v1409_v0  ;;  %1042 = vmatpush3.bf16.msra.mxu0 %v707_v49 }
 0x196   : > { %v489_v20 = vpop.f32.mrb[0].mxu0 }
 0x197   : > { %v1021_v21 = vpop.f32.mrb[1].mxu0  ;;  %v539_v23 = vpop.f32.mrb[0].mxu1  ;;  %v496_v30 = vcombine.high %v489_v20, %v489_v20 }
 0x198   : > { %v492_v22 = vpop.f32.mrb[2].mxu0  ;;  %v540_v25 = vadd.f32 %v539_v23, %v489_v20  ;;  %v1027_v26 = vpop.f32.mrb[1].mxu1 }
 0x199   : > { %v1022_v24 = vpop.f32.mrb[3].mxu0  ;;  %v542_v27 = vpop.f32.mrb[2].mxu1  ;;  %v640_v22 = vld [vmem:[#allocation4 + $0x4] sm:$0xf] }
 0x19a   : > { %v594_v28 = vsel %vm593_vm5, %v540_v25, -inf  ;;  %v1028_v29 = vpop.f32.mrb[3].mxu1 }
 0x19b   : > { %595 = vmax.xlane.f32.xlu0 %v594_v28 }
 0x1a0   : > { %v585_v31 = vpop.f32.mrb[4].mxu0 }
 0x1a1   : > { %v586_v32 = vadd.f32 %v585_v31, %v496_v30  ;;  %v1033_v33 = vpop.f32.mrb[5].mxu0 }
 0x1a2   : > { %v588_v34 = vpop.f32.mrb[6].mxu0 }
 0x1a3   : > { %v1034_v35 = vpop.f32.mrb[7].mxu0  ;;  %v597_v36 = vsel %vm593_vm5, %v586_v32, -inf }
 0x1a4   : > { %598 = vmax.xlane.f32.xlu0 %v597_v36 }
 0x228   : > { %v596_v39 = vpop.xlane.xlu0 %595 }
 0x229   : > { %v600_v40 = vmax.f32 %v591_v38, %v596_v39 }
 0x22b   : > { %v602_v41 = vsub.f32 %v591_v38, %v600_v40  ;;  %754 = vst.msk [vmem:[#allocation2] sm:$0xf] %vm422_vm4, %v600_v40  ;;  %610 = vperm.xlu1 %1144, %v600_v40  }
 0x22d   : > { %v604_v60 = vmul.f32 1.442695, %v602_v41 }
 0x231   : > { %v599_v43 = vpop.xlane.xlu0 %598 }
 0x232   : > { %v601_v44 = vmax.f32 %v592_v42, %v599_v43 }
 0x234   : > { %v603_v45 = vsub.f32 %v592_v42, %v601_v44  ;;  %755 = vst.msk [vmem:[#allocation2 + $0x4] sm:$0xf] %vm422_vm4, %v601_v44  ;;  %615 = vperm.xlu1 %1144, %v601_v44  }
 0x236   : > { %v606_v63 = vmul.f32 1.442695, %v603_v45 }
 0x2aa   : > { %v611_v50 = vpop.permute.xlu1 %610 }
 0x2ab   : > { %v618_v51 = vsub.f32 %v540_v25, %v611_v50 }
 0x2ad   : > { %v620_v52 = vmul.f32 1.442695, %v618_v51 }
 0x2af   : > { %1146 = vpow2.f32 %v620_v52 }
 0x2b3   : > { %v616_v53 = vpop.permute.xlu1 %615 }
 0x2b4   : > { %v619_v54 = vsub.f32 %v586_v32, %v616_v53 }
 0x2b6   : > { %v622_v55 = vmul.f32 1.442695, %v619_v54 }
 0x2b8   : > { %1148 = vpow2.f32 %v622_v55 }
 0x2b9   : > { %v1147_v56 = vpop.eup %1146  ;;  %1150 = vpow2.f32 %v604_v60 }
 0x2ba   : > { %v628_v57 = vsel %vm593_vm5, %v1147_v56, 0.0  ;;  %v653_v58 = vpack.c.bf16 %v1147_v56, %v1147_v56  ;;  %1152 = vpow2.f32 %v606_v63 }
 0x2bb   : > { %629 = vadd.xlane.f32.xlu0 %v628_v57 }
 0x2bc   : > { %1038 = vmatmul.mubr.msk.bf16.vlgmr.msra.gmra.mrb[4].mxu1 %vm447_vm3, %v653_v58 }
 0x2c2   : > { %v1149_v59 = vpop.eup %1148 }
 0x2c3   : > { %v631_v61 = vsel %vm593_vm5, %v1149_v59, 0.0  ;;  %v654_v62 = vpack.c.bf16 %v1149_v59, %v1149_v59  ;;  %v1151_v1 = vpop.eup %1150 }
 0x2c4   : > { %632 = vadd.xlane.f32.xlu1 %v631_v61  ;;  %v1153_v2 = vpop.eup %1152  ;;  %v626_v4 = vmul.f32 %v1151_v1, %v624_v3 }
 0x2c5   : > { %1044 = vmatmul.mubr.msk.bf16.vlgmr.msra.gmra.mrb[8].mxu0 %vm447_vm3, %v654_v62  ;;  %v627_v8 = vmul.f32 %v1153_v2, %v625_v7 }
 0x2d1   : > { %643 = vperm.xlu0 %1145, %v1151_v1  }
 0x2d5   : > { %648 = vperm.xlu1 %1144, %v1153_v2  }
 0x348   : > { %v630_v5 = vpop.xlane.xlu0 %629 }
 0x349   : > { %v634_v6 = vadd.f32 %v630_v5, %v626_v4 }
 0x34b   : > { %637 = vst.msk [vmem:[#allocation3] sm:$0xf] %vm422_vm4, %v634_v6 }
 0x350   : > { %v644_v15 = vpop.permute.xlu0 %643 }
 0x351   : > { %v633_v9 = vpop.xlane.xlu1 %632  ;;  %v651_v16 = vmul.f32 %v644_v15, %v639_v14 }
 0x352   : > { %v635_v10 = vadd.f32 %v633_v9, %v627_v8  ;;  %v761_v11 = vld [vmem:[#allocation3] sm:$0xf] }
 0x353   : > { %1154 = vrcp.f32 %v761_v11 }
 0x354   : > { %638 = vst.msk [vmem:[#allocation3 + $0x4] sm:$0xf] %vm422_vm4, %v635_v10 }
 0x355   : > { %v649_v23 = vpop.permute.xlu1 %648 }
 0x356   : > { %v652_v24 = vmul.f32 %v649_v23, %v640_v22 }
 0x35b   : > { %v762_v0 = vld [vmem:[#allocation3 + $0x4] sm:$0xf] }
 0x35c   : > { %1156 = vrcp.f32 %v762_v0 }
 0x35d   : > { %v1155_v12 = vpop.eup %1154 }
 0x35e   : > { %767 = vperm.xlu0 %1145, %v1155_v12  }
 0x366   : > { %v1157_v13 = vpop.eup %1156 }
 0x367   : > { %772 = vperm.xlu0 %1145, %v1157_v13  }
 0x38f   : > { %v697_v17 = vpop.f32.mrb[4].mxu1 }
 0x390   : > { %v749_v18 = vadd.f32 %v697_v17, %v651_v16  ;;  %v1039_v19 = vpop.f32.mrb[5].mxu1 }
 0x391   : > { %v700_v20 = vpop.f32.mrb[6].mxu1 }
 0x392   : > { %752 = vst.msk [vmem:[#allocation4] sm:$0xf] %vm427_vm6, %v749_v18  ;;  %v1040_v21 = vpop.f32.mrb[7].mxu1 }
 0x398   : > { %v743_v25 = vpop.f32.mrb[8].mxu0 }
 0x399   : > { %v750_v26 = vadd.f32 %v743_v25, %v652_v24  ;;  %v1045_v27 = vpop.f32.mrb[9].mxu0  ;;  %v759_v30 = vld [vmem:[#allocation4] sm:$0xf] }
 0x39a   : > { %v746_v28 = vpop.f32.mrb[10].mxu0 }
 0x39b   : > { %753 = vst.msk [vmem:[#allocation4 + $0x4] sm:$0xf] %vm427_vm6, %v750_v26  ;;  %v1046_v29 = vpop.f32.mrb[11].mxu0 }
 0x3a2   : > { %v760_v34 = vld [vmem:[#allocation4 + $0x4] sm:$0xf] }
 0x3dd   : > { %v768_v31 = vpop.permute.xlu0 %767 }
 0x3de   : > { %v775_v32 = vmul.f32 %v768_v31, %v759_v30 }
 0x3e0   : > { %v777_v33 = vpack.c.bf16 %v775_v32, %v775_v32 }
 0x3e2   : > { %780 = vst.msk [vmem:[%s411_s24] sm:$0x3] %vm779_vm7, %v777_v33 }
 0x3e6   : > { %v773_v35 = vpop.permute.xlu0 %772 }
 0x3e7   : > { %v776_v36 = vmul.f32 %v773_v35, %v760_v34 }
 0x3e9   : > { %v778_v37 = vpack.c.bf16 %v776_v36, %v776_v36 }
 0x3eb   : > { %781 = vst.msk [vmem:[%s411_s24 + $0x2] sm:$0x3] %vm779_vm7, %v778_v37 }
 0x3ec   : > { %1319 = shalt.err (!%p1316_p13)
}
 0x3ed   : > { %s1320_s13 = scalar_lea.hbm %s1816_s30, 64  ;;  %s1324_s12 = scalar_lea.hbm %s1872_s5, 128 }
 0x3ee   : > { %p1321_p6 = scmp.ne.s32.totalorder %s1816_s30, %s1320_s13  ;;  %p1325_p2 = scmp.lt.u32.totalorder %s1816_s30, %s1872_s5 }
 0x3ef   : > { %p1326_p9 = scmp.lt.u32.totalorder %s1324_s12, %s1320_s13  ;;  %p1328_p11 = scmp.lt.u32.totalorder %s1320_s13, %s1816_s30 }
 0x3f0   : > { %p1322_p4 = pnand %p1321_p6, %p1921_p1 }
 0x3f1   : > { %p1327_p5 = por %p1326_p9, %p1325_p2 }
 0x3f2   : > { %p1323_p12 = pneg %p1322_p4 }
 0x3f3   : > { %p1329_p10 = por %p1328_p11, %p1327_p5 }
 0x3f5   : > { %p1330_p0 = pnand %p1329_p10, %p1323_p12 }
 0x3f7   : > { %1333 = shalt.err (!%p1330_p0)
}
 0x3f8   : > { %s1415_s18 = smov 32   ;;  %s1416_s6 = smov 2  }
 0x3f9   : > { %1059 = dma.vmem_to_hbm [thread:$0]  (%p1921_p1), %s1818_s28, 64, %s1816_s30, %s783_s16, %s1415_s18, %s1415_s18, %s1416_s6  }
 0x3fa PF: > { %s1922_s11 = sld [smem:[#allocation20_spill]]  ;;  %s1923_s15 = sld [smem:[#allocation23_spill]] }
 0x3fb   : > { %p1925_p8 = scmp.ge.s32.totalorder %s1400_s23, 2 }
 0x400   : > { %s812_s22 = sand.u32 1, %s1922_s11   ;;  %p1924_p7 = scmp.ne.s32.totalorder %s1923_s15, 0 }
 0x401   : > { %s813_s20 = scalar_lea.sflag [#allocation7], %s812_s22 }
 0x402   : > { %p1079_p3 = pnand %p1925_p8, %p1924_p7 }
 0x404   : > { %1375 = dma.done.wait (!%p1079_p3), %s813_s20, 64  }
 0x405   : > { %1377 = vsyncadd (!%p1079_p3), %s813_s20, 4294967232  ;;  %s27_s23 = sadd.s32 1, %s1400_s23   ;;  %s1926_s8 = sld [smem:[#allocation21_spill]] }
 0x406   : > { %p24_p13 = scmp.ge.s32.totalorder %s27_s23, 4   ;;  %s1927_s20 = sld [smem:[#allocation25_spill]] }
 0x407   : > { %s1928_s21 = sld [smem:[#allocation22_spill]]  ;;  %s1929_s22 = sld [smem:[#allocation24_spill]] }
 0x408   : > { %s1930_s18 = smov %s1384_s19  ;;  %26 = sbr.rel (!%p24_p13) target bundleno = 14 (0xe), region = 135 }
 0x40b   : > { %s1931_s19 = smov %s1926_s8 }
 0x40f   :  { %818 = vsyncpa [#allocation6], 1 }
 0x410   :  { %820 = vsyncpa [#allocation6 + $0x1], 1 }
 0x411   :  { %821 = vsyncpa [#allocation9], 1 }
 0x412   :  { %823 = vsyncpa [#allocation9 + $0x1], 1 }
 0x413   :  { %824 = vsyncpa [#allocation12], 1 }
 0x414   :  { %826 = vsyncpa [#allocation12 + $0x1], 1 }
 0x415   :  { %827 = vsyncpa [#allocation7], 1 }
 0x416   :  { %829 = vsyncpa [#allocation7 + $0x1], 1 }

// kernel: _encode.17
= control target key start
LH: loop header
LB: loop body
LE: loop exit
PB: predicated region body
PF: predicated region fallthrough
CT: control target
= control target key end

     0   :  { %10 = vsyncpa [#allocation3], 0  ;;  %s505_s0 = inlined_call_operand.hbm [shape: bf16[8,32], index: 0, kind: input, shape index: {}]   ;;  %s506_s1 = inlined_call_operand.hbm [shape: f32[1,32], index: 1, kind: input, shape index: {}]   ;;  %s507_s2 = inlined_call_operand.hbm [shape: f32[1,32], index: 2, kind: input, shape index: {}]   ;;  %s508_s3 = inlined_call_operand.hbm [shape: bf16[32,128], index: 3, kind: input, shape index: {}]   ;;  %s509_s4 = inlined_call_operand.hbm [shape: f32[1,128], index: 4, kind: input, shape index: {}]   ;;  %s510_s5 = inlined_call_operand.hbm [shape: bf16[8,128], index: 5, kind: output, shape index: {}]  }
   0x1   :  { %11 = vsyncpa [#allocation6], 0 }
   0x2   :  { %12 = vsyncpa [#allocation9], 0 }
   0x3   :  { %13 = vsyncpa [#allocation4], 0  ;;  %s383_s18 = smov [#allocation5]   ;;  %s384_s20 = smov [#allocation8]  }
   0x4   :  { %s30_s19 = sshll.u32 %s383_s18, 4  ;;  %s49_s21 = sshll.u32 %s384_s20, 4  ;;  %s31_s19 = int_to_ptr.vmem [resolvable:$true] %s30_s19  ;;  %s423_s21 = int_to_ptr.vmem [resolvable:$true] %s49_s21 }
   0x5   :  { %s243_s24 = scalar_lea.hbm %s506_s1, 16 }
   0x6   :  { %p244_p0 = scmp.ne.s32.totalorder %s506_s1, %s243_s24  ;;  %p247_p1 = scmp.lt.u32.totalorder %s243_s24, %s506_s1 }
   0x8   :  { %p249_p2 = pnand %p247_p1, %p244_p0 }
   0xa   :  { %252 = shalt.err (!%p249_p2)
}
   0xb   :  { %s253_s29 = scalar_lea.vmem %s31_s19, 16  ;;  %s257_s30 = scalar_lea.vmem %s31_s19, 32 }
   0xc   :  { %p254_p3 = scmp.ne.s32.totalorder %s31_s19, %s253_s29  ;;  %p258_p4 = scmp.lt.s32.totalorder %s31_s19, %s31_s19 }
   0xd   :  { %p259_p5 = scmp.lt.s32.totalorder %s257_s30, %s253_s29 }
   0xf   :  { %p260_p6 = por %p259_p5, %p258_p4 }
  0x11   :  { %p261_p7 = pnand %p260_p6, %p254_p3 }
  0x13   :  { %264 = shalt.err (!%p261_p7)
}
  0x14   :  { %33 = dma.hbm_to_vmem [thread:$0]  %s506_s1, 16, %s31_s19, [#allocation6]  }
  0x15   :  { %s265_s10 = scalar_lea.hbm %s508_s3, 256 }
  0x16   :  { %p266_p8 = scmp.ne.s32.totalorder %s508_s3, %s265_s10  ;;  %p269_p9 = scmp.lt.u32.totalorder %s265_s10, %s508_s3 }
  0x18   :  { %p271_p10 = pnand %p269_p9, %p266_p8 }
  0x1a   :  { %274 = shalt.err (!%p271_p10)
}
  0x1b   :  { %s275_s15 = scalar_lea.vmem %s423_s21, 256  ;;  %p280_p12 = scmp.lt.s32.totalorder %s423_s21, %s423_s21 }
  0x1c   :  { %p276_p11 = scmp.ne.s32.totalorder %s423_s21, %s275_s15  ;;  %p281_p13 = scmp.lt.s32.totalorder %s275_s15, %s275_s15 }
  0x1e   :  { %p282_p0 = por %p281_p13, %p280_p12 }
  0x20   :  { %p283_p1 = pnand %p282_p0, %p276_p11 }
  0x22   :  { %286 = shalt.err (!%p283_p1)
}
  0x23   :  { %s385_s1 = smov 64   ;;  %s386_s16 = smov 4  }
  0x24   :  { %55 = dma.hbm_to_vmem [thread:$0]  %s508_s3, 256, %s423_s21, [#allocation9], %s385_s1, %s385_s1, %s386_s16  }
  0x25   :  { %s387_s19 = smov [#allocation2]   ;;  %s388_s22 = smov [#allocation7]  }
  0x26   :  { %s20_s20 = sshll.u32 %s387_s19, 4  ;;  %s40_s23 = sshll.u32 %s388_s22, 4  ;;  %s21_s20 = int_to_ptr.vmem [resolvable:$true] %s20_s20  ;;  %s41_s23 = int_to_ptr.vmem [resolvable:$true] %s40_s23 }
  0x27   :  { %s287_s26 = scalar_lea.hbm %s505_s0, 64 }
  0x28   :  { %p288_p2 = scmp.ne.s32.totalorder %s505_s0, %s287_s26  ;;  %p291_p3 = scmp.lt.u32.totalorder %s287_s26, %s505_s0 }
  0x2a   :  { %p293_p4 = pnand %p291_p3, %p288_p2 }
  0x2c   :  { %296 = shalt.err (!%p293_p4)
}
  0x2d   :  { %s297_s3 = scalar_lea.vmem %s21_s20, 64  ;;  %p302_p6 = scmp.lt.s32.totalorder %s21_s20, %s21_s20 }
  0x2e   :  { %p298_p5 = scmp.ne.s32.totalorder %s21_s20, %s297_s3  ;;  %p303_p7 = scmp.lt.s32.totalorder %s297_s3, %s297_s3 }
  0x30   :  { %p304_p8 = por %p303_p7, %p302_p6 }
  0x32   :  { %p305_p9 = pnand %p304_p8, %p298_p5 }
  0x34   :  { %308 = shalt.err (!%p305_p9)
}
  0x35   :  { %23 = dma.hbm_to_vmem [thread:$0]  %s505_s0, 64, %s21_s20, [#allocation3]  }
  0x36   :  { %s309_s9 = scalar_lea.hbm %s507_s2, 16 }
  0x37   :  { %p310_p10 = scmp.ne.s32.totalorder %s507_s2, %s309_s9  ;;  %p313_p11 = scmp.lt.u32.totalorder %s309_s9, %s507_s2 }
  0x39   :  { %p315_p12 = pnand %p313_p11, %p310_p10 }
  0x3b   :  { %318 = shalt.err (!%p315_p12)
}
  0x3c   :  { %s319_s14 = scalar_lea.vmem %s41_s23, 16  ;;  %s323_s15 = scalar_lea.vmem %s41_s23, 32 }
  0x3d   :  { %p320_p13 = scmp.ne.s32.totalorder %s41_s23, %s319_s14  ;;  %p324_p0 = scmp.lt.s32.totalorder %s41_s23, %s41_s23 }
  0x3e   :  { %p325_p1 = scmp.lt.s32.totalorder %s323_s15, %s319_s14 }
  0x40   :  { %p326_p2 = por %p325_p1, %p324_p0 }
  0x42   :  { %p327_p3 = pnand %p326_p2, %p320_p13 }
  0x44   :  { %330 = shalt.err (!%p327_p3)
}
  0x45   :  { %43 = dma.hbm_to_vmem [thread:$0]  %s507_s2, 16, %s41_s23, [#allocation6]  }
  0x46   :  { %s389_s16 = smov [#allocation10]   ;;  %s331_s20 = scalar_lea.hbm %s509_s4, 16 }
  0x47   :  { %s62_s17 = sshll.u32 %s389_s16, 4  ;;  %p332_p4 = scmp.ne.s32.totalorder %s509_s4, %s331_s20  ;;  %s63_s17 = int_to_ptr.vmem [resolvable:$true] %s62_s17 }
  0x48   :  { %p335_p5 = scmp.lt.u32.totalorder %s331_s20, %s509_s4 }
  0x4a   :  { %p337_p6 = pnand %p335_p5, %p332_p4 }
  0x4c   :  { %340 = shalt.err (!%p337_p6)
}
  0x4d   :  { %s341_s27 = scalar_lea.vmem %s63_s17, 16  ;;  %s345_s2 = scalar_lea.vmem %s63_s17, 32 }
  0x4e   :  { %p342_p7 = scmp.ne.s32.totalorder %s63_s17, %s341_s27  ;;  %p346_p8 = scmp.lt.s32.totalorder %s63_s17, %s63_s17 }
  0x4f   :  { %p347_p9 = scmp.lt.s32.totalorder %s345_s2, %s341_s27 }
  0x51   :  { %p348_p10 = por %p347_p9, %p346_p8 }
  0x53   :  { %p349_p11 = pnand %p348_p10, %p342_p7 }
  0x55   :  { %352 = shalt.err (!%p349_p11)
}
  0x56   :  { %65 = dma.hbm_to_vmem [thread:$0]  %s509_s4, 16, %s63_s17, [#allocation9]  }
  0x57   :  { %375 = dma.done.wait [#allocation3], 64  }
  0x58   :  { %376 = vsyncadd [#allocation3], 4294967232 }
  0x59   :  { %377 = dma.done.wait [#allocation6], 32  }
  0x5a   :  { %378 = vsyncadd [#allocation6], 4294967264 }
  0x5b   :  { %379 = dma.done.wait [#allocation9], 272  }
  0x5c   :  { %380 = vsyncadd [#allocation9], 4294967024  ;;  %vm84_vm0 = vcmask 261120   ;;  %v82_v0 = vld [vmem:[#allocation2] sm:$0xf]  ;;  %v237_v8 = vld [vmem:[#allocation8] sm:$0xff]  }
  0x5d   :  { %v83_v1 = vunpack.c.l.bf16 %v82_v0  ;;  %v390_v9 = vmov 0.0   ;;  %v238_v10 = vld [vmem:[#allocation8 + $0x8] sm:$0xff]   ;;  %vm391_vm1 = vmmov 0   ;;  %v210_v15 = vld [vmem:[#allocation5] ss:$0 sm:$0xff]  ;;  %s392_s4 = smov [#allocation11]  }
  0x5e   :  { %219 = vmatprep.subr.bf16.mxu0 %v390_v9  ;;  %223 = vmatprep.mubr.msk.bf16.mxu0 %vm391_vm1, %v390_v9  ;;  %v211_v17 = vld [vmem:[#allocation7] ss:$0 sm:$0xff]  ;;  %v212_v21 = vld [vmem:[#allocation10] ss:$0 sm:$0xff]  ;;  %s199_s29 = sshll.u32 %s392_s4, 4  ;;  %s200_s29 = int_to_ptr.vmem [resolvable:$true] %s199_s29 }
  0x5f   :  { %v85_v2 = vsel %vm84_vm0, %v83_v1, 0.0  ;;  %220 = vmatpush3.bf16.msra.mxu0 %v237_v8  ;;  %s353_s30 = scalar_lea.vmem %s200_s29, 64  ;;  %p358_p13 = scmp.lt.s32.totalorder %s200_s29, %s200_s29 }
  0x60   :  { %86 = vadd.xlane.f32.xlu0 %v85_v2  ;;  %221 = vmatprep.subr.bf16.mxu0 %v390_v9  ;;  %p354_p12 = scmp.ne.s32.totalorder %s200_s29, %s353_s30  ;;  %p359_p0 = scmp.lt.s32.totalorder %s353_s30, %s353_s30 }
  0x62   :  { %p360_p1 = por %p359_p0, %p358_p13 }
  0x63   :  { %222 = vmatpush3.bf16.msra.mxu0 %v238_v10 }
  0x64   :  { %p361_p2 = pnand %p360_p1, %p354_p12 }
  0xed   :  { %v87_v3 = vpop.xlane.xlu0 %86 }
  0xee   :  { %v89_v4 = vmul.f32 0.03125, %v87_v3 }
  0xf0   :  { %v90_v5 = vsub.f32 %v83_v1, %v89_v4 }
  0xf2   :  { %v91_v6 = vmul.f32 %v90_v5, %v90_v5 }
  0xf4   :  { %v92_v7 = vsel %vm84_vm0, %v91_v6, 0.0 }
  0xf5   :  { %93 = vadd.xlane.f32.xlu0 %v92_v7 }
 0x182   :  { %v94_v11 = vpop.xlane.xlu0 %93 }
 0x183   :  { %v95_v12 = vmul.f32 0.03125, %v94_v11 }
 0x185   :  { %v96_v13 = vadd.f32 1e-06, %v95_v12 }
 0x187   :  { %239 = vrsqrt.f32 %v96_v13 }
 0x191   :  { %v240_v14 = vpop.eup %239 }
 0x192   :  { %v98_v16 = vmul.f32 %v240_v14, %v90_v5 }
 0x194   :  { %v106_v18 = vmul.f32 %v210_v15, %v98_v16 }
 0x196   :  { %v114_v19 = vadd.f32 %v211_v17, %v106_v18 }
 0x198   :  { %v115_v20 = vpack.c.bf16 %v114_v19, %v114_v19 }
 0x19a   :  { %224 = vmatmul.mubr.msk.bf16.vlgmr.msra.gmra.mrb[0].mxu0 %vm84_vm0, %v115_v20 }
 0x26d   :  { %v176_v22 = vpop.f32.mrb[0].mxu0 }
 0x26e   :  { %v177_v23 = vadd.f32 %v212_v21, %v176_v22  ;;  %v225_v24 = vpop.f32.mrb[1].mxu0 }
 0x26f   :  { %v179_v25 = vpop.f32.mrb[2].mxu0 }
 0x270   :  { %v182_v26 = vmul.f32 %v177_v23, %v177_v23  ;;  %v226_v27 = vpop.f32.mrb[3].mxu0 }
 0x272   :  { %v183_v28 = vmul.f32 %v182_v26, %v177_v23 }
 0x274   :  { %v184_v29 = vmul.f32 0.044715, %v183_v28 }
 0x276   :  { %v185_v30 = vadd.f32 %v184_v29, %v177_v23 }
 0x278   :  { %v186_v31 = vmul.f32 0.7978846, %v185_v30 }
 0x27a   :  { %241 = vtanh.f32 %v186_v31 }
 0x284   :  { %v242_v32 = vpop.eup %241 }
 0x285   :  { %v188_v33 = vadd.f32 1.0, %v242_v32 }
 0x287   :  { %v189_v34 = vmul.f32 0.5, %v188_v33 }
 0x289   :  { %v190_v35 = vmul.f32 %v189_v34, %v177_v23 }
 0x28b   :  { %v191_v36 = vpack.c.bf16 %v190_v35, %v190_v35 }
 0x28d   :  { %192 = vst [vmem:[#allocation11] sm:$0xf] %v191_v36 }
 0x28e   :  { %364 = shalt.err (!%p361_p2)
}
 0x28f   :  { %s365_s6 = scalar_lea.hbm %s510_s5, 64 }
 0x290   :  { %p366_p3 = scmp.ne.s32.totalorder %s510_s5, %s365_s6  ;;  %p369_p4 = scmp.lt.u32.totalorder %s365_s6, %s510_s5 }
 0x292   :  { %p371_p5 = pnand %p369_p4, %p366_p3 }
 0x294   :  { %374 = shalt.err (!%p371_p5)
}
 0x295   :  { %202 = dma.vmem_to_hbm [thread:$0]  %s200_s29, 64, %s510_s5, [#allocation4]  }
 0x296   :  { %381 = dma.done.wait [#allocation4], 64  }
 0x297   :  { %382 = vsyncadd [#allocation4], 4294967232 }
 0x298   :  { %206 = vsyncpa [#allocation3], 1 }
 0x299   :  { %207 = vsyncpa [#allocation6], 1 }
 0x29a   :  { %208 = vsyncpa [#allocation9], 1 }
 0x29b   :  { %209 = vsyncpa [#allocation4], 1 }

// kernel: _encode.18
= control target key start
LH: loop header
LB: loop body
LE: loop exit
PB: predicated region body
PF: predicated region fallthrough
CT: control target
= control target key end

     0   :  { %9 = vsyncpa [#allocation4], 0  ;;  %s487_s0 = inlined_call_operand.hbm [shape: bf16[8,128], index: 0, kind: input, shape index: {}]   ;;  %s488_s1 = inlined_call_operand.hbm [shape: bf16[128,32], index: 1, kind: input, shape index: {}]   ;;  %s489_s2 = inlined_call_operand.hbm [shape: f32[1,32], index: 2, kind: input, shape index: {}]   ;;  %s490_s3 = inlined_call_operand.hbm [shape: bf16[8,32], index: 3, kind: input, shape index: {}]   ;;  %s491_s4 = inlined_call_operand.hbm [shape: bf16[8,32], index: 4, kind: output, shape index: {}]  }
   0x1   :  { %10 = vsyncpa [#allocation7], 0 }
   0x2   :  { %11 = vsyncpa [#allocation10], 0 }
   0x3   :  { %12 = vsyncpa [#allocation5], 0  ;;  %s391_s15 = smov [#allocation6]   ;;  %s273_s19 = scalar_lea.hbm %s488_s1, 1024 }
   0x4   :  { %s28_s16 = sshll.u32 %s391_s15, 4  ;;  %p274_p0 = scmp.ne.s32.totalorder %s488_s1, %s273_s19  ;;  %s29_s16 = int_to_ptr.vmem [resolvable:$true] %s28_s16 }
   0x5   :  { %p277_p1 = scmp.lt.u32.totalorder %s273_s19, %s488_s1 }
   0x7   :  { %p279_p2 = pnand %p277_p1, %p274_p0 }
   0x9   :  { %282 = shalt.err (!%p279_p2)
}
   0xa   :  { %s283_s24 = scalar_lea.vmem %s29_s16, 1024  ;;  %p288_p4 = scmp.lt.s32.totalorder %s29_s16, %s29_s16 }
   0xb   :  { %p284_p3 = scmp.ne.s32.totalorder %s29_s16, %s283_s24  ;;  %p289_p5 = scmp.lt.s32.totalorder %s283_s24, %s283_s24 }
   0xd   :  { %p290_p6 = por %p289_p5, %p288_p4 }
   0xf   :  { %p291_p7 = pnand %p290_p6, %p284_p3 }
  0x11   :  { %294 = shalt.err (!%p291_p7)
}
  0x12   :  { %s392_s25 = smov 64   ;;  %s393_s26 = smov 4  }
  0x13   :  { %34 = dma.hbm_to_vmem [thread:$0]  %s488_s1, 1024, %s29_s16, [#allocation7], %s392_s25, %s392_s25, %s393_s26  }
  0x14   :  { %s394_s29 = smov [#allocation3]   ;;  %s395_s5 = smov [#allocation8]  }
  0x15   :  { %s19_s30 = sshll.u32 %s394_s29, 4  ;;  %s41_s6 = sshll.u32 %s395_s5, 4  ;;  %s20_s30 = int_to_ptr.vmem [resolvable:$true] %s19_s30  ;;  %s42_s6 = int_to_ptr.vmem [resolvable:$true] %s41_s6 }
  0x16   :  { %s295_s9 = scalar_lea.hbm %s487_s0, 64 }
  0x17   :  { %p296_p8 = scmp.ne.s32.totalorder %s487_s0, %s295_s9  ;;  %p299_p9 = scmp.lt.u32.totalorder %s295_s9, %s487_s0 }
  0x19   :  { %p301_p10 = pnand %p299_p9, %p296_p8 }
  0x1b   :  { %304 = shalt.err (!%p301_p10)
}
  0x1c   :  { %s305_s1 = scalar_lea.vmem %s20_s30, 64  ;;  %p310_p12 = scmp.lt.s32.totalorder %s20_s30, %s20_s30 }
  0x1d   :  { %p306_p11 = scmp.ne.s32.totalorder %s20_s30, %s305_s1  ;;  %p311_p13 = scmp.lt.s32.totalorder %s305_s1, %s305_s1 }
  0x1f   :  { %p312_p0 = por %p311_p13, %p310_p12 }
  0x21   :  { %p313_p1 = pnand %p312_p0, %p306_p11 }
  0x23   :  { %316 = shalt.err (!%p313_p1)
}
  0x24   :  { %22 = dma.hbm_to_vmem [thread:$0]  %s487_s0, 64, %s20_s30, [#allocation4]  }
  0x25   :  { %s317_s18 = scalar_lea.hbm %s489_s2, 16 }
  0x26   :  { %p318_p2 = scmp.ne.s32.totalorder %s489_s2, %s317_s18  ;;  %p321_p3 = scmp.lt.u32.totalorder %s317_s18, %s489_s2 }
  0x28   :  { %p323_p4 = pnand %p321_p3, %p318_p2 }
  0x2a   :  { %326 = shalt.err (!%p323_p4)
}
  0x2b   :  { %s327_s23 = scalar_lea.vmem %s42_s6, 16  ;;  %s331_s24 = scalar_lea.vmem %s42_s6, 32 }
  0x2c   :  { %p328_p5 = scmp.ne.s32.totalorder %s42_s6, %s327_s23  ;;  %p332_p6 = scmp.lt.s32.totalorder %s42_s6, %s42_s6 }
  0x2d   :  { %p333_p7 = scmp.lt.s32.totalorder %s331_s24, %s327_s23 }
  0x2f   :  { %p334_p8 = por %p333_p7, %p332_p6 }
  0x31   :  { %p335_p9 = pnand %p334_p8, %p328_p5 }
  0x33   :  { %338 = shalt.err (!%p335_p9)
}
  0x34   :  { %44 = dma.hbm_to_vmem [thread:$0]  %s489_s2, 16, %s42_s6, [#allocation7]  }
  0x35   :  { %s396_s26 = smov [#allocation9]   ;;  %s339_s30 = scalar_lea.hbm %s490_s3, 64 }
  0x36   :  { %s51_s27 = sshll.u32 %s396_s26, 4  ;;  %p340_p10 = scmp.ne.s32.totalorder %s490_s3, %s339_s30  ;;  %s52_s27 = int_to_ptr.vmem [resolvable:$true] %s51_s27 }
  0x37   :  { %p343_p11 = scmp.lt.u32.totalorder %s339_s30, %s490_s3 }
  0x39   :  { %p345_p12 = pnand %p343_p11, %p340_p10 }
  0x3b   :  { %348 = shalt.err (!%p345_p12)
}
  0x3c   :  { %s349_s10 = scalar_lea.vmem %s52_s27, 64  ;;  %p354_p0 = scmp.lt.s32.totalorder %s52_s27, %s52_s27 }
  0x3d   :  { %p350_p13 = scmp.ne.s32.totalorder %s52_s27, %s349_s10  ;;  %p355_p1 = scmp.lt.s32.totalorder %s349_s10, %s349_s10 }
  0x3f   :  { %p356_p2 = por %p355_p1, %p354_p0 }
  0x41   :  { %p357_p3 = pnand %p356_p2, %p350_p13 }
  0x43   :  { %360 = shalt.err (!%p357_p3)
}
  0x44   :  { %54 = dma.hbm_to_vmem [thread:$0]  %s490_s3, 64, %s52_s27, [#allocation10]  }
  0x45   :  { %383 = dma.done.wait [#allocation4], 64  }
  0x46   :  { %384 = vsyncadd [#allocation4], 4294967232 }
  0x47   :  { %385 = dma.done.wait [#allocation7], 1040  }
  0x48   :  { %386 = vsyncadd [#allocation7], 4294966256 }
  0x49   :  { %387 = dma.done.wait [#allocation10], 64  }
  0x4a   :  { %388 = vsyncadd [#allocation10], 4294967232  ;;  %vm72_vm0 = vcmask 261120   ;;  %v397_v0 = vmov 0.0   ;;  %vm398_vm1 = vmmov 0   ;;  %v265_v1 = vld [vmem:[#allocation6] sm:$0xff]  }
  0x4b   :  { %236 = vmatprep.subr.bf16.mxu0 %v397_v0  ;;  %252 = vmatprep.mubr.msk.bf16.mxu0 %vm398_vm1, %v397_v0  ;;  %73 = vst.msk [vmem:[#allocation2] sm:$0xff] %vm72_vm0, %v397_v0  ;;  %v266_v2 = vld [vmem:[#allocation6 + $0x8] sm:$0xff]   ;;  %v267_v3 = vld [vmem:[#allocation6 + $0x10] sm:$0xff]   ;;  %v268_v4 = vld [vmem:[#allocation6 + $0x18] sm:$0xff]   ;;  %s399_s3 = smov [#allocation11]   ;;  %vm199_vm2 = vcmask 257024  }
  0x4c   :  { %237 = vmatpush3.bf16.msra.mxu0 %v265_v1  ;;  %v269_v5 = vld [vmem:[#allocation6 + $0x20] sm:$0xff]   ;;  %v270_v6 = vld [vmem:[#allocation6 + $0x28] sm:$0xff]   ;;  %v271_v7 = vld [vmem:[#allocation6 + $0x30] sm:$0xff]   ;;  %s207_s11 = sshll.u32 %s399_s3, 4  ;;  %s208_s11 = int_to_ptr.vmem [resolvable:$true] %s207_s11 }
  0x4d   :  { %238 = vmatprep.subr.bf16.mxu0 %v397_v0  ;;  %v272_v8 = vld [vmem:[#allocation6 + $0x38] sm:$0xff]   ;;  %v195_v16 = vld [vmem:[#allocation9] sm:$0xf]  ;;  %v226_v17 = vld [vmem:[#allocation8] ss:$0 sm:$0xff]  ;;  %s361_s12 = scalar_lea.vmem %s208_s11, 64  ;;  %p366_p5 = scmp.lt.s32.totalorder %s208_s11, %s208_s11 }
  0x4e   :  { %v75_v9 = vld [vmem:[#allocation3] sm:$0xf]  ;;  %v196_v18 = vunpack.c.l.bf16 %v195_v16  ;;  %p362_p4 = scmp.ne.s32.totalorder %s208_s11, %s361_s12  ;;  %p367_p6 = scmp.lt.s32.totalorder %s361_s12, %s361_s12 }
  0x50   :  { %239 = vmatpush3.bf16.msra.mxu0 %v266_v2  ;;  %p368_p7 = por %p367_p6, %p366_p5 }
  0x51   :  { %240 = vmatprep.subr.bf16.mxu0 %v397_v0 }
  0x52   :  { %v74_v10 = vld [vmem:[#allocation2] sm:$0xff]  ;;  %p369_p8 = pnand %p368_p7, %p362_p4 }
  0x54   :  { %241 = vmatpush3.bf16.msra.mxu0 %v267_v3 }
  0x55   :  { %242 = vmatprep.subr.bf16.mxu0 %v397_v0 }
  0x58   :  { %243 = vmatpush3.bf16.msra.mxu0 %v268_v4 }
  0x59   :  { %244 = vmatprep.subr.bf16.mxu0 %v397_v0 }
  0x5c   :  { %245 = vmatpush3.bf16.msra.mxu0 %v269_v5 }
  0x5d   :  { %246 = vmatprep.subr.bf16.mxu0 %v397_v0 }
  0x60   :  { %247 = vmatpush3.bf16.msra.mxu0 %v270_v6 }
  0x61   :  { %248 = vmatprep.subr.bf16.mxu0 %v397_v0 }
  0x64   :  { %249 = vmatpush3.bf16.msra.mxu0 %v271_v7 }
  0x65   :  { %250 = vmatprep.subr.bf16.mxu0 %v397_v0 }
  0x68   :  { %251 = vmatpush3.bf16.msra.mxu0 %v272_v8 }
  0x6b   :  { %253 = vmatmul.mubr.bf16.vlgmr.msra.gmra.mrb[0].mxu0 %v75_v9 }
 0x13e   :  { %v174_v11 = vpop.f32.mrb[0].mxu0 }
 0x13f   :  { %v180_v12 = vadd.f32 %v174_v11, %v74_v10  ;;  %v254_v13 = vpop.f32.mrb[1].mxu0 }
 0x140   :  { %v177_v14 = vpop.f32.mrb[2].mxu0 }
 0x141   :  { %182 = vst.msk [vmem:[#allocation2] sm:$0xff] %vm72_vm0, %v180_v12  ;;  %v255_v15 = vpop.f32.mrb[3].mxu0 }
 0x148   :  { %v186_v19 = vld [vmem:[#allocation2] sm:$0xff] }
 0x149   :  { %v194_v20 = vadd.f32 %v226_v17, %v186_v19 }
 0x14b   :  { %v197_v21 = vadd.f32 %v196_v18, %v194_v20 }
 0x14d   :  { %v198_v22 = vpack.c.bf16 %v197_v21, %v197_v21 }
 0x14f   :  { %200 = vst.msk [vmem:[#allocation11] sm:$0xf] %vm199_vm2, %v198_v22 }
 0x150   :  { %372 = shalt.err (!%p369_p8)
}
 0x151   :  { %s373_s14 = scalar_lea.hbm %s491_s4, 64 }
 0x152   :  { %p374_p9 = scmp.ne.s32.totalorder %s491_s4, %s373_s14  ;;  %p377_p10 = scmp.lt.u32.totalorder %s373_s14, %s491_s4 }
 0x154   :  { %p379_p11 = pnand %p377_p10, %p374_p9 }
 0x156   :  { %382 = shalt.err (!%p379_p11)
}
 0x157   :  { %210 = dma.vmem_to_hbm [thread:$0]  %s208_s11, 64, %s491_s4, [#allocation5]  }
 0x158   :  { %389 = dma.done.wait [#allocation5], 64  }
 0x159   :  { %390 = vsyncadd [#allocation5], 4294967232 }
 0x15a   :  { %214 = vsyncpa [#allocation4], 1 }
 0x15b   :  { %215 = vsyncpa [#allocation7], 1 }
 0x15c   :  { %216 = vsyncpa [#allocation10], 1 }
 0x15d   :  { %217 = vsyncpa [#allocation5], 1 }

// kernel: _encode.24
= control target key start
LH: loop header
LB: loop body
LE: loop exit
PB: predicated region body
PF: predicated region fallthrough
CT: control target
= control target key end

     0   :  { %9 = vsyncpa [#allocation4], 0  ;;  %s438_s0 = inlined_call_operand.hbm [shape: bf16[8,32], index: 0, kind: input, shape index: {}]   ;;  %s439_s1 = inlined_call_operand.hbm [shape: bf16[32,32], index: 1, kind: input, shape index: {}]   ;;  %s440_s2 = inlined_call_operand.hbm [shape: f32[1,32], index: 2, kind: input, shape index: {}]   ;;  %s441_s3 = inlined_call_operand.hbm [shape: f32[1,32], index: 3, kind: input, shape index: {}]   ;;  %s442_s4 = inlined_call_operand.hbm [shape: bf16[8,32], index: 4, kind: output, shape index: {}]  }
   0x1   :  { %10 = vsyncpa [#allocation7], 0 }
   0x2   :  { %11 = vsyncpa [#allocation10], 0 }
   0x3   :  { %12 = vsyncpa [#allocation5], 0  ;;  %s339_s15 = smov [#allocation6]   ;;  %s221_s19 = scalar_lea.hbm %s439_s1, 256 }
   0x4   :  { %s28_s16 = sshll.u32 %s339_s15, 4  ;;  %p222_p0 = scmp.ne.s32.totalorder %s439_s1, %s221_s19  ;;  %s29_s16 = int_to_ptr.vmem [resolvable:$true] %s28_s16 }
   0x5   :  { %p225_p1 = scmp.lt.u32.totalorder %s221_s19, %s439_s1 }
   0x7   :  { %p227_p2 = pnand %p225_p1, %p222_p0 }
   0x9   :  { %230 = shalt.err (!%p227_p2)
}
   0xa   :  { %s231_s24 = scalar_lea.vmem %s29_s16, 256  ;;  %p236_p4 = scmp.lt.s32.totalorder %s29_s16, %s29_s16 }
   0xb   :  { %p232_p3 = scmp.ne.s32.totalorder %s29_s16, %s231_s24  ;;  %p237_p5 = scmp.lt.s32.totalorder %s231_s24, %s231_s24 }
   0xd   :  { %p238_p6 = por %p237_p5, %p236_p4 }
   0xf   :  { %p239_p7 = pnand %p238_p6, %p232_p3 }
  0x11   :  { %242 = shalt.err (!%p239_p7)
}
  0x12   :  { %s340_s25 = smov 64   ;;  %s341_s26 = smov 4  }
  0x13   :  { %34 = dma.hbm_to_vmem [thread:$0]  %s439_s1, 256, %s29_s16, [#allocation7], %s340_s25, %s340_s25, %s341_s26  }
  0x14   :  { %s342_s29 = smov [#allocation3]   ;;  %s343_s5 = smov [#allocation8]  }
  0x15   :  { %s19_s30 = sshll.u32 %s342_s29, 4  ;;  %s41_s6 = sshll.u32 %s343_s5, 4  ;;  %s20_s30 = int_to_ptr.vmem [resolvable:$true] %s19_s30  ;;  %s42_s6 = int_to_ptr.vmem [resolvable:$true] %s41_s6 }
  0x16   :  { %s243_s9 = scalar_lea.hbm %s438_s0, 64 }
  0x17   :  { %p244_p8 = scmp.ne.s32.totalorder %s438_s0, %s243_s9  ;;  %p247_p9 = scmp.lt.u32.totalorder %s243_s9, %s438_s0 }
  0x19   :  { %p249_p10 = pnand %p247_p9, %p244_p8 }
  0x1b   :  { %252 = shalt.err (!%p249_p10)
}
  0x1c   :  { %s253_s1 = scalar_lea.vmem %s20_s30, 64  ;;  %p258_p12 = scmp.lt.s32.totalorder %s20_s30, %s20_s30 }
  0x1d   :  { %p254_p11 = scmp.ne.s32.totalorder %s20_s30, %s253_s1  ;;  %p259_p13 = scmp.lt.s32.totalorder %s253_s1, %s253_s1 }
  0x1f   :  { %p260_p0 = por %p259_p13, %p258_p12 }
  0x21   :  { %p261_p1 = pnand %p260_p0, %p254_p11 }
  0x23   :  { %264 = shalt.err (!%p261_p1)
}
  0x24   :  { %22 = dma.hbm_to_vmem [thread:$0]  %s438_s0, 64, %s20_s30, [#allocation4]  }
  0x25   :  { %s265_s18 = scalar_lea.hbm %s440_s2, 16 }
  0x26   :  { %p266_p2 = scmp.ne.s32.totalorder %s440_s2, %s265_s18  ;;  %p269_p3 = scmp.lt.u32.totalorder %s265_s18, %s440_s2 }
  0x28   :  { %p271_p4 = pnand %p269_p3, %p266_p2 }
  0x2a   :  { %274 = shalt.err (!%p271_p4)
}
  0x2b   :  { %s275_s23 = scalar_lea.vmem %s42_s6, 16  ;;  %s279_s24 = scalar_lea.vmem %s42_s6, 32 }
  0x2c   :  { %p276_p5 = scmp.ne.s32.totalorder %s42_s6, %s275_s23  ;;  %p280_p6 = scmp.lt.s32.totalorder %s42_s6, %s42_s6 }
  0x2d   :  { %p281_p7 = scmp.lt.s32.totalorder %s279_s24, %s275_s23 }
  0x2f   :  { %p282_p8 = por %p281_p7, %p280_p6 }
  0x31   :  { %p283_p9 = pnand %p282_p8, %p276_p5 }
  0x33   :  { %286 = shalt.err (!%p283_p9)
}
  0x34   :  { %44 = dma.hbm_to_vmem [thread:$0]  %s440_s2, 16, %s42_s6, [#allocation7]  }
  0x35   :  { %s344_s26 = smov [#allocation9]   ;;  %s287_s30 = scalar_lea.hbm %s441_s3, 16 }
  0x36   :  { %s51_s27 = sshll.u32 %s344_s26, 4  ;;  %p288_p10 = scmp.ne.s32.totalorder %s441_s3, %s287_s30  ;;  %s52_s27 = int_to_ptr.vmem [resolvable:$true] %s51_s27 }
  0x37   :  { %p291_p11 = scmp.lt.u32.totalorder %s287_s30, %s441_s3 }
  0x39   :  { %p293_p12 = pnand %p291_p11, %p288_p10 }
  0x3b   :  { %296 = shalt.err (!%p293_p12)
}
  0x3c   :  { %s297_s10 = scalar_lea.vmem %s52_s27, 16  ;;  %s301_s2 = scalar_lea.vmem %s52_s27, 32 }
  0x3d   :  { %p298_p13 = scmp.ne.s32.totalorder %s52_s27, %s297_s10  ;;  %p302_p0 = scmp.lt.s32.totalorder %s52_s27, %s52_s27 }
  0x3e   :  { %p303_p1 = scmp.lt.s32.totalorder %s301_s2, %s297_s10 }
  0x40   :  { %p304_p2 = por %p303_p1, %p302_p0 }
  0x42   :  { %p305_p3 = pnand %p304_p2, %p298_p13 }
  0x44   :  { %308 = shalt.err (!%p305_p3)
}
  0x45   :  { %54 = dma.hbm_to_vmem [thread:$0]  %s441_s3, 16, %s52_s27, [#allocation10]  }
  0x46   :  { %331 = dma.done.wait [#allocation4], 64  }
  0x47   :  { %332 = vsyncadd [#allocation4], 4294967232 }
  0x48   :  { %333 = dma.done.wait [#allocation7], 272  }
  0x49   :  { %334 = vsyncadd [#allocation7], 4294967024 }
  0x4a   :  { %335 = dma.done.wait [#allocation10], 16  }
  0x4b   :  { %336 = vsyncadd [#allocation10], 4294967280  ;;  %vm72_vm0 = vcmask 261120   ;;  %v345_v0 = vmov 0.0   ;;  %vm346_vm1 = vmmov 0   ;;  %v217_v1 = vld [vmem:[#allocation6] sm:$0xff]  }
  0x4c   :  { %200 = vmatprep.subr.bf16.mxu0 %v345_v0  ;;  %204 = vmatprep.mubr.msk.bf16.mxu0 %vm346_vm1, %v345_v0  ;;  %73 = vst.msk [vmem:[#allocation2] sm:$0xff] %vm72_vm0, %v345_v0  ;;  %v218_v2 = vld [vmem:[#allocation6 + $0x8] sm:$0xff]   ;;  %v75_v3 = vld [vmem:[#allocation3] sm:$0xf]  ;;  %v195_v21 = vld [vmem:[#allocation8] ss:$0 sm:$0xff] }
  0x4d   :  { %201 = vmatpush3.bf16.msra.mxu0 %v217_v1  ;;  %v196_v23 = vld [vmem:[#allocation9] ss:$0 sm:$0xff]  ;;  %s347_s3 = smov [#allocation11]   ;;  %vm173_vm2 = vcmask 257024  }
  0x4e   :  { %202 = vmatprep.subr.bf16.mxu0 %v345_v0  ;;  %s181_s12 = sshll.u32 %s347_s3, 4  ;;  %s182_s12 = int_to_ptr.vmem [resolvable:$true] %s181_s12 }
  0x4f   :  { %s309_s13 = scalar_lea.vmem %s182_s12, 64  ;;  %p314_p5 = scmp.lt.s32.totalorder %s182_s12, %s182_s12 }
  0x50   :  { %p310_p4 = scmp.ne.s32.totalorder %s182_s12, %s309_s13  ;;  %p315_p6 = scmp.lt.s32.totalorder %s309_s13, %s309_s13 }
  0x51   :  { %203 = vmatpush3.bf16.msra.mxu0 %v218_v2 }
  0x52   :  { %p316_p7 = por %p315_p6, %p314_p5 }
  0x53   :  { %v74_v4 = vld [vmem:[#allocation2] sm:$0xff] }
  0x54   :  { %205 = vmatmul.mubr.msk.bf16.vlgmr.msra.gmra.mrb[0].mxu0 %vm72_vm0, %v75_v3  ;;  %p317_p8 = pnand %p316_p7, %p310_p4 }
 0x127   :  { %v130_v5 = vpop.f32.mrb[0].mxu0 }
 0x128   :  { %v136_v6 = vadd.f32 %v130_v5, %v74_v4  ;;  %v206_v7 = vpop.f32.mrb[1].mxu0 }
 0x129   :  { %v133_v8 = vpop.f32.mrb[2].mxu0 }
 0x12a   :  { %137 = vst.msk [vmem:[#allocation2] sm:$0xff] %vm72_vm0, %v136_v6  ;;  %v207_v9 = vpop.f32.mrb[3].mxu0 }
 0x131   :  { %v141_v10 = vld [vmem:[#allocation2] sm:$0xff] }
 0x132   :  { %v142_v11 = vsel %vm72_vm0, %v141_v10, 0.0 }
 0x133   :  { %143 = vadd.xlane.f32.xlu0 %v142_v11 }
 0x1c0   :  { %v144_v12 = vpop.xlane.xlu0 %143 }
 0x1c1   :  { %v146_v13 = vmul.f32 0.03125, %v144_v12 }
 0x1c3   :  { %v147_v14 = vsub.f32 %v141_v10, %v146_v13 }
 0x1c5   :  { %v148_v15 = vmul.f32 %v147_v14, %v147_v14 }
 0x1c7   :  { %v149_v16 = vsel %vm72_vm0, %v148_v15, 0.0 }
 0x1c8   :  { %150 = vadd.xlane.f32.xlu0 %v149_v16 }
 0x255   :  { %v151_v17 = vpop.xlane.xlu0 %150 }
 0x256   :  { %v152_v18 = vmul.f32 0.03125, %v151_v17 }
 0x258   :  { %v153_v19 = vadd.f32 1e-06, %v152_v18 }
 0x25a   :  { %219 = vrsqrt.f32 %v153_v19 }
 0x264   :  { %v220_v20 = vpop.eup %219 }
 0x265   :  { %v155_v22 = vmul.f32 %v220_v20, %v147_v14 }
 0x267   :  { %v163_v24 = vmul.f32 %v195_v21, %v155_v22 }
 0x269   :  { %v171_v25 = vadd.f32 %v196_v23, %v163_v24 }
 0x26b   :  { %v172_v26 = vpack.c.bf16 %v171_v25, %v171_v25 }
 0x26d   :  { %174 = vst.msk [vmem:[#allocation11] sm:$0xf] %vm173_vm2, %v172_v26 }
 0x26e   :  { %320 = shalt.err (!%p317_p8)
}
 0x26f   :  { %s321_s15 = scalar_lea.hbm %s442_s4, 64 }
 0x270   :  { %p322_p9 = scmp.ne.s32.totalorder %s442_s4, %s321_s15  ;;  %p325_p10 = scmp.lt.u32.totalorder %s321_s15, %s442_s4 }
 0x272   :  { %p327_p11 = pnand %p325_p10, %p322_p9 }
 0x274   :  { %330 = shalt.err (!%p327_p11)
}
 0x275   :  { %184 = dma.vmem_to_hbm [thread:$0]  %s182_s12, 64, %s442_s4, [#allocation5]  }
 0x276   :  { %337 = dma.done.wait [#allocation5], 64  }
 0x277   :  { %338 = vsyncadd [#allocation5], 4294967232 }
 0x278   :  { %188 = vsyncpa [#allocation4], 1 }
 0x279   :  { %189 = vsyncpa [#allocation7], 1 }
 0x27a   :  { %190 = vsyncpa [#allocation10], 1 }
 0x27b   :  { %191 = vsyncpa [#allocation5], 1 }

// kernel: _encode.25
= control target key start
LH: loop header
LB: loop body
LE: loop exit
PB: predicated region body
PF: predicated region fallthrough
CT: control target
= control target key end

     0   :  { %9 = vsyncpa [#allocation3], 0  ;;  %s2198_s0 = inlined_call_operand.hbm [shape: bf16[2,4,4,32], index: 0, kind: input, shape index: {}]   ;;  %s2199_s1 = inlined_call_operand.hbm [shape: bf16[9,32,32], index: 1, kind: input, shape index: {}]   ;;  %s2200_s2 = inlined_call_operand.hbm [shape: f32[1,32], index: 2, kind: input, shape index: {}]   ;;  %s2201_s3 = inlined_call_operand.hbm [shape: f32[1,32], index: 3, kind: input, shape index: {}]   ;;  %s2202_s4 = inlined_call_operand.hbm [shape: f32[2,4,32], index: 4, kind: output, shape index: {}]  }
   0x1   :  { %11 = vsyncpa [#allocation3 + $0x1], 0 }
   0x2   :  { %12 = vsyncpa [#allocation6], 0 }
   0x3   :  { %13 = vsyncpa [#allocation9], 0 }
   0x4   :  { %14 = vsyncpa [#allocation4], 0 }
   0x5   :  { %16 = vsyncpa [#allocation4 + $0x1], 0  ;;  %s1828_s15 = smov 0   ;;  %s1830_s16 = smov 0  }
   0x6   :  { %s1832_s17 = smov 0   ;;  %s1834_s18 = smov 0  }
   0x7 LB: > { %s1849_s19 = sadd.s32 4294967295, %s1789_s18   ;;  %s1287_s20 = sadd.s32 4294967294, %s1789_s18   ;;  %s1789_s18 = sphi %s1834_s18, %s2229_s18   ;;  %s1785_s17 = sphi %s1832_s17, %s2228_s17   ;;  %s1781_s16 = sphi %s1830_s16, %s2227_s16   ;;  %s1777_s15 = sphi %s1828_s15, %s2226_s15  }
   0x8   : > { %p42_p0 = scmp.ne.s32.totalorder %s1781_s16, %s1777_s15  ;;  %p2203_p1 = scmp.eq.s32.totalorder %s1849_s19, 0 }
   0x9   : > { %p135_p3 = scmp.eq.s32.totalorder %s1287_s20, 1  ;;  %p1288_p5 = scmp.ge.s32.totalorder %s1789_s18, 1 }
   0xa   : > { %p1858_p4 = por %p2203_p1, %p42_p0  ;;  %p142_p7 = scmp.lt.s32.totalorder %s1789_s18, 3 }
   0xb   : > { %p1863_p6 = por %p135_p3, %p42_p0  ;;  %s1791_s24 = smov [#allocation5]  }
   0xc   : > { %s2206_s21 = scalar_select %p1858_p4, 1, 0 }
   0xd   : > { %s2207_s22 = scalar_select %p1863_p6, 1, 0 }
   0xe   : > { %p1868_p8 = pnand %p1288_p5, %p142_p7  ;;  %s154_s25 = sshll.u32 %s1791_s24, 4  ;;  %s1872_s25 = int_to_ptr.vmem [resolvable:$true] %s154_s25 }
   0xf   : > { %s1792_s27 = smov [#allocation7]   ;;  %s1793_s29 = smov [#allocation8]  }
  0x10   : > { %s2208_s23 = scalar_select %p1868_p8, 1, 0 }
  0x11   : > { %p1513_p9 = pneg %p1868_p8  ;;  %s168_s28 = sshll.u32 %s1792_s27, 4  ;;  %s1883_s28 = int_to_ptr.vmem [resolvable:$true] %s168_s28 }
  0x12   : > { %s1885_s30 = sshll.u32 %s1793_s29, 4  ;;  %s1601_s7 = scalar_lea.hbm %s2199_s1, 2304  ;;  %s180_s30 = int_to_ptr.vmem [resolvable:$true] %s1885_s30 }
  0x13   : > { %p1879_p11 = pnand %p1513_p9, %p2203_p1  ;;  %p1602_p12 = scmp.ne.s32.totalorder %s2199_s1, %s1601_s7 }
  0x14   : > { %p1608_p5 = scmp.lt.u32.totalorder %s1601_s7, %s2199_s1 }
  0x15   : > { %p1895_p13 = pneg %p1879_p11 }
  0x17   : > { %p1604_p0 = pnand %p1895_p13, %p1602_p12 }
  0x19   : > { %p1605_p3 = pneg %p1604_p0 }
  0x1b   : > { %p1610_p7 = pnand %p1608_p5, %p1605_p3 }
  0x1d   : > { %1613 = shalt.err (!%p1610_p7)
}
  0x1e   : > { %s1614_s13 = scalar_lea.vmem %s1872_s25, 2304  ;;  %p1622_p2 = scmp.lt.s32.totalorder %s1872_s25, %s1872_s25 }
  0x1f   : > { %p1615_p9 = scmp.ne.s32.totalorder %s1872_s25, %s1614_s13  ;;  %p1623_p6 = scmp.lt.s32.totalorder %s1614_s13, %s1614_s13 }
  0x21   : > { %p1617_p10 = pnand %p1615_p9, %p1895_p13  ;;  %p1624_p12 = por %p1623_p6, %p1622_p2 }
  0x23   : > { %p1618_p1 = pneg %p1617_p10 }
  0x25   : > { %p1625_p0 = pnand %p1624_p12, %p1618_p1 }
  0x27   : > { %1628 = shalt.err (!%p1625_p0)
}
  0x28   : > { %s1794_s14 = smov 64   ;;  %s1795_s20 = smov 4  }
  0x29   : > { %1516 = dma.hbm_to_vmem [thread:$0]  (!%p1879_p11), %s2199_s1, 2304, %s1872_s25, [#allocation6], %s1794_s14, %s1794_s14, %s1795_s20  }
  0x2a   : > { %s1629_s6 = scalar_lea.hbm %s2200_s2, 16 }
  0x2b   : > { %p1630_p2 = scmp.ne.s32.totalorder %s2200_s2, %s1629_s6  ;;  %p1636_p10 = scmp.lt.u32.totalorder %s1629_s6, %s2200_s2 }
  0x2d   : > { %p1632_p1 = pnand %p1630_p2, %p1895_p13 }
  0x2f   : > { %p1633_p6 = pneg %p1632_p1 }
  0x31   : > { %p1638_p3 = pnand %p1636_p10, %p1633_p6 }
  0x33   : > { %1641 = shalt.err (!%p1638_p3)
}
  0x34   : > { %s1642_s25 = scalar_lea.vmem %s1883_s28, 16  ;;  %s1649_s12 = scalar_lea.vmem %s1883_s28, 32 }
  0x35   : > { %p1643_p5 = scmp.ne.s32.totalorder %s1883_s28, %s1642_s25  ;;  %p1650_p12 = scmp.lt.s32.totalorder %s1883_s28, %s1883_s28 }
  0x36   : > { %p1651_p0 = scmp.lt.s32.totalorder %s1649_s12, %s1642_s25 }
  0x37   : > { %p1645_p7 = pnand %p1643_p5, %p1895_p13 }
  0x38   : > { %p1652_p2 = por %p1651_p0, %p1650_p12 }
  0x39   : > { %p1646_p9 = pneg %p1645_p7 }
  0x3b   : > { %p1653_p1 = pnand %p1652_p2, %p1646_p9 }
  0x3d   : > { %1656 = shalt.err (!%p1653_p1)
}
  0x3e   : > { %1519 = dma.hbm_to_vmem [thread:$0]  (!%p1879_p11), %s2200_s2, 16, %s1883_s28, [#allocation6]  }
  0x3f   : > { %s1657_s27 = scalar_lea.hbm %s2201_s3, 16 }
  0x40   : > { %p1658_p6 = scmp.ne.s32.totalorder %s2201_s3, %s1657_s27  ;;  %p1664_p5 = scmp.lt.u32.totalorder %s1657_s27, %s2201_s3 }
  0x42   : > { %p1660_p10 = pnand %p1658_p6, %p1895_p13 }
  0x44   : > { %p1661_p3 = pneg %p1660_p10 }
  0x46   : > { %p1666_p7 = pnand %p1664_p5, %p1661_p3 }
  0x48   : > { %1669 = shalt.err (!%p1666_p7)
}
  0x49   : > { %s1670_s8 = scalar_lea.vmem %s180_s30, 16  ;;  %s1677_s28 = scalar_lea.vmem %s180_s30, 32 }
  0x4a   : > { %p1671_p9 = scmp.ne.s32.totalorder %s180_s30, %s1670_s8  ;;  %p1678_p2 = scmp.lt.s32.totalorder %s180_s30, %s180_s30 }
  0x4b   : > { %p1679_p1 = scmp.lt.s32.totalorder %s1677_s28, %s1670_s8 }
  0x4c   : > { %p1673_p12 = pnand %p1671_p9, %p1895_p13 }
  0x4d   : > { %p1680_p4 = por %p1679_p1, %p1678_p2 }
  0x4e   : > { %p1674_p0 = pneg %p1673_p12 }
  0x50   : > { %p1681_p8 = pnand %p1680_p4, %p1674_p0 }
  0x52   : > { %1684 = shalt.err (!%p1681_p8)
}
  0x53   : > { %1522 = dma.hbm_to_vmem [thread:$0]  (!%p1879_p11), %s2201_s3, 16, %s180_s30, [#allocation9]  }
  0x54   : > { %s1960_s10 = sadd.s32 1, %s1789_s18   ;;  %s29_s26 = sadd.s32 1, %s1785_s17 }
  0x55   : > { %s26_s25 = ssub.s32 %s1789_s18, %s1960_s10  ;;  %p36_p8 = scmp.ne.s32.totalorder %s1785_s17, %s1781_s16 }
  0x56   : > { %p27_p4 = scmp.eq.s32.totalorder %s26_s25, 0  ;;  %p37_p13 = scmp.eq.s32.totalorder %s1789_s18, 0 }
  0x57   : > { %p1534_p6 = scmp.lt.s32.totalorder %s1789_s18, 2  ;;  %p2211_p3 = scmp.eq.s32.totalorder %s1849_s19, 1 }
  0x58   : > { %s1970_s12 = scalar_select %p27_p4, %s1785_s17, %s29_s26  }
  0x59   : > { %p38_p10 = por %p37_p13, %p36_p8  ;;  %p1974_p5 = por %p2211_p3, %p36_p8 }
  0x5a   : > { %s190_s14 = sand.u32 1, %s1785_s17   ;;  %s1368_s20 = sshll.u32 %s1789_s18, 7 }
  0x5b   : > { %s1293_s30 = sshll.u32 %s190_s14, 3  ;;  %s1983_s29 = scalar_lea.hbm %s2198_s0, %s1368_s20 }
  0x5c   : > { %s194_s5 = scalar_lea.vmem [#allocation2], %s1293_s30  ;;  %p1985_p11 = pnand %p1534_p6, %p38_p10 }
  0x5d   : > { %s201_s6 = sshll.u32 %s194_s5, 4  ;;  %s1991_s8 = scalar_lea.sflag [#allocation3], %s190_s14  ;;  %s1989_s6 = int_to_ptr.vmem [resolvable:$true] %s201_s6 }
  0x5e   : > { %s1685_s28 = scalar_lea.hbm %s1983_s29, 128  ;;  %p1687_p9 = pneg %p1985_p11 }
  0x5f   : > { %p1686_p7 = scmp.ne.s32.totalorder %s1983_s29, %s1685_s28  ;;  %s1690_s25 = scalar_lea.hbm %s2198_s0, 256 }
  0x60   : > { %p1691_p2 = scmp.lt.u32.totalorder %s1983_s29, %s2198_s0  ;;  %p1692_p1 = scmp.lt.u32.totalorder %s1690_s25, %s1685_s28 }
  0x61   : > { %p1688_p12 = pnand %p1687_p9, %p1686_p7  ;;  %p1694_p8 = scmp.lt.u32.totalorder %s1685_s28, %s1983_s29 }
  0x62   : > { %p1693_p4 = por %p1692_p1, %p1691_p2 }
  0x63   : > { %p1689_p0 = pneg %p1688_p12 }
  0x64   : > { %p1695_p13 = por %p1694_p8, %p1693_p4 }
  0x66   : > { %p1696_p6 = pnand %p1695_p13, %p1689_p0 }
  0x68   : > { %1699 = shalt.err (!%p1696_p6)
}
  0x69   : > { %s1700_s14 = scalar_lea.vmem %s1989_s6, 128  ;;  %s1796_s30 = smov [#allocation2]  }
  0x6a   : > { %p1701_p10 = scmp.ne.s32.totalorder %s1989_s6, %s1700_s14  ;;  %s1705_s24 = sshll.u32 %s1796_s30, 4  ;;  %s1706_s24 = int_to_ptr.vmem [resolvable:$false] %s1705_s24 }
  0x6b   : > { %s1707_s27 = scalar_lea.vmem %s1706_s24, 256  ;;  %p1708_p12 = scmp.lt.s32.totalorder %s1989_s6, %s1706_s24 }
  0x6c   : > { %p1703_p3 = pnand %p1701_p10, %p1687_p9  ;;  %p1709_p2 = scmp.lt.s32.totalorder %s1707_s27, %s1700_s14 }
  0x6e   : > { %p1704_p7 = pneg %p1703_p3  ;;  %p1710_p1 = por %p1709_p2, %p1708_p12 }
  0x70   : > { %p1711_p4 = pnand %p1710_p1, %p1704_p7 }
  0x72   : > { %1714 = shalt.err (!%p1711_p4)
}
  0x73   : > { %s1797_s5 = smov 32   ;;  %s1798_s28 = smov 2  }
  0x74   : > { %1526 = dma.hbm_to_vmem [thread:$0]  (!%p1985_p11), %s1983_s29, 128, %s1989_s6, %s1991_s8, %s1797_s5, %s1797_s5, %s1798_s28  }
  0x75   : > { %p2214_p9 = scmp.ne.s32.totalorder %s2208_s23, 0 }
  0x76   : > { %s2022_s9 = sand.u32 (!%p2214_p9), 1, %s1781_s16   ;;  %p2215_p0 = scmp.ne.s32.totalorder (!%p2214_p9), %s2206_s21, 0 }
  0x77   : > { %213 = sbr.rel (%p2214_p9) target bundleno = 742 (0x2e6), region = 36  ;;  %s1297_s11 = sshll.u32 (!%p2214_p9), %s2022_s9, 3 }
  0x78   : > { %s216_s25 = scalar_lea.sflag (!%p2214_p9), [#allocation3], %s2022_s9  ;;  %s2026_s26 = scalar_lea.vmem (!%p2214_p9), [#allocation2], %s1297_s11 }
  0x7e   : > { %1760 = dma.done.wait (%p2215_p0), %s216_s25, 128  }
  0x7f   : > { %1762 = vsyncadd (%p2215_p0), %s216_s25, 4294967168  ;;  %p2216_p11 = scmp.eq.s32.totalorder %s1849_s19, 0 }
  0x81   : > { %1764 = dma.done.wait (%p2216_p11), [#allocation6], 2320   ;;  %p2217_p8 = pmov %p2216_p11 }
  0x83   : > { %1766 = vsyncadd (%p2217_p8), [#allocation6], 4294964976  ;;  %p2218_p13 = pmov %p2217_p8 }
  0x84   : > { %p2219_p6 = pmov %p2217_p8 }
  0x85   : > { %1768 = dma.done.wait (%p2218_p13), [#allocation9], 16  }
  0x86   : > { %1770 = vsyncadd (%p2219_p6), [#allocation9], 4294967280  ;;  %vm283_vm0 = vsmask.f32 256  ;;  %v1799_v0 = vmov 0.0   ;;  %vm1800_vm4 = vmmov 0   ;;  %v325_v6 = vlaneseq }
  0x87   : > { %1428 = vmatprep.subr.bf16.mxu0 %v1799_v0  ;;  %1396 = vmatprep.subr.bf16.mxu1 %v1799_v0  ;;  %vm284_vm1 = vsmask.f32 1284  ;;  %vm286_vm2 = vsmask.f32 2312  ;;  %vm288_vm3 = vsmask.f32 3340 }
  0x88   : > { %1400 = vmatprep.mubr.msk.bf16.mxu1 %vm1800_vm4, %v1799_v0  ;;  %1432 = vmatprep.mubr.msk.bf16.mxu0 %vm1800_vm4, %v1799_v0  ;;  %vm285_vm5 = vmor %vm283_vm0, %vm284_vm1  ;;  %vm290_vm6 = vsmask.f32 4368  ;;  %vm292_vm8 = vsmask.f32 5396  ;;  %vm294_vm12 = vsmask.f32 6424 }
  0x89   : > { %vm287_vm7 = vmor %vm285_vm5, %vm286_vm2  ;;  %vm296_vm13 = vsmask.f32 7452  ;;  %v1581_v2 = vld [vmem:[#allocation5 + $0x40] sm:$0xff]   ;;  %v1582_v3 = vld [vmem:[#allocation5 + $0x10] sm:$0xff]   ;;  %v1801_v4 = vmov 1966171168  }
  0x8a   : > { %vm289_vm9 = vmor %vm287_vm7, %vm288_vm3  ;;  %v323_v5 = vunpack.c.l.s4 %v1801_v4  ;;  %1429 = vmatpush3.bf16.msra.mxu0 %v1581_v2  ;;  %v1583_v7 = vld [vmem:[#allocation5 + $0x48] sm:$0xff]   ;;  %1397 = vmatpush3.bf16.msra.mxu1 %v1582_v3  ;;  %v1584_v8 = vld [vmem:[#allocation5 + $0x18] sm:$0xff]   ;;  %v326_v14 = vshrl.u32 %v325_v6, 7  ;;  %vm348_vm0 = vcmask 261120   ;;  %vm1142_vm1 = vcmask 257024   ;;  %s1301_s21 = sshll.u32 %s2022_s9, 2 }
  0x8b   : > { %vm291_vm10 = vmor %vm289_vm9, %vm290_vm6  ;;  %1430 = vmatprep.subr.bf16.mxu0 %v1799_v0  ;;  %1398 = vmatprep.subr.bf16.mxu1 %v1799_v0  ;;  %v1302_v9 = vld.sshfl [vmem:[%s2026_s26] sm:$0x11 pattern:$0x75316420]  ;;  %v1586_v30 = vld [vmem:[#allocation5] sm:$0xff]   ;;  %s1365_s23 = sshll.u32 %s1849_s19, 6 }
  0x8c   : > { %vm2046_vm11 = vmor %vm291_vm10, %vm292_vm8  ;;  %v1303_v10 = vld.sshfl [vmem:[%s2026_s26 + $0x2] sm:$0x11 pattern:$0x75316420]  ;;  %v274_v11 = vcombine.high %v1302_v9, %v1302_v9  ;;  %v299_v12 = vshrl.u32 %v1302_v9, 16  ;;  %v324_v13 = vunpack.c.0.s8 %v323_v5  ;;  %v1588_v40 = vld [vmem:[#allocation5 + $0x8] sm:$0xff]   ;;  %s2153_s20 = scalar_lea.hbm %s2202_s4, %s1365_s23 }
  0x8d   : > { %vm295_vm14 = vmor %vm2046_vm11, %vm294_vm12  ;;  %v282_v15 = vcombine.high %v1303_v10, %v1303_v10  ;;  %v308_v17 = vshrl.u32 %v1303_v10, 16  ;;  %v1326_v18 = vld.sshfl [vmem:[%s2026_s26 + $0x4] sm:$0x11 pattern:$0x75316420]  ;;  %v1590_v48 = vld [vmem:[#allocation5 + $0x20] sm:$0xff]  }
  0x8e   : > { %1431 = vmatpush3.bf16.msra.mxu0 %v1583_v7  ;;  %vm2057_vm15 = vmor %vm295_vm14, %vm296_vm13  ;;  %1399 = vmatpush3.bf16.msra.mxu1 %v1584_v8  ;;  %v304_v19 = vshll.u32 %v274_v11, 16  ;;  %v660_v20 = vcombine.high %v1326_v18, %v1326_v18  ;;  %v671_v21 = vshrl.u32 %v1326_v18, 16  ;;  %v2066_v24 = vsub.s32 %v324_v13, %v326_v14  ;;  %v257_v32 = vld [vmem:[%s2026_s26] sm:$0x1]  ;;  %v258_v36 = vld [vmem:[%s2026_s26 + $0x2] sm:$0x1] }
  0x8f   : > { %1436 = vmatprep.subr.bf16.mxu0 %v1799_v0  ;;  %v313_v22 = vshll.u32 %v282_v15, 16  ;;  %1404 = vmatprep.subr.bf16.mxu1 %v1799_v0  ;;  %v1334_v33 = vld.sshfl [vmem:[%s2026_s26 + $0x2] sm:$0x10 pattern:$0x75316420]  ;;  %v394_v41 = vcombine.low %v257_v32, %v258_v36  ;;  %v1589_v50 = vld [vmem:[#allocation5 + $0x60] sm:$0xff]  }
  0x90   : > { %v306_v23 = vsel %vm2057_vm15, %v299_v12, %v304_v19  ;;  %v676_v25 = vshll.u32 %v660_v20, 16  ;;  %v2079_v34 = vld.sshfl [vmem:[%s2026_s26 + $0x4] sm:$0x10 pattern:$0x75316420]  ;;  %v1592_v55 = vld [vmem:[#allocation5 + $0x28] sm:$0xff]  }
  0x91   : > { %v315_v26 = vsel %vm2057_vm15, %v308_v17, %v313_v22  ;;  %v1585_v38 = vld [vmem:[#allocation5 + $0x50] sm:$0xff]   ;;  %v1336_v42 = vcombine.high %v1334_v33, %v2079_v34  ;;  %v1587_v43 = vld [vmem:[#allocation5 + $0x58] sm:$0xff]   ;;  %v401_v44 = vrot.slane %v394_v41, %v2066_v24  ;;  %v1591_v57 = vld [vmem:[#allocation5 + $0x68] sm:$0xff]   ;;  %s255_s29 = scalar_lea.vmem [#allocation10], %s1301_s21  ;;  %s1175_s14 = scalar_lea.sflag [#allocation4], %s2022_s9 }
  0x92   : > { %v321_v27 = vcombine.low %v306_v23, %v315_v26  ;;  %v2072_v28 = vsel %vm2057_vm15, %v671_v21, %v676_v25  ;;  %v1312_v49 = vld.sshfl [vmem:[%s2026_s26] sm:$0x10 pattern:$0x75316420]  ;;  %v1340_v51 = vld [vmem:[%s2026_s26 + $0x4] sm:$0x1] }
  0x93   : > { %v684_v29 = vcombine.low %v315_v26, %v2072_v28  ;;  %v787_v45 = vrot.slane %v1336_v42, %v2066_v24  ;;  %v408_v46 = vrot.slane %v401_v44, %v2066_v24  ;;  %v1341_v52 = vld [vmem:[%s2026_s26 + $0x6] sm:$0x1]  ;;  %v1314_v54 = vcombine.high %v1312_v49, %v1334_v33  ;;  %v1318_v3 = vld [vmem:[%s2026_s26 + $0x2] sm:$0x1]  ;;  %v1319_v4 = vld [vmem:[%s2026_s26 + $0x4] sm:$0x1] }
  0x94   : > { %v328_v31 = vrot.slane %v321_v27, %v2066_v24  ;;  %v1348_v53 = vld.sshfl [vmem:[%s2026_s26 + $0x6] sm:$0x11 pattern:$0x75316420]  ;;  %v861_v56 = vcombine.low %v1340_v51, %v1341_v52  ;;  %v570_v7 = vcombine.low %v1318_v3, %v1319_v4  ;;  %v1597_v15 = vld [vmem:[#allocation5 + $0x80] sm:$0xff]   ;;  %v1598_v18 = vld [vmem:[#allocation5 + $0x88] sm:$0xff]  }
  0x95   : > { %v691_v35 = vrot.slane %v684_v29, %v2066_v24  ;;  %v794_v47 = vrot.slane %v787_v45, %v2066_v24  ;;  %v951_v58 = vcombine.high %v1348_v53, %v1348_v53  ;;  %v496_v59 = vrot.slane %v1314_v54, %v2066_v24  ;;  %v1594_v2 = vld [vmem:[#allocation5 + $0x30] sm:$0xff]   ;;  %v1596_v8 = vld [vmem:[#allocation5 + $0x38] sm:$0xff]   ;;  %s1188_s6 = sshll.u32 %s255_s29, 4  ;;  %s1802_s19 = smov [#allocation10]   ;;  %s2155_s6 = int_to_ptr.vmem [resolvable:$true] %s1188_s6 }
  0x96   : > { %v335_v37 = vrot.slane %v328_v31, %v2066_v24  ;;  %v868_v60 = vrot.slane %v861_v56, %v2066_v24  ;;  %v962_v61 = vshrl.u32 %v1348_v53, 16  ;;  %v1593_v5 = vld [vmem:[#allocation5 + $0x70] sm:$0xff]   ;;  %v1595_v10 = vld [vmem:[#allocation5 + $0x78] sm:$0xff]   ;;  %v577_v11 = vrot.slane %v570_v7, %v2066_v24  ;;  %s1715_s30 = scalar_lea.vmem %s2155_s6, 64  ;;  %s1719_s24 = sshll.u32 %s1802_s19, 4  ;;  %s1720_s24 = int_to_ptr.vmem [resolvable:$false] %s1719_s24 }
  0x97   : > { %v698_v39 = vrot.slane %v691_v35, %v2066_v24  ;;  %v967_v62 = vshll.u32 %v951_v58, 16  ;;  %v503_v63 = vrot.slane %v496_v59, %v2066_v24  ;;  %v1357_v16 = vld.sshfl [vmem:[%s2026_s26 + $0x6] sm:$0x10 pattern:$0x75316420]  ;;  %p1716_p10 = scmp.ne.s32.totalorder %s2155_s6, %s1715_s30  ;;  %s1721_s27 = scalar_lea.vmem %s1720_s24, 128 }
  0x98   : > { %1401 = vmatmul.mubr.msk.bf16.vlgmr.msra.gmra.mrb[0].mxu1 %vm348_vm0, %v335_v37  ;;  %v875_v1 = vrot.slane %v868_v60, %v2066_v24  ;;  %v584_v13 = vrot.slane %v577_v11, %v2066_v24  ;;  %v1358_v17 = vcombine.high %v2079_v34, %v1357_v16  ;;  %v1363_v41 = vld [vmem:[#allocation8] ss:$0 sm:$0xff]  ;;  %p1722_p12 = scmp.lt.s32.totalorder %s2155_s6, %s1720_s24  ;;  %p1723_p2 = scmp.lt.s32.totalorder %s1721_s27, %s1715_s30 }
  0x99   : > { %1433 = vmatmul.mubr.msk.bf16.vlgmr.msra.gmra.mrb[0].mxu0 %vm348_vm0, %v698_v39  ;;  %1405 = vmatpush3.bf16.msra.mxu1 %v1586_v30  ;;  %v969_v6 = vsel %vm2057_vm15, %v962_v61, %v967_v62  ;;  %v1362_v39 = vld [vmem:[#allocation7] ss:$0 sm:$0xff]  ;;  %p1717_p3 = pnand %p1716_p10, %p1974_p5 }
  0x9a   : > { %1437 = vmatpush3.bf16.msra.mxu0 %v1585_v38  ;;  %1406 = vmatprep.subr.bf16.mxu1 %v1799_v0  ;;  %v975_v9 = vcombine.low %v2072_v28, %v969_v6  ;;  %v1078_v19 = vrot.slane %v1358_v17, %v2066_v24  ;;  %p1724_p1 = por %p1723_p2, %p1722_p12 }
  0x9b   : > { %1438 = vmatprep.subr.bf16.mxu0 %v1799_v0  ;;  %1408 = vmatprep.mubr.msk.bf16.mxu1 %vm1800_vm4, %v1799_v0  ;;  %p1718_p7 = pneg %p1717_p3 }
  0x9c   : > { %1440 = vmatprep.mubr.msk.bf16.mxu0 %vm1800_vm4, %v1799_v0  ;;  %v982_v12 = vrot.slane %v975_v9, %v2066_v24  ;;  %v1085_v20 = vrot.slane %v1078_v19, %v2066_v24 }
  0x9d   : > { %1407 = vmatpush3.bf16.msra.mxu1 %v1588_v40  ;;  %p1725_p4 = pnand %p1724_p1, %p1718_p7 }
  0x9e   : > { %1439 = vmatpush3.bf16.msra.mxu0 %v1587_v43  ;;  %1412 = vmatprep.subr.bf16.mxu1 %v1799_v0  ;;  %v989_v14 = vrot.slane %v982_v12, %v2066_v24 }
  0x9f   : > { %1444 = vmatprep.subr.bf16.mxu0 %v1799_v0 }
  0xa4   : > { %1409 = vmatmul.mubr.msk.bf16.vlgmr.msra.gmra.mrb[0].mxu1 %vm348_vm0, %v408_v46 }
  0xa5   : > { %1441 = vmatmul.mubr.msk.bf16.vlgmr.msra.gmra.mrb[0].mxu0 %vm348_vm0, %v794_v47  ;;  %1413 = vmatpush3.bf16.msra.mxu1 %v1590_v48 }
  0xa6   : > { %1445 = vmatpush3.bf16.msra.mxu0 %v1589_v50  ;;  %1414 = vmatprep.subr.bf16.mxu1 %v1799_v0 }
  0xa7   : > { %1446 = vmatprep.subr.bf16.mxu0 %v1799_v0  ;;  %1416 = vmatprep.mubr.msk.bf16.mxu1 %vm1800_vm4, %v1799_v0 }
  0xa8   : > { %1448 = vmatprep.mubr.msk.bf16.mxu0 %vm1800_vm4, %v1799_v0 }
  0xa9   : > { %1415 = vmatpush3.bf16.msra.mxu1 %v1592_v55 }
  0xaa   : > { %1447 = vmatpush3.bf16.msra.mxu0 %v1591_v57  ;;  %1420 = vmatprep.subr.bf16.mxu1 %v1799_v0 }
  0xab   : > { %1452 = vmatprep.subr.bf16.mxu0 %v1799_v0 }
  0xb0   : > { %1417 = vmatmul.mubr.msk.bf16.vlgmr.msra.gmra.mrb[0].mxu1 %vm348_vm0, %v503_v63 }
  0xb1   : > { %1449 = vmatmul.mubr.msk.bf16.vlgmr.msra.gmra.mrb[0].mxu0 %vm348_vm0, %v875_v1  ;;  %1421 = vmatpush3.bf16.msra.mxu1 %v1594_v2 }
  0xb2   : > { %1453 = vmatpush3.bf16.msra.mxu0 %v1593_v5  ;;  %1422 = vmatprep.subr.bf16.mxu1 %v1799_v0 }
  0xb3   : > { %1454 = vmatprep.subr.bf16.mxu0 %v1799_v0  ;;  %1424 = vmatprep.mubr.msk.bf16.mxu1 %vm1800_vm4, %v1799_v0 }
  0xb4   : > { %1456 = vmatprep.mubr.msk.bf16.mxu0 %vm1800_vm4, %v1799_v0 }
  0xb5   : > { %1423 = vmatpush3.bf16.msra.mxu1 %v1596_v8 }
  0xb6   : > { %1455 = vmatpush3.bf16.msra.mxu0 %v1595_v10 }
  0xb7   : > { %1460 = vmatprep.subr.bf16.mxu0 %v1799_v0 }
  0xbc   : > { %1425 = vmatmul.mubr.msk.bf16.vlgmr.msra.gmra.mrb[0].mxu1 %vm348_vm0, %v584_v13 }
  0xbd   : > { %1457 = vmatmul.mubr.msk.bf16.vlgmr.msra.gmra.mrb[0].mxu0 %vm348_vm0, %v989_v14 }
  0xbe   : > { %1461 = vmatpush3.bf16.msra.mxu0 %v1597_v15  ;;  %1464 = vmatprep.mubr.msk.bf16.mxu0 %vm1800_vm4, %v1799_v0 }
  0xbf   : > { %1462 = vmatprep.subr.bf16.mxu0 %v1799_v0 }
  0xc2   : > { %1463 = vmatpush3.bf16.msra.mxu0 %v1598_v18 }
  0xc9   : > { %1465 = vmatmul.mubr.msk.bf16.vlgmr.msra.gmra.mrb[0].mxu0 %vm348_vm0, %v1085_v20 }
 0x18f   : > { %v634_v21 = vpop.f32.mrb[0].mxu1 }
 0x190   : > { %v1426_v22 = vpop.f32.mrb[1].mxu1 }
 0x191   : > { %v637_v23 = vpop.f32.mrb[2].mxu1 }
 0x192   : > { %v1427_v25 = vpop.f32.mrb[3].mxu1 }
 0x19c   : > { %v1135_v26 = vpop.f32.mrb[0].mxu0 }
 0x19d   : > { %v1468_v27 = vadd.f32 %v1135_v26, %v634_v21  ;;  %v1466_v28 = vpop.f32.mrb[1].mxu0 }
 0x19e   : > { %v1138_v29 = vpop.f32.mrb[2].mxu0 }
 0x19f   : > { %v1467_v30 = vpop.f32.mrb[3].mxu0  ;;  %v1143_v0 = vsel %vm1142_vm1, %v1468_v27, 0.0 }
 0x1a0   : > { %1144 = vadd.xlane.f32.xlu0 %v1143_v0 }
 0x22d   : > { %v1145_v31 = vpop.xlane.xlu0 %1144 }
 0x22e   : > { %v1147_v32 = vmul.f32 0.03125, %v1145_v31 }
 0x230   : > { %v1148_v24 = vsub.f32 %v1468_v27, %v1147_v32 }
 0x232   : > { %v1149_v33 = vmul.f32 %v1148_v24, %v1148_v24 }
 0x234   : > { %v1150_v34 = vsel %vm1142_vm1, %v1149_v33, 0.0 }
 0x235   : > { %1151 = vadd.xlane.f32.xlu0 %v1150_v34 }
 0x2c2   : > { %v1152_v35 = vpop.xlane.xlu0 %1151 }
 0x2c3   : > { %v1153_v36 = vmul.f32 0.03125, %v1152_v35 }
 0x2c5   : > { %v1154_v37 = vadd.f32 1e-06, %v1153_v36 }
 0x2c7   : > { %1599 = vrsqrt.f32 %v1154_v37 }
 0x2d1   : > { %v1600_v38 = vpop.eup %1599 }
 0x2d2   : > { %v1156_v40 = vmul.f32 %v1600_v38, %v1148_v24 }
 0x2d4   : > { %v1164_v42 = vmul.f32 %v1362_v39, %v1156_v40 }
 0x2d6   : > { %v1172_v43 = vadd.f32 %v1363_v41, %v1164_v42 }
 0x2d8   : > { %1173 = vst.msk [vmem:[%s255_s29] sm:$0xf] %vm1142_vm1, %v1172_v43 }
 0x2d9   : > { %1728 = shalt.err (!%p1725_p4)
}
 0x2da   : > { %s1729_s5 = scalar_lea.hbm %s2153_s20, 64  ;;  %s1733_s11 = scalar_lea.hbm %s2202_s4, 128 }
 0x2db   : > { %p1730_p9 = scmp.ne.s32.totalorder %s2153_s20, %s1729_s5  ;;  %p1734_p8 = scmp.lt.u32.totalorder %s2153_s20, %s2202_s4 }
 0x2dc   : > { %p1735_p13 = scmp.lt.u32.totalorder %s1733_s11, %s1729_s5  ;;  %p1737_p10 = scmp.lt.u32.totalorder %s1729_s5, %s2153_s20 }
 0x2dd   : > { %p1731_p0 = pnand %p1730_p9, %p1974_p5 }
 0x2de   : > { %p1736_p6 = por %p1735_p13, %p1734_p8 }
 0x2df   : > { %p1732_p11 = pneg %p1731_p0 }
 0x2e0   : > { %p1738_p3 = por %p1737_p10, %p1736_p6 }
 0x2e2   : > { %p1739_p7 = pnand %p1738_p3, %p1732_p11 }
 0x2e4   : > { %1742 = shalt.err (!%p1739_p7)
}
 0x2e5   : > { %1511 = dma.vmem_to_hbm [thread:$0]  (%p1974_p5), %s2155_s6, 64, %s2153_s20, %s1175_s14  }
 0x2e6 PF: > { %s1200_s21 = sand.u32 1, %s1777_s15   ;;  %p2224_p12 = scmp.ne.s32.totalorder %s2207_s22, 0 }
 0x2e7   : > { %p2225_p2 = scmp.ge.s32.totalorder %s1789_s18, 2  ;;  %s1201_s23 = scalar_lea.sflag [#allocation4], %s1200_s21 }
 0x2e9   : > { %p1528_p1 = pnand %p2225_p2, %p2224_p12 }
 0x2eb   : > { %1772 = dma.done.wait (!%p1528_p1), %s1201_s23, 64  }
 0x2ec   : > { %1774 = vsyncadd (!%p1528_p1), %s1201_s23, 4294967232  ;;  %p19_p4 = scmp.ge.s32.totalorder %s1960_s10, 4   ;;  %s2226_s15 = smov %s1781_s16 }
 0x2ed   : > { %s2227_s16 = smov %s1785_s17  ;;  %s2228_s17 = smov %s1970_s12 }
 0x2ee   : > { %s2229_s18 = smov %s1960_s10  ;;  %21 = sbr.rel (!%p19_p4) target bundleno = 7 (0x7), region = 103 }
 0x2f5   :  { %1206 = vsyncpa [#allocation3], 1 }
 0x2f6   :  { %1208 = vsyncpa [#allocation3 + $0x1], 1 }
 0x2f7   :  { %1209 = vsyncpa [#allocation6], 1 }
 0x2f8   :  { %1210 = vsyncpa [#allocation9], 1 }
 0x2f9   :  { %1211 = vsyncpa [#allocation4], 1 }
 0x2fa   :  { %1213 = vsyncpa [#allocation4 + $0x1], 1 }

</bundles_post_ra>
